<compile_context>
chip_gen: v7x
topology: tpu7x:2x2x1
jax: 0.10.0
libtpu: 0.0.40
codegen_flags: <defaults>
</compile_context>

<pallas_src>
import jax
import jax.numpy as jnp
from jax.experimental import pallas as pl
from jax.experimental.pallas import tpu as pltpu


def _full_spec(shape):
    return pl.BlockSpec(shape, lambda i: (0,) * len(shape))


# ------------------------- fused BiLSTM + strided Conv1d kernel -------------------------
def _letter_classifier_kernel(x_ref, wih_ref, bias_ref, whh_f_ref, whh_r_ref,
                              wlo_ref, whi_ref, cb_ref,
                              out_ref,
                              xp2_ref, xpf_ref, xpr_ref, buf_ref):
    """Shapes (all static):
       x_ref:    (T*B, D)          bf16   time-major, rows ordered (t, b)
       wih_ref:  (D, 8*Hp)         bf16   [fwd gates | rev gates], gate order i,f,g,o, Hp lanes/gate
       bias_ref: (1, 8*Hp)         f32    b_ih + b_hh, same layout
       whh_*:    (Hp, 4*Hp)        bf16
       wlo/whi:  (stride*2Hp, Np)  bf16   conv taps [0:stride) / [stride:K)
       cb_ref:   (1, Np)           f32
       out_ref:  (B, L_out, Np)    f32
       scratch:  xp2 (T*B, 8Hp) f32, xpf/xpr (T, B, 4Hp) f32, buf (Q, B, stride*2Hp) bf16
    """
    T, B, G = xpf_ref.shape          # G = 4*Hp
    Hp = G // 4
    C2p = 2 * Hp
    Q = buf_ref.shape[0]
    stride = buf_ref.shape[2] // C2p
    L_out = out_ref.shape[1]
    f32 = jnp.float32

    # ---- 1) Input projection for both directions: one big MXU matmul, bias folded in.
    xp2_ref[...] = (jnp.dot(x_ref[...], wih_ref[...], preferred_element_type=f32)
                    + bias_ref[...])

    # Repack (static, one-time) into per-timestep leading-dim-indexable scratches.
    for t in range(T):
        row = xp2_ref[pl.ds(t * B, B), :]          # (B, 2G) f32
        xpf_ref[pl.ds(t, 1)] = row[:, :G][None]
        xpr_ref[pl.ds(t, 1)] = row[:, G:][None]

    # ---- 2) Bidirectional recurrence (only h @ Whh on the serial path).
    whh_f = whh_f_ref[...]                          # hoisted out of the loop
    whh_r = whh_r_ref[...]

    def cell(pre, c):
        # pre: (B, 4*Hp) f32; gate slices are 128-lane aligned static views.
        i = jax.nn.sigmoid(pre[:, 0 * Hp:1 * Hp])
        f = jax.nn.sigmoid(pre[:, 1 * Hp:2 * Hp])
        g = jnp.tanh(pre[:, 2 * Hp:3 * Hp])
        o = jax.nn.sigmoid(pre[:, 3 * Hp:4 * Hp])
        c_new = f * c + i * g
        h_new = o * jnp.tanh(c_new)
        return h_new.astype(jnp.bfloat16), c_new    # h kept bf16 (matmul-only use), c in f32

    h0 = jnp.zeros((B, Hp), jnp.bfloat16)
    c0 = jnp.zeros((B, Hp), f32)

    def q_step(q, carry):
        hf, cf, hr, cr = carry
        qr = Q - 1 - q
        for s in range(stride):                     # static x`stride` unroll per fori step
            t = q * stride + s                      # forward time index
            sr = stride - 1 - s
            tr = qr * stride + sr                   # reverse time index = T-1-t
            # forward direction
            pre_f = xpf_ref[pl.ds(t, 1)][0] + jnp.dot(hf, whh_f, preferred_element_type=f32)
            hf, cf = cell(pre_f, cf)
            buf_ref[pl.ds(q, 1), :, pl.ds(s * C2p, Hp)] = hf[None]
            # reverse direction
            pre_r = xpr_ref[pl.ds(tr, 1)][0] + jnp.dot(hr, whh_r, preferred_element_type=f32)
            hr, cr = cell(pre_r, cr)
            buf_ref[pl.ds(qr, 1), :, pl.ds(sr * C2p + Hp, Hp)] = hr[None]
        return hf, cf, hr, cr

    jax.lax.fori_loop(0, Q, q_step, (h0, c0, h0, c0))

    # ---- 3) Strided Conv1d: since K == 2*stride, window p = blocks (p, p+1) of `buf`.
    w_lo = wlo_ref[...]
    w_hi = whi_ref[...]
    cbias = cb_ref[...]                             # (1, Np) broadcast once per window
    for p in range(L_out):
        acc = cbias + jnp.dot(buf_ref[p], w_lo, preferred_element_type=f32)
        acc = acc + jnp.dot(buf_ref[p + 1], w_hi, preferred_element_type=f32)
        out_ref[:, pl.ds(p, 1), :] = acc[:, None, :]     # batch-first, lane-dense store


# --------------------------------- parameter packing ------------------------------------
def prepare_params(canon, kernel_size=8):
    """canon holds PyTorch-convention tensors:
       w_ih_{f,r}: (4H, D)  w_hh_{f,r}: (4H, H)  b_ih/b_hh_{f,r}: (4H,)  gate order i,f,g,o
       conv_w: (N, 2H, K)   conv_b: (N,)
    Returns lane-aligned / bf16 kernel tensors."""
    four_h, D = canon["w_ih_f"].shape
    H = four_h // 4
    Hp = -(-H // 128) * 128
    G = 4 * Hp
    C2p = 2 * Hp
    stride = kernel_size // 2
    N = canon["conv_w"].shape[0]
    Np = -(-N // 128) * 128

    wih_cat = jnp.zeros((D, 2 * G), jnp.float32)
    bias_cat = jnp.zeros((1, 2 * G), jnp.float32)
    whh_pad = []
    for di, d in enumerate(("f", "r")):
        wih = canon[f"w_ih_{d}"]
        whh = canon[f"w_hh_{d}"]
        b = canon[f"b_ih_{d}"] + canon[f"b_hh_{d}"]
        wp = jnp.zeros((Hp, G), jnp.float32)
        for g in range(4):
            col0 = di * G + g * Hp
            wih_cat = wih_cat.at[:, col0:col0 + H].set(wih[g * H:(g + 1) * H, :].T)
            bias_cat = bias_cat.at[0, col0:col0 + H].set(b[g * H:(g + 1) * H])
            wp = wp.at[:H, g * Hp:g * Hp + H].set(whh[g * H:(g + 1) * H, :].T)
        whh_pad.append(wp.astype(jnp.bfloat16))

    w = canon["conv_w"]                                  # (N, 2H, K)
    K = w.shape[2]
    wf = jnp.zeros((K, C2p, Np), jnp.float32)
    wf = wf.at[:, :H, :N].set(jnp.transpose(w[:, :H, :], (2, 1, 0)))          # forward chans
    wf = wf.at[:, Hp:Hp + H, :N].set(jnp.transpose(w[:, H:2 * H, :], (2, 1, 0)))  # reverse chans
    w_lo = wf[:stride].reshape(stride * C2p, Np).astype(jnp.bfloat16)
    w_hi = wf[stride:].reshape(stride * C2p, Np).astype(jnp.bfloat16)
    conv_b = jnp.zeros((1, Np), jnp.float32).at[0, :N].set(canon["conv_b"])

    return dict(wih=wih_cat.astype(jnp.bfloat16), bias=bias_cat,
                whh_f=whh_pad[0], whh_r=whh_pad[1],
                w_lo=w_lo, w_hi=w_hi, conv_b=conv_b,
                hp=Hp, n_pad=Np, n_out=N, stride=stride, kernel_size=K)


# ------------------------------------- wrapper ------------------------------------------
def letter_classifier_forward(features, kp):
    """features: (B, T, dim_encoder) — output of feature_maker (identity stand-in).
    Returns logits (B, L_out, n_letters + 1)."""
    B, T, D = features.shape
    stride, K = kp["stride"], kp["kernel_size"]
    Hp, Np = kp["hp"], kp["n_pad"]
    G = 4 * Hp
    C2p = 2 * Hp
    assert K == 2 * stride, "kernel assumes stride == kernel_size // 2 with even kernel_size"
    assert T % stride == 0 and T >= K, "demo kernel assumes T divisible by stride"
    Q = T // stride
    L_out = (T - K) // stride + 1

    x2d = jnp.transpose(features, (1, 0, 2)).reshape(T * B, D).astype(jnp.bfloat16)
    inputs = (x2d, kp["wih"], kp["bias"], kp["whh_f"], kp["whh_r"],
              kp["w_lo"], kp["w_hi"], kp["conv_b"])

    out_pad = pl.pallas_call(
        _letter_classifier_kernel,
        out_shape=jax.ShapeDtypeStruct((B, L_out, Np), jnp.float32),
        grid=(1,),
        in_specs=[_full_spec(a.shape) for a in inputs],
        out_specs=_full_spec((B, L_out, Np)),
        scratch_shapes=[
            pltpu.VMEM((T * B, 2 * G), jnp.float32),        # input projection (both dirs)
            pltpu.VMEM((T, B, G), jnp.float32),             # per-timestep fwd gate preacts
            pltpu.VMEM((T, B, G), jnp.float32),             # per-timestep rev gate preacts
            pltpu.VMEM((Q, B, stride * C2p), jnp.bfloat16), # conv-layout BiLSTM output
        ],
        compiler_params=pltpu.CompilerParams(
            dimension_semantics=("arbitrary",),
            vmem_limit_bytes=32 * 1024 * 1024),
    )(*inputs)
    return out_pad[:, :, :kp["n_out"]]


# -------------------------------- pure-JAX reference ------------------------------------
def reference_forward(features, canon, kernel_size=8):
    B, T, D = features.shape
    H = canon["w_hh_f"].shape[1]
    stride = kernel_size // 2

    def run_dir(x_btd, w_ih, w_hh, b_ih, b_hh):
        wih, whh, b = w_ih.T, w_hh.T, (b_ih + b_hh)[None]

        def step(carry, x_t):
            h, c = carry
            g = x_t @ wih + h @ whh + b
            i = jax.nn.sigmoid(g[:, :H])
            f = jax.nn.sigmoid(g[:, H:2 * H])
            gg = jnp.tanh(g[:, 2 * H:3 * H])
            o = jax.nn.sigmoid(g[:, 3 * H:])
            c = f * c + i * gg
            h = o * jnp.tanh(c)
            return (h, c), h

        init = (jnp.zeros((B, H), jnp.float32), jnp.zeros((B, H), jnp.float32))
        _, hs = jax.lax.scan(step, init, jnp.transpose(x_btd, (1, 0, 2)))
        return jnp.transpose(hs, (1, 0, 2))

    h_f = run_dir(features, canon["w_ih_f"], canon["w_hh_f"], canon["b_ih_f"], canon["b_hh_f"])
    h_r = run_dir(features[:, ::-1], canon["w_ih_r"], canon["w_hh_r"],
                  canon["b_ih_r"], canon["b_hh_r"])[:, ::-1]
    lstm_out = jnp.concatenate([h_f, h_r], axis=-1)          # (B, T, 2H)

    w, b = canon["conv_w"], canon["conv_b"]                  # (N, 2H, K), (N,)
    N, _, K = w.shape
    L_out = (T - K) // stride + 1
    outs = []
    for p in range(L_out):
        acc = jnp.zeros((B, N), jnp.float32) + b[None, :]
        for k in range(K):
            acc = acc + lstm_out[:, p * stride + k, :] @ w[:, :, k].T
        outs.append(acc)
    return jnp.stack(outs, axis=1)                           # (B, L_out, N)


# ------------------------------------------ main ----------------------------------------
if __name__ == "__main__":
    B, T = 2, 16
    dim_encoder = 32                  # LSTM input size; per-direction hidden = 16
    n_letters = 26
    kernel_size = 8                   # conv kernel, stride = 4
    H = dim_encoder // 2
    N = n_letters + 1

    key = jax.random.PRNGKey(0)
    ks = jax.random.split(key, 12)
    s = 0.1
    canon = {
        "w_ih_f": s * jax.random.normal(ks[0], (4 * H, dim_encoder), jnp.float32),
        "w_hh_f": s * jax.random.normal(ks[1], (4 * H, H), jnp.float32),
        "b_ih_f": s * jax.random.normal(ks[2], (4 * H,), jnp.float32),
        "b_hh_f": s * jax.random.normal(ks[3], (4 * H,), jnp.float32),
        "w_ih_r": s * jax.random.normal(ks[4], (4 * H, dim_encoder), jnp.float32),
        "w_hh_r": s * jax.random.normal(ks[5], (4 * H, H), jnp.float32),
        "b_ih_r": s * jax.random.normal(ks[6], (4 * H,), jnp.float32),
        "b_hh_r": s * jax.random.normal(ks[7], (4 * H,), jnp.float32),
        "conv_w": s * jax.random.normal(ks[8], (N, 2 * H, kernel_size), jnp.float32),
        "conv_b": s * jax.random.normal(ks[9], (N,), jnp.float32),
    }
    kp = prepare_params(canon, kernel_size)

    # feature_maker output (identity stand-in): (B, T, dim_encoder)
    features = jax.random.normal(ks[10], (B, T, dim_encoder), jnp.float32)

    out = jax.block_until_ready(letter_classifier_forward(features, kp))
    ref = jax.block_until_ready(reference_forward(features, canon, kernel_size))

    L_out = (T - kernel_size) // (kernel_size // 2) + 1
    assert out.shape == (B, L_out, N), out.shape
    err = float(jnp.max(jnp.abs(out - ref)))
    assert jnp.allclose(out, ref, atol=2e-2, rtol=2e-2), f"max abs err = {err}"

    print("KERNEL_OK")
</pallas_src>

<mosaic_0001>
module attributes {stable_mosaic.version = 11 : i64} {
  func.func @_letter_classifier_kernel(%arg0: i32, %arg1: memref<32x32xbf16, #tpu.memory_space<vmem>>, %arg2: memref<32x1024xbf16, #tpu.memory_space<vmem>>, %arg3: memref<1x1024xf32, #tpu.memory_space<vmem>>, %arg4: memref<128x512xbf16, #tpu.memory_space<vmem>>, %arg5: memref<128x512xbf16, #tpu.memory_space<vmem>>, %arg6: memref<1024x128xbf16, #tpu.memory_space<vmem>>, %arg7: memref<1024x128xbf16, #tpu.memory_space<vmem>>, %arg8: memref<1x128xf32, #tpu.memory_space<vmem>>, %arg9: memref<2x3x128xf32, #tpu.memory_space<vmem>>, %arg10: memref<32x1024xf32, #tpu.memory_space<vmem>>, %arg11: memref<16x2x512xf32, #tpu.memory_space<vmem>>, %arg12: memref<16x2x512xf32, #tpu.memory_space<vmem>>, %arg13: memref<4x2x1024xbf16, #tpu.memory_space<vmem>>) attributes {dimension_semantics = [#tpu.dimension_semantics<arbitrary>], iteration_bounds = array<i64: 1>, scalar_prefetch = 0 : i64, scratch_operands = 4 : i64, tpu.core_type = #tpu.core_type<tc>, window_params = [{pipeline_mode = #tpu.pipeline_mode<synchronous>, transform_indices = @transform_0, window_bounds = array<i64: 32, 32>}, {pipeline_mode = #tpu.pipeline_mode<synchronous>, transform_indices = @transform_1, window_bounds = array<i64: 32, 1024>}, {pipeline_mode = #tpu.pipeline_mode<synchronous>, transform_indices = @transform_2, window_bounds = array<i64: 1, 1024>}, {pipeline_mode = #tpu.pipeline_mode<synchronous>, transform_indices = @transform_3, window_bounds = array<i64: 128, 512>}, {pipeline_mode = #tpu.pipeline_mode<synchronous>, transform_indices = @transform_4, window_bounds = array<i64: 128, 512>}, {pipeline_mode = #tpu.pipeline_mode<synchronous>, transform_indices = @transform_5, window_bounds = array<i64: 1024, 128>}, {pipeline_mode = #tpu.pipeline_mode<synchronous>, transform_indices = @transform_6, window_bounds = array<i64: 1024, 128>}, {pipeline_mode = #tpu.pipeline_mode<synchronous>, transform_indices = @transform_7, window_bounds = array<i64: 1, 128>}, {pipeline_mode = #tpu.pipeline_mode<synchronous>, transform_indices = @transform_8, window_bounds = array<i64: 2, 3, 128>}]} {
    %c0 = arith.constant 0 : index
    %c0_0 = arith.constant 0 : index
    %0 = vector.load %arg1[%c0, %c0_0] : memref<32x32xbf16, #tpu.memory_space<vmem>>, vector<32x32xbf16>
    %c0_1 = arith.constant 0 : index
    %c0_2 = arith.constant 0 : index
    %1 = vector.load %arg2[%c0_1, %c0_2] : memref<32x1024xbf16, #tpu.memory_space<vmem>>, vector<32x1024xbf16>
    %cst = arith.constant dense<0.000000e+00> : vector<32x1024xf32>
    %2 = tpu.matmul %0, %1, %cst {dimension_numbers = #tpu.dot_dimension_numbers<[1], [0], [0], [1], [0, 0, 1, 1], [], []>} : vector<32x32xbf16>, vector<32x1024xbf16>, vector<32x1024xf32> -> vector<32x1024xf32>
    %c0_3 = arith.constant 0 : index
    %c0_4 = arith.constant 0 : index
    %3 = vector.load %arg3[%c0_3, %c0_4] : memref<1x1024xf32, #tpu.memory_space<vmem>>, vector<1x1024xf32>
    %4 = vector.broadcast %3 : vector<1x1024xf32> to vector<32x1024xf32>
    %5 = arith.addf %2, %4 : vector<32x1024xf32>
    %c0_5 = arith.constant 0 : index
    %c0_6 = arith.constant 0 : index
    %6 = vector.load %arg10[%c0_5, %c0_6] : memref<32x1024xf32, #tpu.memory_space<vmem>>, vector<32x1024xf32>
    tpu.vector_store %arg10[%c0_5, %c0_6], %5 {strides = array<i32>} : memref<32x1024xf32, #tpu.memory_space<vmem>>, vector<32x1024xf32>,
    %c0_7 = arith.constant 0 : index
    %c0_8 = arith.constant 0 : index
    %7 = vector.load %arg10[%c0_7, %c0_8] : memref<32x1024xf32, #tpu.memory_space<vmem>>, vector<2x1024xf32>
    %8 = vector.extract_strided_slice %7 {offsets = [0, 0], sizes = [2, 512], strides = [1, 1]} : vector<2x1024xf32> to vector<2x512xf32>
    %9 = vector.shape_cast %8 : vector<2x512xf32> to vector<1x2x512xf32>
    %c0_9 = arith.constant 0 : index
    %c0_10 = arith.constant 0 : index
    %c0_11 = arith.constant 0 : index
    %10 = vector.load %arg11[%c0_9, %c0_10, %c0_11] : memref<16x2x512xf32, #tpu.memory_space<vmem>>, vector<1x2x512xf32>
    tpu.vector_store %arg11[%c0_9, %c0_10, %c0_11], %9 {strides = array<i32>} : memref<16x2x512xf32, #tpu.memory_space<vmem>>, vector<1x2x512xf32>,
    %11 = vector.extract_strided_slice %7 {offsets = [0, 512], sizes = [2, 512], strides = [1, 1]} : vector<2x1024xf32> to vector<2x512xf32>
    %12 = vector.shape_cast %11 : vector<2x512xf32> to vector<1x2x512xf32>
    %c0_12 = arith.constant 0 : index
    %c0_13 = arith.constant 0 : index
    %c0_14 = arith.constant 0 : index
    %13 = vector.load %arg12[%c0_12, %c0_13, %c0_14] : memref<16x2x512xf32, #tpu.memory_space<vmem>>, vector<1x2x512xf32>
    tpu.vector_store %arg12[%c0_12, %c0_13, %c0_14], %12 {strides = array<i32>} : memref<16x2x512xf32, #tpu.memory_space<vmem>>, vector<1x2x512xf32>,
    %c2 = arith.constant 2 : index
    %c0_15 = arith.constant 0 : index
    %14 = vector.load %arg10[%c2, %c0_15] : memref<32x1024xf32, #tpu.memory_space<vmem>>, vector<2x1024xf32>
    %15 = vector.extract_strided_slice %14 {offsets = [0, 0], sizes = [2, 512], strides = [1, 1]} : vector<2x1024xf32> to vector<2x512xf32>
    %16 = vector.shape_cast %15 : vector<2x512xf32> to vector<1x2x512xf32>
    %c1 = arith.constant 1 : index
    %c0_16 = arith.constant 0 : index
    %c0_17 = arith.constant 0 : index
    %17 = vector.load %arg11[%c1, %c0_16, %c0_17] : memref<16x2x512xf32, #tpu.memory_space<vmem>>, vector<1x2x512xf32>
    tpu.vector_store %arg11[%c1, %c0_16, %c0_17], %16 {strides = array<i32>} : memref<16x2x512xf32, #tpu.memory_space<vmem>>, vector<1x2x512xf32>,
    %18 = vector.extract_strided_slice %14 {offsets = [0, 512], sizes = [2, 512], strides = [1, 1]} : vector<2x1024xf32> to vector<2x512xf32>
    %19 = vector.shape_cast %18 : vector<2x512xf32> to vector<1x2x512xf32>
    %c1_18 = arith.constant 1 : index
    %c0_19 = arith.constant 0 : index
    %c0_20 = arith.constant 0 : index
    %20 = vector.load %arg12[%c1_18, %c0_19, %c0_20] : memref<16x2x512xf32, #tpu.memory_space<vmem>>, vector<1x2x512xf32>
    tpu.vector_store %arg12[%c1_18, %c0_19, %c0_20], %19 {strides = array<i32>} : memref<16x2x512xf32, #tpu.memory_space<vmem>>, vector<1x2x512xf32>,
    %c4 = arith.constant 4 : index
    %c0_21 = arith.constant 0 : index
    %21 = vector.load %arg10[%c4, %c0_21] : memref<32x1024xf32, #tpu.memory_space<vmem>>, vector<2x1024xf32>
    %22 = vector.extract_strided_slice %21 {offsets = [0, 0], sizes = [2, 512], strides = [1, 1]} : vector<2x1024xf32> to vector<2x512xf32>
    %23 = vector.shape_cast %22 : vector<2x512xf32> to vector<1x2x512xf32>
    %c2_22 = arith.constant 2 : index
    %c0_23 = arith.constant 0 : index
    %c0_24 = arith.constant 0 : index
    %24 = vector.load %arg11[%c2_22, %c0_23, %c0_24] : memref<16x2x512xf32, #tpu.memory_space<vmem>>, vector<1x2x512xf32>
    tpu.vector_store %arg11[%c2_22, %c0_23, %c0_24], %23 {strides = array<i32>} : memref<16x2x512xf32, #tpu.memory_space<vmem>>, vector<1x2x512xf32>,
    %25 = vector.extract_strided_slice %21 {offsets = [0, 512], sizes = [2, 512], strides = [1, 1]} : vector<2x1024xf32> to vector<2x512xf32>
    %26 = vector.shape_cast %25 : vector<2x512xf32> to vector<1x2x512xf32>
    %c2_25 = arith.constant 2 : index
    %c0_26 = arith.constant 0 : index
    %c0_27 = arith.constant 0 : index
    %27 = vector.load %arg12[%c2_25, %c0_26, %c0_27] : memref<16x2x512xf32, #tpu.memory_space<vmem>>, vector<1x2x512xf32>
    tpu.vector_store %arg12[%c2_25, %c0_26, %c0_27], %26 {strides = array<i32>} : memref<16x2x512xf32, #tpu.memory_space<vmem>>, vector<1x2x512xf32>,
    %c6 = arith.constant 6 : index
    %c0_28 = arith.constant 0 : index
    %28 = vector.load %arg10[%c6, %c0_28] : memref<32x1024xf32, #tpu.memory_space<vmem>>, vector<2x1024xf32>
    %29 = vector.extract_strided_slice %28 {offsets = [0, 0], sizes = [2, 512], strides = [1, 1]} : vector<2x1024xf32> to vector<2x512xf32>
    %30 = vector.shape_cast %29 : vector<2x512xf32> to vector<1x2x512xf32>
    %c3 = arith.constant 3 : index
    %c0_29 = arith.constant 0 : index
    %c0_30 = arith.constant 0 : index
    %31 = vector.load %arg11[%c3, %c0_29, %c0_30] : memref<16x2x512xf32, #tpu.memory_space<vmem>>, vector<1x2x512xf32>
    tpu.vector_store %arg11[%c3, %c0_29, %c0_30], %30 {strides = array<i32>} : memref<16x2x512xf32, #tpu.memory_space<vmem>>, vector<1x2x512xf32>,
    %32 = vector.extract_strided_slice %28 {offsets = [0, 512], sizes = [2, 512], strides = [1, 1]} : vector<2x1024xf32> to vector<2x512xf32>
    %33 = vector.shape_cast %32 : vector<2x512xf32> to vector<1x2x512xf32>
    %c3_31 = arith.constant 3 : index
    %c0_32 = arith.constant 0 : index
    %c0_33 = arith.constant 0 : index
    %34 = vector.load %arg12[%c3_31, %c0_32, %c0_33] : memref<16x2x512xf32, #tpu.memory_space<vmem>>, vector<1x2x512xf32>
    tpu.vector_store %arg12[%c3_31, %c0_32, %c0_33], %33 {strides = array<i32>} : memref<16x2x512xf32, #tpu.memory_space<vmem>>, vector<1x2x512xf32>,
    %c8 = arith.constant 8 : index
    %c0_34 = arith.constant 0 : index
    %35 = vector.load %arg10[%c8, %c0_34] : memref<32x1024xf32, #tpu.memory_space<vmem>>, vector<2x1024xf32>
    %36 = vector.extract_strided_slice %35 {offsets = [0, 0], sizes = [2, 512], strides = [1, 1]} : vector<2x1024xf32> to vector<2x512xf32>
    %37 = vector.shape_cast %36 : vector<2x512xf32> to vector<1x2x512xf32>
    %c4_35 = arith.constant 4 : index
    %c0_36 = arith.constant 0 : index
    %c0_37 = arith.constant 0 : index
    %38 = vector.load %arg11[%c4_35, %c0_36, %c0_37] : memref<16x2x512xf32, #tpu.memory_space<vmem>>, vector<1x2x512xf32>
    tpu.vector_store %arg11[%c4_35, %c0_36, %c0_37], %37 {strides = array<i32>} : memref<16x2x512xf32, #tpu.memory_space<vmem>>, vector<1x2x512xf32>,
    %39 = vector.extract_strided_slice %35 {offsets = [0, 512], sizes = [2, 512], strides = [1, 1]} : vector<2x1024xf32> to vector<2x512xf32>
    %40 = vector.shape_cast %39 : vector<2x512xf32> to vector<1x2x512xf32>
    %c4_38 = arith.constant 4 : index
    %c0_39 = arith.constant 0 : index
    %c0_40 = arith.constant 0 : index
    %41 = vector.load %arg12[%c4_38, %c0_39, %c0_40] : memref<16x2x512xf32, #tpu.memory_space<vmem>>, vector<1x2x512xf32>
    tpu.vector_store %arg12[%c4_38, %c0_39, %c0_40], %40 {strides = array<i32>} : memref<16x2x512xf32, #tpu.memory_space<vmem>>, vector<1x2x512xf32>,
    %c10 = arith.constant 10 : index
    %c0_41 = arith.constant 0 : index
    %42 = vector.load %arg10[%c10, %c0_41] : memref<32x1024xf32, #tpu.memory_space<vmem>>, vector<2x1024xf32>
    %43 = vector.extract_strided_slice %42 {offsets = [0, 0], sizes = [2, 512], strides = [1, 1]} : vector<2x1024xf32> to vector<2x512xf32>
    %44 = vector.shape_cast %43 : vector<2x512xf32> to vector<1x2x512xf32>
    %c5 = arith.constant 5 : index
    %c0_42 = arith.constant 0 : index
    %c0_43 = arith.constant 0 : index
    %45 = vector.load %arg11[%c5, %c0_42, %c0_43] : memref<16x2x512xf32, #tpu.memory_space<vmem>>, vector<1x2x512xf32>
    tpu.vector_store %arg11[%c5, %c0_42, %c0_43], %44 {strides = array<i32>} : memref<16x2x512xf32, #tpu.memory_space<vmem>>, vector<1x2x512xf32>,
    %46 = vector.extract_strided_slice %42 {offsets = [0, 512], sizes = [2, 512], strides = [1, 1]} : vector<2x1024xf32> to vector<2x512xf32>
    %47 = vector.shape_cast %46 : vector<2x512xf32> to vector<1x2x512xf32>
    %c5_44 = arith.constant 5 : index
    %c0_45 = arith.constant 0 : index
    %c0_46 = arith.constant 0 : index
    %48 = vector.load %arg12[%c5_44, %c0_45, %c0_46] : memref<16x2x512xf32, #tpu.memory_space<vmem>>, vector<1x2x512xf32>
    tpu.vector_store %arg12[%c5_44, %c0_45, %c0_46], %47 {strides = array<i32>} : memref<16x2x512xf32, #tpu.memory_space<vmem>>, vector<1x2x512xf32>,
    %c12 = arith.constant 12 : index
    %c0_47 = arith.constant 0 : index
    %49 = vector.load %arg10[%c12, %c0_47] : memref<32x1024xf32, #tpu.memory_space<vmem>>, vector<2x1024xf32>
    %50 = vector.extract_strided_slice %49 {offsets = [0, 0], sizes = [2, 512], strides = [1, 1]} : vector<2x1024xf32> to vector<2x512xf32>
    %51 = vector.shape_cast %50 : vector<2x512xf32> to vector<1x2x512xf32>
    %c6_48 = arith.constant 6 : index
    %c0_49 = arith.constant 0 : index
    %c0_50 = arith.constant 0 : index
    %52 = vector.load %arg11[%c6_48, %c0_49, %c0_50] : memref<16x2x512xf32, #tpu.memory_space<vmem>>, vector<1x2x512xf32>
    tpu.vector_store %arg11[%c6_48, %c0_49, %c0_50], %51 {strides = array<i32>} : memref<16x2x512xf32, #tpu.memory_space<vmem>>, vector<1x2x512xf32>,
    %53 = vector.extract_strided_slice %49 {offsets = [0, 512], sizes = [2, 512], strides = [1, 1]} : vector<2x1024xf32> to vector<2x512xf32>
    %54 = vector.shape_cast %53 : vector<2x512xf32> to vector<1x2x512xf32>
    %c6_51 = arith.constant 6 : index
    %c0_52 = arith.constant 0 : index
    %c0_53 = arith.constant 0 : index
    %55 = vector.load %arg12[%c6_51, %c0_52, %c0_53] : memref<16x2x512xf32, #tpu.memory_space<vmem>>, vector<1x2x512xf32>
    tpu.vector_store %arg12[%c6_51, %c0_52, %c0_53], %54 {strides = array<i32>} : memref<16x2x512xf32, #tpu.memory_space<vmem>>, vector<1x2x512xf32>,
    %c14 = arith.constant 14 : index
    %c0_54 = arith.constant 0 : index
    %56 = vector.load %arg10[%c14, %c0_54] : memref<32x1024xf32, #tpu.memory_space<vmem>>, vector<2x1024xf32>
    %57 = vector.extract_strided_slice %56 {offsets = [0, 0], sizes = [2, 512], strides = [1, 1]} : vector<2x1024xf32> to vector<2x512xf32>
    %58 = vector.shape_cast %57 : vector<2x512xf32> to vector<1x2x512xf32>
    %c7 = arith.constant 7 : index
    %c0_55 = arith.constant 0 : index
    %c0_56 = arith.constant 0 : index
    %59 = vector.load %arg11[%c7, %c0_55, %c0_56] : memref<16x2x512xf32, #tpu.memory_space<vmem>>, vector<1x2x512xf32>
    tpu.vector_store %arg11[%c7, %c0_55, %c0_56], %58 {strides = array<i32>} : memref<16x2x512xf32, #tpu.memory_space<vmem>>, vector<1x2x512xf32>,
    %60 = vector.extract_strided_slice %56 {offsets = [0, 512], sizes = [2, 512], strides = [1, 1]} : vector<2x1024xf32> to vector<2x512xf32>
    %61 = vector.shape_cast %60 : vector<2x512xf32> to vector<1x2x512xf32>
    %c7_57 = arith.constant 7 : index
    %c0_58 = arith.constant 0 : index
    %c0_59 = arith.constant 0 : index
    %62 = vector.load %arg12[%c7_57, %c0_58, %c0_59] : memref<16x2x512xf32, #tpu.memory_space<vmem>>, vector<1x2x512xf32>
    tpu.vector_store %arg12[%c7_57, %c0_58, %c0_59], %61 {strides = array<i32>} : memref<16x2x512xf32, #tpu.memory_space<vmem>>, vector<1x2x512xf32>,
    %c16 = arith.constant 16 : index
    %c0_60 = arith.constant 0 : index
    %63 = vector.load %arg10[%c16, %c0_60] : memref<32x1024xf32, #tpu.memory_space<vmem>>, vector<2x1024xf32>
    %64 = vector.extract_strided_slice %63 {offsets = [0, 0], sizes = [2, 512], strides = [1, 1]} : vector<2x1024xf32> to vector<2x512xf32>
    %65 = vector.shape_cast %64 : vector<2x512xf32> to vector<1x2x512xf32>
    %c8_61 = arith.constant 8 : index
    %c0_62 = arith.constant 0 : index
    %c0_63 = arith.constant 0 : index
    %66 = vector.load %arg11[%c8_61, %c0_62, %c0_63] : memref<16x2x512xf32, #tpu.memory_space<vmem>>, vector<1x2x512xf32>
    tpu.vector_store %arg11[%c8_61, %c0_62, %c0_63], %65 {strides = array<i32>} : memref<16x2x512xf32, #tpu.memory_space<vmem>>, vector<1x2x512xf32>,
    %67 = vector.extract_strided_slice %63 {offsets = [0, 512], sizes = [2, 512], strides = [1, 1]} : vector<2x1024xf32> to vector<2x512xf32>
    %68 = vector.shape_cast %67 : vector<2x512xf32> to vector<1x2x512xf32>
    %c8_64 = arith.constant 8 : index
    %c0_65 = arith.constant 0 : index
    %c0_66 = arith.constant 0 : index
    %69 = vector.load %arg12[%c8_64, %c0_65, %c0_66] : memref<16x2x512xf32, #tpu.memory_space<vmem>>, vector<1x2x512xf32>
    tpu.vector_store %arg12[%c8_64, %c0_65, %c0_66], %68 {strides = array<i32>} : memref<16x2x512xf32, #tpu.memory_space<vmem>>, vector<1x2x512xf32>,
    %c18 = arith.constant 18 : index
    %c0_67 = arith.constant 0 : index
    %70 = vector.load %arg10[%c18, %c0_67] : memref<32x1024xf32, #tpu.memory_space<vmem>>, vector<2x1024xf32>
    %71 = vector.extract_strided_slice %70 {offsets = [0, 0], sizes = [2, 512], strides = [1, 1]} : vector<2x1024xf32> to vector<2x512xf32>
    %72 = vector.shape_cast %71 : vector<2x512xf32> to vector<1x2x512xf32>
    %c9 = arith.constant 9 : index
    %c0_68 = arith.constant 0 : index
    %c0_69 = arith.constant 0 : index
    %73 = vector.load %arg11[%c9, %c0_68, %c0_69] : memref<16x2x512xf32, #tpu.memory_space<vmem>>, vector<1x2x512xf32>
    tpu.vector_store %arg11[%c9, %c0_68, %c0_69], %72 {strides = array<i32>} : memref<16x2x512xf32, #tpu.memory_space<vmem>>, vector<1x2x512xf32>,
    %74 = vector.extract_strided_slice %70 {offsets = [0, 512], sizes = [2, 512], strides = [1, 1]} : vector<2x1024xf32> to vector<2x512xf32>
    %75 = vector.shape_cast %74 : vector<2x512xf32> to vector<1x2x512xf32>
    %c9_70 = arith.constant 9 : index
    %c0_71 = arith.constant 0 : index
    %c0_72 = arith.constant 0 : index
    %76 = vector.load %arg12[%c9_70, %c0_71, %c0_72] : memref<16x2x512xf32, #tpu.memory_space<vmem>>, vector<1x2x512xf32>
    tpu.vector_store %arg12[%c9_70, %c0_71, %c0_72], %75 {strides = array<i32>} : memref<16x2x512xf32, #tpu.memory_space<vmem>>, vector<1x2x512xf32>,
    %c20 = arith.constant 20 : index
    %c0_73 = arith.constant 0 : index
    %77 = vector.load %arg10[%c20, %c0_73] : memref<32x1024xf32, #tpu.memory_space<vmem>>, vector<2x1024xf32>
    %78 = vector.extract_strided_slice %77 {offsets = [0, 0], sizes = [2, 512], strides = [1, 1]} : vector<2x1024xf32> to vector<2x512xf32>
    %79 = vector.shape_cast %78 : vector<2x512xf32> to vector<1x2x512xf32>
    %c10_74 = arith.constant 10 : index
    %c0_75 = arith.constant 0 : index
    %c0_76 = arith.constant 0 : index
    %80 = vector.load %arg11[%c10_74, %c0_75, %c0_76] : memref<16x2x512xf32, #tpu.memory_space<vmem>>, vector<1x2x512xf32>
    tpu.vector_store %arg11[%c10_74, %c0_75, %c0_76], %79 {strides = array<i32>} : memref<16x2x512xf32, #tpu.memory_space<vmem>>, vector<1x2x512xf32>,
    %81 = vector.extract_strided_slice %77 {offsets = [0, 512], sizes = [2, 512], strides = [1, 1]} : vector<2x1024xf32> to vector<2x512xf32>
    %82 = vector.shape_cast %81 : vector<2x512xf32> to vector<1x2x512xf32>
    %c10_77 = arith.constant 10 : index
    %c0_78 = arith.constant 0 : index
    %c0_79 = arith.constant 0 : index
    %83 = vector.load %arg12[%c10_77, %c0_78, %c0_79] : memref<16x2x512xf32, #tpu.memory_space<vmem>>, vector<1x2x512xf32>
    tpu.vector_store %arg12[%c10_77, %c0_78, %c0_79], %82 {strides = array<i32>} : memref<16x2x512xf32, #tpu.memory_space<vmem>>, vector<1x2x512xf32>,
    %c22 = arith.constant 22 : index
    %c0_80 = arith.constant 0 : index
    %84 = vector.load %arg10[%c22, %c0_80] : memref<32x1024xf32, #tpu.memory_space<vmem>>, vector<2x1024xf32>
    %85 = vector.extract_strided_slice %84 {offsets = [0, 0], sizes = [2, 512], strides = [1, 1]} : vector<2x1024xf32> to vector<2x512xf32>
    %86 = vector.shape_cast %85 : vector<2x512xf32> to vector<1x2x512xf32>
    %c11 = arith.constant 11 : index
    %c0_81 = arith.constant 0 : index
    %c0_82 = arith.constant 0 : index
    %87 = vector.load %arg11[%c11, %c0_81, %c0_82] : memref<16x2x512xf32, #tpu.memory_space<vmem>>, vector<1x2x512xf32>
    tpu.vector_store %arg11[%c11, %c0_81, %c0_82], %86 {strides = array<i32>} : memref<16x2x512xf32, #tpu.memory_space<vmem>>, vector<1x2x512xf32>,
    %88 = vector.extract_strided_slice %84 {offsets = [0, 512], sizes = [2, 512], strides = [1, 1]} : vector<2x1024xf32> to vector<2x512xf32>
    %89 = vector.shape_cast %88 : vector<2x512xf32> to vector<1x2x512xf32>
    %c11_83 = arith.constant 11 : index
    %c0_84 = arith.constant 0 : index
    %c0_85 = arith.constant 0 : index
    %90 = vector.load %arg12[%c11_83, %c0_84, %c0_85] : memref<16x2x512xf32, #tpu.memory_space<vmem>>, vector<1x2x512xf32>
    tpu.vector_store %arg12[%c11_83, %c0_84, %c0_85], %89 {strides = array<i32>} : memref<16x2x512xf32, #tpu.memory_space<vmem>>, vector<1x2x512xf32>,
    %c24 = arith.constant 24 : index
    %c0_86 = arith.constant 0 : index
    %91 = vector.load %arg10[%c24, %c0_86] : memref<32x1024xf32, #tpu.memory_space<vmem>>, vector<2x1024xf32>
    %92 = vector.extract_strided_slice %91 {offsets = [0, 0], sizes = [2, 512], strides = [1, 1]} : vector<2x1024xf32> to vector<2x512xf32>
    %93 = vector.shape_cast %92 : vector<2x512xf32> to vector<1x2x512xf32>
    %c12_87 = arith.constant 12 : index
    %c0_88 = arith.constant 0 : index
    %c0_89 = arith.constant 0 : index
    %94 = vector.load %arg11[%c12_87, %c0_88, %c0_89] : memref<16x2x512xf32, #tpu.memory_space<vmem>>, vector<1x2x512xf32>
    tpu.vector_store %arg11[%c12_87, %c0_88, %c0_89], %93 {strides = array<i32>} : memref<16x2x512xf32, #tpu.memory_space<vmem>>, vector<1x2x512xf32>,
    %95 = vector.extract_strided_slice %91 {offsets = [0, 512], sizes = [2, 512], strides = [1, 1]} : vector<2x1024xf32> to vector<2x512xf32>
    %96 = vector.shape_cast %95 : vector<2x512xf32> to vector<1x2x512xf32>
    %c12_90 = arith.constant 12 : index
    %c0_91 = arith.constant 0 : index
    %c0_92 = arith.constant 0 : index
    %97 = vector.load %arg12[%c12_90, %c0_91, %c0_92] : memref<16x2x512xf32, #tpu.memory_space<vmem>>, vector<1x2x512xf32>
    tpu.vector_store %arg12[%c12_90, %c0_91, %c0_92], %96 {strides = array<i32>} : memref<16x2x512xf32, #tpu.memory_space<vmem>>, vector<1x2x512xf32>,
    %c26 = arith.constant 26 : index
    %c0_93 = arith.constant 0 : index
    %98 = vector.load %arg10[%c26, %c0_93] : memref<32x1024xf32, #tpu.memory_space<vmem>>, vector<2x1024xf32>
    %99 = vector.extract_strided_slice %98 {offsets = [0, 0], sizes = [2, 512], strides = [1, 1]} : vector<2x1024xf32> to vector<2x512xf32>
    %100 = vector.shape_cast %99 : vector<2x512xf32> to vector<1x2x512xf32>
    %c13 = arith.constant 13 : index
    %c0_94 = arith.constant 0 : index
    %c0_95 = arith.constant 0 : index
    %101 = vector.load %arg11[%c13, %c0_94, %c0_95] : memref<16x2x512xf32, #tpu.memory_space<vmem>>, vector<1x2x512xf32>
    tpu.vector_store %arg11[%c13, %c0_94, %c0_95], %100 {strides = array<i32>} : memref<16x2x512xf32, #tpu.memory_space<vmem>>, vector<1x2x512xf32>,
    %102 = vector.extract_strided_slice %98 {offsets = [0, 512], sizes = [2, 512], strides = [1, 1]} : vector<2x1024xf32> to vector<2x512xf32>
    %103 = vector.shape_cast %102 : vector<2x512xf32> to vector<1x2x512xf32>
    %c13_96 = arith.constant 13 : index
    %c0_97 = arith.constant 0 : index
    %c0_98 = arith.constant 0 : index
    %104 = vector.load %arg12[%c13_96, %c0_97, %c0_98] : memref<16x2x512xf32, #tpu.memory_space<vmem>>, vector<1x2x512xf32>
    tpu.vector_store %arg12[%c13_96, %c0_97, %c0_98], %103 {strides = array<i32>} : memref<16x2x512xf32, #tpu.memory_space<vmem>>, vector<1x2x512xf32>,
    %c28 = arith.constant 28 : index
    %c0_99 = arith.constant 0 : index
    %105 = vector.load %arg10[%c28, %c0_99] : memref<32x1024xf32, #tpu.memory_space<vmem>>, vector<2x1024xf32>
    %106 = vector.extract_strided_slice %105 {offsets = [0, 0], sizes = [2, 512], strides = [1, 1]} : vector<2x1024xf32> to vector<2x512xf32>
    %107 = vector.shape_cast %106 : vector<2x512xf32> to vector<1x2x512xf32>
    %c14_100 = arith.constant 14 : index
    %c0_101 = arith.constant 0 : index
    %c0_102 = arith.constant 0 : index
    %108 = vector.load %arg11[%c14_100, %c0_101, %c0_102] : memref<16x2x512xf32, #tpu.memory_space<vmem>>, vector<1x2x512xf32>
    tpu.vector_store %arg11[%c14_100, %c0_101, %c0_102], %107 {strides = array<i32>} : memref<16x2x512xf32, #tpu.memory_space<vmem>>, vector<1x2x512xf32>,
    %109 = vector.extract_strided_slice %105 {offsets = [0, 512], sizes = [2, 512], strides = [1, 1]} : vector<2x1024xf32> to vector<2x512xf32>
    %110 = vector.shape_cast %109 : vector<2x512xf32> to vector<1x2x512xf32>
    %c14_103 = arith.constant 14 : index
    %c0_104 = arith.constant 0 : index
    %c0_105 = arith.constant 0 : index
    %111 = vector.load %arg12[%c14_103, %c0_104, %c0_105] : memref<16x2x512xf32, #tpu.memory_space<vmem>>, vector<1x2x512xf32>
    tpu.vector_store %arg12[%c14_103, %c0_104, %c0_105], %110 {strides = array<i32>} : memref<16x2x512xf32, #tpu.memory_space<vmem>>, vector<1x2x512xf32>,
    %c30 = arith.constant 30 : index
    %c0_106 = arith.constant 0 : index
    %112 = vector.load %arg10[%c30, %c0_106] : memref<32x1024xf32, #tpu.memory_space<vmem>>, vector<2x1024xf32>
    %113 = vector.extract_strided_slice %112 {offsets = [0, 0], sizes = [2, 512], strides = [1, 1]} : vector<2x1024xf32> to vector<2x512xf32>
    %114 = vector.shape_cast %113 : vector<2x512xf32> to vector<1x2x512xf32>
    %c15 = arith.constant 15 : index
    %c0_107 = arith.constant 0 : index
    %c0_108 = arith.constant 0 : index
    %115 = vector.load %arg11[%c15, %c0_107, %c0_108] : memref<16x2x512xf32, #tpu.memory_space<vmem>>, vector<1x2x512xf32>
    tpu.vector_store %arg11[%c15, %c0_107, %c0_108], %114 {strides = array<i32>} : memref<16x2x512xf32, #tpu.memory_space<vmem>>, vector<1x2x512xf32>,
    %116 = vector.extract_strided_slice %112 {offsets = [0, 512], sizes = [2, 512], strides = [1, 1]} : vector<2x1024xf32> to vector<2x512xf32>
    %117 = vector.shape_cast %116 : vector<2x512xf32> to vector<1x2x512xf32>
    %c15_109 = arith.constant 15 : index
    %c0_110 = arith.constant 0 : index
    %c0_111 = arith.constant 0 : index
    %118 = vector.load %arg12[%c15_109, %c0_110, %c0_111] : memref<16x2x512xf32, #tpu.memory_space<vmem>>, vector<1x2x512xf32>
    tpu.vector_store %arg12[%c15_109, %c0_110, %c0_111], %117 {strides = array<i32>} : memref<16x2x512xf32, #tpu.memory_space<vmem>>, vector<1x2x512xf32>,
    %c0_112 = arith.constant 0 : index
    %c0_113 = arith.constant 0 : index
    %119 = vector.load %arg4[%c0_112, %c0_113] : memref<128x512xbf16, #tpu.memory_space<vmem>>, vector<128x512xbf16>
    %c0_114 = arith.constant 0 : index
    %c0_115 = arith.constant 0 : index
    %120 = vector.load %arg5[%c0_114, %c0_115] : memref<128x512xbf16, #tpu.memory_space<vmem>>, vector<128x512xbf16>
    %cst_116 = arith.constant 0.000000e+00 : bf16
    %121 = vector.broadcast %cst_116 : bf16 to vector<2x128xbf16>
    %cst_117 = arith.constant 0.000000e+00 : f32
    %122 = vector.broadcast %cst_117 : f32 to vector<2x128xf32>
    %c0_i32 = arith.constant 0 : i32
    %c4_i32 = arith.constant 4 : i32
    %123 = arith.addi %c0_i32, %c4_i32 : i32
    %c1_i32 = arith.constant 1 : i32
    %124:4 = scf.for %arg14 = %c0_i32 to %123 step %c1_i32 iter_args(%arg15 = %121, %arg16 = %122, %arg17 = %121, %arg18 = %122) -> (vector<2x128xbf16>, vector<2x128xf32>, vector<2x128xbf16>, vector<2x128xf32>)  : i32 {
      %c3_i32 = arith.constant 3 : i32
      %161 = arith.subi %c3_i32, %arg14 : i32
      %c4_i32_158 = arith.constant 4 : i32
      %162 = arith.muli %arg14, %c4_i32_158 : i32
      %c0_i32_159 = arith.constant 0 : i32
      %163 = arith.addi %162, %c0_i32_159 : i32
      %c4_i32_160 = arith.constant 4 : i32
      %164 = arith.muli %161, %c4_i32_160 : i32
      %c3_i32_161 = arith.constant 3 : i32
      %165 = arith.addi %164, %c3_i32_161 : i32
      %166 = arith.index_cast %163 : i32 to index
      %c0_162 = arith.constant 0 : index
      %c0_163 = arith.constant 0 : index
      %167 = vector.load %arg11[%166, %c0_162, %c0_163] : memref<16x2x512xf32, #tpu.memory_space<vmem>>, vector<1x2x512xf32>
      %168 = vector.shape_cast %167 : vector<1x2x512xf32> to vector<2x512xf32>
      %cst_164 = arith.constant dense<0.000000e+00> : vector<2x512xf32>
      %169 = tpu.matmul %arg15, %119, %cst_164 {dimension_numbers = #tpu.dot_dimension_numbers<[1], [0], [0], [1], [0, 0, 1, 1], [], []>} : vector<2x128xbf16>, vector<128x512xbf16>, vector<2x512xf32> -> vector<2x512xf32>
      %170 = arith.addf %168, %169 : vector<2x512xf32>
      %171 = vector.extract_strided_slice %170 {offsets = [0, 0], sizes = [2, 128], strides = [1, 1]} : vector<2x512xf32> to vector<2x128xf32>
      %172 = arith.negf %171 : vector<2x128xf32>
      %173 = math.exp %172 : vector<2x128xf32>
      %cst_165 = arith.constant 1.000000e+00 : f32
      %174 = vector.broadcast %cst_165 : f32 to vector<2x128xf32>
      %175 = arith.addf %174, %173 : vector<2x128xf32>
      %176 = arith.divf %174, %175 : vector<2x128xf32>
      %177 = vector.extract_strided_slice %170 {offsets = [0, 128], sizes = [2, 128], strides = [1, 1]} : vector<2x512xf32> to vector<2x128xf32>
      %178 = arith.negf %177 : vector<2x128xf32>
      %179 = math.exp %178 : vector<2x128xf32>
      %cst_166 = arith.constant 1.000000e+00 : f32
      %180 = vector.broadcast %cst_166 : f32 to vector<2x128xf32>
      %181 = arith.addf %180, %179 : vector<2x128xf32>
      %182 = arith.divf %180, %181 : vector<2x128xf32>
      %183 = vector.extract_strided_slice %170 {offsets = [0, 256], sizes = [2, 128], strides = [1, 1]} : vector<2x512xf32> to vector<2x128xf32>
      %184 = math.tanh %183 : vector<2x128xf32>
      %185 = vector.extract_strided_slice %170 {offsets = [0, 384], sizes = [2, 128], strides = [1, 1]} : vector<2x512xf32> to vector<2x128xf32>
      %186 = arith.negf %185 : vector<2x128xf32>
      %187 = math.exp %186 : vector<2x128xf32>
      %cst_167 = arith.constant 1.000000e+00 : f32
      %188 = vector.broadcast %cst_167 : f32 to vector<2x128xf32>
      %189 = arith.addf %188, %187 : vector<2x128xf32>
      %190 = arith.divf %188, %189 : vector<2x128xf32>
      %191 = arith.mulf %182, %arg16 : vector<2x128xf32>
      %192 = arith.mulf %176, %184 : vector<2x128xf32>
      %193 = arith.addf %191, %192 : vector<2x128xf32>
      %194 = math.tanh %193 : vector<2x128xf32>
      %195 = arith.mulf %190, %194 : vector<2x128xf32>
      %196 = arith.truncf %195 : vector<2x128xf32> to vector<2x128xbf16>
      %197 = vector.shape_cast %196 : vector<2x128xbf16> to vector<1x2x128xbf16>
      %198 = arith.index_cast %arg14 : i32 to index
      %c0_168 = arith.constant 0 : index
      %c0_169 = arith.constant 0 : index
      %199 = vector.load %arg13[%198, %c0_168, %c0_169] : memref<4x2x1024xbf16, #tpu.memory_space<vmem>>, vector<1x2x128xbf16>
      tpu.vector_store %arg13[%198, %c0_168, %c0_169], %197 {strides = array<i32>} : memref<4x2x1024xbf16, #tpu.memory_space<vmem>>, vector<1x2x128xbf16>,
      %200 = arith.index_cast %165 : i32 to index
      %c0_170 = arith.constant 0 : index
      %c0_171 = arith.constant 0 : index
      %201 = vector.load %arg12[%200, %c0_170, %c0_171] : memref<16x2x512xf32, #tpu.memory_space<vmem>>, vector<1x2x512xf32>
      %202 = vector.shape_cast %201 : vector<1x2x512xf32> to vector<2x512xf32>
      %cst_172 = arith.constant dense<0.000000e+00> : vector<2x512xf32>
      %203 = tpu.matmul %arg17, %120, %cst_172 {dimension_numbers = #tpu.dot_dimension_numbers<[1], [0], [0], [1], [0, 0, 1, 1], [], []>} : vector<2x128xbf16>, vector<128x512xbf16>, vector<2x512xf32> -> vector<2x512xf32>
      %204 = arith.addf %202, %203 : vector<2x512xf32>
      %205 = vector.extract_strided_slice %204 {offsets = [0, 0], sizes = [2, 128], strides = [1, 1]} : vector<2x512xf32> to vector<2x128xf32>
      %206 = arith.negf %205 : vector<2x128xf32>
      %207 = math.exp %206 : vector<2x128xf32>
      %cst_173 = arith.constant 1.000000e+00 : f32
      %208 = vector.broadcast %cst_173 : f32 to vector<2x128xf32>
      %209 = arith.addf %208, %207 : vector<2x128xf32>
      %210 = arith.divf %208, %209 : vector<2x128xf32>
      %211 = vector.extract_strided_slice %204 {offsets = [0, 128], sizes = [2, 128], strides = [1, 1]} : vector<2x512xf32> to vector<2x128xf32>
      %212 = arith.negf %211 : vector<2x128xf32>
      %213 = math.exp %212 : vector<2x128xf32>
      %cst_174 = arith.constant 1.000000e+00 : f32
      %214 = vector.broadcast %cst_174 : f32 to vector<2x128xf32>
      %215 = arith.addf %214, %213 : vector<2x128xf32>
      %216 = arith.divf %214, %215 : vector<2x128xf32>
      %217 = vector.extract_strided_slice %204 {offsets = [0, 256], sizes = [2, 128], strides = [1, 1]} : vector<2x512xf32> to vector<2x128xf32>
      %218 = math.tanh %217 : vector<2x128xf32>
      %219 = vector.extract_strided_slice %204 {offsets = [0, 384], sizes = [2, 128], strides = [1, 1]} : vector<2x512xf32> to vector<2x128xf32>
      %220 = arith.negf %219 : vector<2x128xf32>
      %221 = math.exp %220 : vector<2x128xf32>
      %cst_175 = arith.constant 1.000000e+00 : f32
      %222 = vector.broadcast %cst_175 : f32 to vector<2x128xf32>
      %223 = arith.addf %222, %221 : vector<2x128xf32>
      %224 = arith.divf %222, %223 : vector<2x128xf32>
      %225 = arith.mulf %216, %arg18 : vector<2x128xf32>
      %226 = arith.mulf %210, %218 : vector<2x128xf32>
      %227 = arith.addf %225, %226 : vector<2x128xf32>
      %228 = math.tanh %227 : vector<2x128xf32>
      %229 = arith.mulf %224, %228 : vector<2x128xf32>
      %230 = arith.truncf %229 : vector<2x128xf32> to vector<2x128xbf16>
      %231 = vector.shape_cast %230 : vector<2x128xbf16> to vector<1x2x128xbf16>
      %232 = arith.index_cast %161 : i32 to index
      %c0_176 = arith.constant 0 : index
      %c896 = arith.constant 896 : index
      %233 = vector.load %arg13[%232, %c0_176, %c896] : memref<4x2x1024xbf16, #tpu.memory_space<vmem>>, vector<1x2x128xbf16>
      tpu.vector_store %arg13[%232, %c0_176, %c896], %231 {strides = array<i32>} : memref<4x2x1024xbf16, #tpu.memory_space<vmem>>, vector<1x2x128xbf16>,
      %c4_i32_177 = arith.constant 4 : i32
      %234 = arith.muli %arg14, %c4_i32_177 : i32
      %c1_i32_178 = arith.constant 1 : i32
      %235 = arith.addi %234, %c1_i32_178 : i32
      %c4_i32_179 = arith.constant 4 : i32
      %236 = arith.muli %161, %c4_i32_179 : i32
      %c2_i32 = arith.constant 2 : i32
      %237 = arith.addi %236, %c2_i32 : i32
      %238 = arith.index_cast %235 : i32 to index
      %c0_180 = arith.constant 0 : index
      %c0_181 = arith.constant 0 : index
      %239 = vector.load %arg11[%238, %c0_180, %c0_181] : memref<16x2x512xf32, #tpu.memory_space<vmem>>, vector<1x2x512xf32>
      %240 = vector.shape_cast %239 : vector<1x2x512xf32> to vector<2x512xf32>
      %cst_182 = arith.constant dense<0.000000e+00> : vector<2x512xf32>
      %241 = tpu.matmul %196, %119, %cst_182 {dimension_numbers = #tpu.dot_dimension_numbers<[1], [0], [0], [1], [0, 0, 1, 1], [], []>} : vector<2x128xbf16>, vector<128x512xbf16>, vector<2x512xf32> -> vector<2x512xf32>
      %242 = arith.addf %240, %241 : vector<2x512xf32>
      %243 = vector.extract_strided_slice %242 {offsets = [0, 0], sizes = [2, 128], strides = [1, 1]} : vector<2x512xf32> to vector<2x128xf32>
      %244 = arith.negf %243 : vector<2x128xf32>
      %245 = math.exp %244 : vector<2x128xf32>
      %cst_183 = arith.constant 1.000000e+00 : f32
      %246 = vector.broadcast %cst_183 : f32 to vector<2x128xf32>
      %247 = arith.addf %246, %245 : vector<2x128xf32>
      %248 = arith.divf %246, %247 : vector<2x128xf32>
      %249 = vector.extract_strided_slice %242 {offsets = [0, 128], sizes = [2, 128], strides = [1, 1]} : vector<2x512xf32> to vector<2x128xf32>
      %250 = arith.negf %249 : vector<2x128xf32>
      %251 = math.exp %250 : vector<2x128xf32>
      %cst_184 = arith.constant 1.000000e+00 : f32
      %252 = vector.broadcast %cst_184 : f32 to vector<2x128xf32>
      %253 = arith.addf %252, %251 : vector<2x128xf32>
      %254 = arith.divf %252, %253 : vector<2x128xf32>
      %255 = vector.extract_strided_slice %242 {offsets = [0, 256], sizes = [2, 128], strides = [1, 1]} : vector<2x512xf32> to vector<2x128xf32>
      %256 = math.tanh %255 : vector<2x128xf32>
      %257 = vector.extract_strided_slice %242 {offsets = [0, 384], sizes = [2, 128], strides = [1, 1]} : vector<2x512xf32> to vector<2x128xf32>
      %258 = arith.negf %257 : vector<2x128xf32>
      %259 = math.exp %258 : vector<2x128xf32>
      %cst_185 = arith.constant 1.000000e+00 : f32
      %260 = vector.broadcast %cst_185 : f32 to vector<2x128xf32>
      %261 = arith.addf %260, %259 : vector<2x128xf32>
      %262 = arith.divf %260, %261 : vector<2x128xf32>
      %263 = arith.mulf %254, %193 : vector<2x128xf32>
      %264 = arith.mulf %248, %256 : vector<2x128xf32>
      %265 = arith.addf %263, %264 : vector<2x128xf32>
      %266 = math.tanh %265 : vector<2x128xf32>
      %267 = arith.mulf %262, %266 : vector<2x128xf32>
      %268 = arith.truncf %267 : vector<2x128xf32> to vector<2x128xbf16>
      %269 = vector.shape_cast %268 : vector<2x128xbf16> to vector<1x2x128xbf16>
      %270 = arith.index_cast %arg14 : i32 to index
      %c0_186 = arith.constant 0 : index
      %c256 = arith.constant 256 : index
      %271 = vector.load %arg13[%270, %c0_186, %c256] : memref<4x2x1024xbf16, #tpu.memory_space<vmem>>, vector<1x2x128xbf16>
      tpu.vector_store %arg13[%270, %c0_186, %c256], %269 {strides = array<i32>} : memref<4x2x1024xbf16, #tpu.memory_space<vmem>>, vector<1x2x128xbf16>,
      %272 = arith.index_cast %237 : i32 to index
      %c0_187 = arith.constant 0 : index
      %c0_188 = arith.constant 0 : index
      %273 = vector.load %arg12[%272, %c0_187, %c0_188] : memref<16x2x512xf32, #tpu.memory_space<vmem>>, vector<1x2x512xf32>
      %274 = vector.shape_cast %273 : vector<1x2x512xf32> to vector<2x512xf32>
      %cst_189 = arith.constant dense<0.000000e+00> : vector<2x512xf32>
      %275 = tpu.matmul %230, %120, %cst_189 {dimension_numbers = #tpu.dot_dimension_numbers<[1], [0], [0], [1], [0, 0, 1, 1], [], []>} : vector<2x128xbf16>, vector<128x512xbf16>, vector<2x512xf32> -> vector<2x512xf32>
      %276 = arith.addf %274, %275 : vector<2x512xf32>
      %277 = vector.extract_strided_slice %276 {offsets = [0, 0], sizes = [2, 128], strides = [1, 1]} : vector<2x512xf32> to vector<2x128xf32>
      %278 = arith.negf %277 : vector<2x128xf32>
      %279 = math.exp %278 : vector<2x128xf32>
      %cst_190 = arith.constant 1.000000e+00 : f32
      %280 = vector.broadcast %cst_190 : f32 to vector<2x128xf32>
      %281 = arith.addf %280, %279 : vector<2x128xf32>
      %282 = arith.divf %280, %281 : vector<2x128xf32>
      %283 = vector.extract_strided_slice %276 {offsets = [0, 128], sizes = [2, 128], strides = [1, 1]} : vector<2x512xf32> to vector<2x128xf32>
      %284 = arith.negf %283 : vector<2x128xf32>
      %285 = math.exp %284 : vector<2x128xf32>
      %cst_191 = arith.constant 1.000000e+00 : f32
      %286 = vector.broadcast %cst_191 : f32 to vector<2x128xf32>
      %287 = arith.addf %286, %285 : vector<2x128xf32>
      %288 = arith.divf %286, %287 : vector<2x128xf32>
      %289 = vector.extract_strided_slice %276 {offsets = [0, 256], sizes = [2, 128], strides = [1, 1]} : vector<2x512xf32> to vector<2x128xf32>
      %290 = math.tanh %289 : vector<2x128xf32>
      %291 = vector.extract_strided_slice %276 {offsets = [0, 384], sizes = [2, 128], strides = [1, 1]} : vector<2x512xf32> to vector<2x128xf32>
      %292 = arith.negf %291 : vector<2x128xf32>
      %293 = math.exp %292 : vector<2x128xf32>
      %cst_192 = arith.constant 1.000000e+00 : f32
      %294 = vector.broadcast %cst_192 : f32 to vector<2x128xf32>
      %295 = arith.addf %294, %293 : vector<2x128xf32>
      %296 = arith.divf %294, %295 : vector<2x128xf32>
      %297 = arith.mulf %288, %227 : vector<2x128xf32>
      %298 = arith.mulf %282, %290 : vector<2x128xf32>
      %299 = arith.addf %297, %298 : vector<2x128xf32>
      %300 = math.tanh %299 : vector<2x128xf32>
      %301 = arith.mulf %296, %300 : vector<2x128xf32>
      %302 = arith.truncf %301 : vector<2x128xf32> to vector<2x128xbf16>
      %303 = vector.shape_cast %302 : vector<2x128xbf16> to vector<1x2x128xbf16>
      %304 = arith.index_cast %161 : i32 to index
      %c0_193 = arith.constant 0 : index
      %c640 = arith.constant 640 : index
      %305 = vector.load %arg13[%304, %c0_193, %c640] : memref<4x2x1024xbf16, #tpu.memory_space<vmem>>, vector<1x2x128xbf16>
      tpu.vector_store %arg13[%304, %c0_193, %c640], %303 {strides = array<i32>} : memref<4x2x1024xbf16, #tpu.memory_space<vmem>>, vector<1x2x128xbf16>,
      %c4_i32_194 = arith.constant 4 : i32
      %306 = arith.muli %arg14, %c4_i32_194 : i32
      %c2_i32_195 = arith.constant 2 : i32
      %307 = arith.addi %306, %c2_i32_195 : i32
      %c4_i32_196 = arith.constant 4 : i32
      %308 = arith.muli %161, %c4_i32_196 : i32
      %c1_i32_197 = arith.constant 1 : i32
      %309 = arith.addi %308, %c1_i32_197 : i32
      %310 = arith.index_cast %307 : i32 to index
      %c0_198 = arith.constant 0 : index
      %c0_199 = arith.constant 0 : index
      %311 = vector.load %arg11[%310, %c0_198, %c0_199] : memref<16x2x512xf32, #tpu.memory_space<vmem>>, vector<1x2x512xf32>
      %312 = vector.shape_cast %311 : vector<1x2x512xf32> to vector<2x512xf32>
      %cst_200 = arith.constant dense<0.000000e+00> : vector<2x512xf32>
      %313 = tpu.matmul %268, %119, %cst_200 {dimension_numbers = #tpu.dot_dimension_numbers<[1], [0], [0], [1], [0, 0, 1, 1], [], []>} : vector<2x128xbf16>, vector<128x512xbf16>, vector<2x512xf32> -> vector<2x512xf32>
      %314 = arith.addf %312, %313 : vector<2x512xf32>
      %315 = vector.extract_strided_slice %314 {offsets = [0, 0], sizes = [2, 128], strides = [1, 1]} : vector<2x512xf32> to vector<2x128xf32>
      %316 = arith.negf %315 : vector<2x128xf32>
      %317 = math.exp %316 : vector<2x128xf32>
      %cst_201 = arith.constant 1.000000e+00 : f32
      %318 = vector.broadcast %cst_201 : f32 to vector<2x128xf32>
      %319 = arith.addf %318, %317 : vector<2x128xf32>
      %320 = arith.divf %318, %319 : vector<2x128xf32>
      %321 = vector.extract_strided_slice %314 {offsets = [0, 128], sizes = [2, 128], strides = [1, 1]} : vector<2x512xf32> to vector<2x128xf32>
      %322 = arith.negf %321 : vector<2x128xf32>
      %323 = math.exp %322 : vector<2x128xf32>
      %cst_202 = arith.constant 1.000000e+00 : f32
      %324 = vector.broadcast %cst_202 : f32 to vector<2x128xf32>
      %325 = arith.addf %324, %323 : vector<2x128xf32>
      %326 = arith.divf %324, %325 : vector<2x128xf32>
      %327 = vector.extract_strided_slice %314 {offsets = [0, 256], sizes = [2, 128], strides = [1, 1]} : vector<2x512xf32> to vector<2x128xf32>
      %328 = math.tanh %327 : vector<2x128xf32>
      %329 = vector.extract_strided_slice %314 {offsets = [0, 384], sizes = [2, 128], strides = [1, 1]} : vector<2x512xf32> to vector<2x128xf32>
      %330 = arith.negf %329 : vector<2x128xf32>
      %331 = math.exp %330 : vector<2x128xf32>
      %cst_203 = arith.constant 1.000000e+00 : f32
      %332 = vector.broadcast %cst_203 : f32 to vector<2x128xf32>
      %333 = arith.addf %332, %331 : vector<2x128xf32>
      %334 = arith.divf %332, %333 : vector<2x128xf32>
      %335 = arith.mulf %326, %265 : vector<2x128xf32>
      %336 = arith.mulf %320, %328 : vector<2x128xf32>
      %337 = arith.addf %335, %336 : vector<2x128xf32>
      %338 = math.tanh %337 : vector<2x128xf32>
      %339 = arith.mulf %334, %338 : vector<2x128xf32>
      %340 = arith.truncf %339 : vector<2x128xf32> to vector<2x128xbf16>
      %341 = vector.shape_cast %340 : vector<2x128xbf16> to vector<1x2x128xbf16>
      %342 = arith.index_cast %arg14 : i32 to index
      %c0_204 = arith.constant 0 : index
      %c512 = arith.constant 512 : index
      %343 = vector.load %arg13[%342, %c0_204, %c512] : memref<4x2x1024xbf16, #tpu.memory_space<vmem>>, vector<1x2x128xbf16>
      tpu.vector_store %arg13[%342, %c0_204, %c512], %341 {strides = array<i32>} : memref<4x2x1024xbf16, #tpu.memory_space<vmem>>, vector<1x2x128xbf16>,
      %344 = arith.index_cast %309 : i32 to index
      %c0_205 = arith.constant 0 : index
      %c0_206 = arith.constant 0 : index
      %345 = vector.load %arg12[%344, %c0_205, %c0_206] : memref<16x2x512xf32, #tpu.memory_space<vmem>>, vector<1x2x512xf32>
      %346 = vector.shape_cast %345 : vector<1x2x512xf32> to vector<2x512xf32>
      %cst_207 = arith.constant dense<0.000000e+00> : vector<2x512xf32>
      %347 = tpu.matmul %302, %120, %cst_207 {dimension_numbers = #tpu.dot_dimension_numbers<[1], [0], [0], [1], [0, 0, 1, 1], [], []>} : vector<2x128xbf16>, vector<128x512xbf16>, vector<2x512xf32> -> vector<2x512xf32>
      %348 = arith.addf %346, %347 : vector<2x512xf32>
      %349 = vector.extract_strided_slice %348 {offsets = [0, 0], sizes = [2, 128], strides = [1, 1]} : vector<2x512xf32> to vector<2x128xf32>
      %350 = arith.negf %349 : vector<2x128xf32>
      %351 = math.exp %350 : vector<2x128xf32>
      %cst_208 = arith.constant 1.000000e+00 : f32
      %352 = vector.broadcast %cst_208 : f32 to vector<2x128xf32>
      %353 = arith.addf %352, %351 : vector<2x128xf32>
      %354 = arith.divf %352, %353 : vector<2x128xf32>
      %355 = vector.extract_strided_slice %348 {offsets = [0, 128], sizes = [2, 128], strides = [1, 1]} : vector<2x512xf32> to vector<2x128xf32>
      %356 = arith.negf %355 : vector<2x128xf32>
      %357 = math.exp %356 : vector<2x128xf32>
      %cst_209 = arith.constant 1.000000e+00 : f32
      %358 = vector.broadcast %cst_209 : f32 to vector<2x128xf32>
      %359 = arith.addf %358, %357 : vector<2x128xf32>
      %360 = arith.divf %358, %359 : vector<2x128xf32>
      %361 = vector.extract_strided_slice %348 {offsets = [0, 256], sizes = [2, 128], strides = [1, 1]} : vector<2x512xf32> to vector<2x128xf32>
      %362 = math.tanh %361 : vector<2x128xf32>
      %363 = vector.extract_strided_slice %348 {offsets = [0, 384], sizes = [2, 128], strides = [1, 1]} : vector<2x512xf32> to vector<2x128xf32>
      %364 = arith.negf %363 : vector<2x128xf32>
      %365 = math.exp %364 : vector<2x128xf32>
      %cst_210 = arith.constant 1.000000e+00 : f32
      %366 = vector.broadcast %cst_210 : f32 to vector<2x128xf32>
      %367 = arith.addf %366, %365 : vector<2x128xf32>
      %368 = arith.divf %366, %367 : vector<2x128xf32>
      %369 = arith.mulf %360, %299 : vector<2x128xf32>
      %370 = arith.mulf %354, %362 : vector<2x128xf32>
      %371 = arith.addf %369, %370 : vector<2x128xf32>
      %372 = math.tanh %371 : vector<2x128xf32>
      %373 = arith.mulf %368, %372 : vector<2x128xf32>
      %374 = arith.truncf %373 : vector<2x128xf32> to vector<2x128xbf16>
      %375 = vector.shape_cast %374 : vector<2x128xbf16> to vector<1x2x128xbf16>
      %376 = arith.index_cast %161 : i32 to index
      %c0_211 = arith.constant 0 : index
      %c384 = arith.constant 384 : index
      %377 = vector.load %arg13[%376, %c0_211, %c384] : memref<4x2x1024xbf16, #tpu.memory_space<vmem>>, vector<1x2x128xbf16>
      tpu.vector_store %arg13[%376, %c0_211, %c384], %375 {strides = array<i32>} : memref<4x2x1024xbf16, #tpu.memory_space<vmem>>, vector<1x2x128xbf16>,
      %c4_i32_212 = arith.constant 4 : i32
      %378 = arith.muli %arg14, %c4_i32_212 : i32
      %c3_i32_213 = arith.constant 3 : i32
      %379 = arith.addi %378, %c3_i32_213 : i32
      %c4_i32_214 = arith.constant 4 : i32
      %380 = arith.muli %161, %c4_i32_214 : i32
      %c0_i32_215 = arith.constant 0 : i32
      %381 = arith.addi %380, %c0_i32_215 : i32
      %382 = arith.index_cast %379 : i32 to index
      %c0_216 = arith.constant 0 : index
      %c0_217 = arith.constant 0 : index
      %383 = vector.load %arg11[%382, %c0_216, %c0_217] : memref<16x2x512xf32, #tpu.memory_space<vmem>>, vector<1x2x512xf32>
      %384 = vector.shape_cast %383 : vector<1x2x512xf32> to vector<2x512xf32>
      %cst_218 = arith.constant dense<0.000000e+00> : vector<2x512xf32>
      %385 = tpu.matmul %340, %119, %cst_218 {dimension_numbers = #tpu.dot_dimension_numbers<[1], [0], [0], [1], [0, 0, 1, 1], [], []>} : vector<2x128xbf16>, vector<128x512xbf16>, vector<2x512xf32> -> vector<2x512xf32>
      %386 = arith.addf %384, %385 : vector<2x512xf32>
      %387 = vector.extract_strided_slice %386 {offsets = [0, 0], sizes = [2, 128], strides = [1, 1]} : vector<2x512xf32> to vector<2x128xf32>
      %388 = arith.negf %387 : vector<2x128xf32>
      %389 = math.exp %388 : vector<2x128xf32>
      %cst_219 = arith.constant 1.000000e+00 : f32
      %390 = vector.broadcast %cst_219 : f32 to vector<2x128xf32>
      %391 = arith.addf %390, %389 : vector<2x128xf32>
      %392 = arith.divf %390, %391 : vector<2x128xf32>
      %393 = vector.extract_strided_slice %386 {offsets = [0, 128], sizes = [2, 128], strides = [1, 1]} : vector<2x512xf32> to vector<2x128xf32>
      %394 = arith.negf %393 : vector<2x128xf32>
      %395 = math.exp %394 : vector<2x128xf32>
      %cst_220 = arith.constant 1.000000e+00 : f32
      %396 = vector.broadcast %cst_220 : f32 to vector<2x128xf32>
      %397 = arith.addf %396, %395 : vector<2x128xf32>
      %398 = arith.divf %396, %397 : vector<2x128xf32>
      %399 = vector.extract_strided_slice %386 {offsets = [0, 256], sizes = [2, 128], strides = [1, 1]} : vector<2x512xf32> to vector<2x128xf32>
      %400 = math.tanh %399 : vector<2x128xf32>
      %401 = vector.extract_strided_slice %386 {offsets = [0, 384], sizes = [2, 128], strides = [1, 1]} : vector<2x512xf32> to vector<2x128xf32>
      %402 = arith.negf %401 : vector<2x128xf32>
      %403 = math.exp %402 : vector<2x128xf32>
      %cst_221 = arith.constant 1.000000e+00 : f32
      %404 = vector.broadcast %cst_221 : f32 to vector<2x128xf32>
      %405 = arith.addf %404, %403 : vector<2x128xf32>
      %406 = arith.divf %404, %405 : vector<2x128xf32>
      %407 = arith.mulf %398, %337 : vector<2x128xf32>
      %408 = arith.mulf %392, %400 : vector<2x128xf32>
      %409 = arith.addf %407, %408 : vector<2x128xf32>
      %410 = math.tanh %409 : vector<2x128xf32>
      %411 = arith.mulf %406, %410 : vector<2x128xf32>
      %412 = arith.truncf %411 : vector<2x128xf32> to vector<2x128xbf16>
      %413 = vector.shape_cast %412 : vector<2x128xbf16> to vector<1x2x128xbf16>
      %414 = arith.index_cast %arg14 : i32 to index
      %c0_222 = arith.constant 0 : index
      %c768 = arith.constant 768 : index
      %415 = vector.load %arg13[%414, %c0_222, %c768] : memref<4x2x1024xbf16, #tpu.memory_space<vmem>>, vector<1x2x128xbf16>
      tpu.vector_store %arg13[%414, %c0_222, %c768], %413 {strides = array<i32>} : memref<4x2x1024xbf16, #tpu.memory_space<vmem>>, vector<1x2x128xbf16>,
      %416 = arith.index_cast %381 : i32 to index
      %c0_223 = arith.constant 0 : index
      %c0_224 = arith.constant 0 : index
      %417 = vector.load %arg12[%416, %c0_223, %c0_224] : memref<16x2x512xf32, #tpu.memory_space<vmem>>, vector<1x2x512xf32>
      %418 = vector.shape_cast %417 : vector<1x2x512xf32> to vector<2x512xf32>
      %cst_225 = arith.constant dense<0.000000e+00> : vector<2x512xf32>
      %419 = tpu.matmul %374, %120, %cst_225 {dimension_numbers = #tpu.dot_dimension_numbers<[1], [0], [0], [1], [0, 0, 1, 1], [], []>} : vector<2x128xbf16>, vector<128x512xbf16>, vector<2x512xf32> -> vector<2x512xf32>
      %420 = arith.addf %418, %419 : vector<2x512xf32>
      %421 = vector.extract_strided_slice %420 {offsets = [0, 0], sizes = [2, 128], strides = [1, 1]} : vector<2x512xf32> to vector<2x128xf32>
      %422 = arith.negf %421 : vector<2x128xf32>
      %423 = math.exp %422 : vector<2x128xf32>
      %cst_226 = arith.constant 1.000000e+00 : f32
      %424 = vector.broadcast %cst_226 : f32 to vector<2x128xf32>
      %425 = arith.addf %424, %423 : vector<2x128xf32>
      %426 = arith.divf %424, %425 : vector<2x128xf32>
      %427 = vector.extract_strided_slice %420 {offsets = [0, 128], sizes = [2, 128], strides = [1, 1]} : vector<2x512xf32> to vector<2x128xf32>
      %428 = arith.negf %427 : vector<2x128xf32>
      %429 = math.exp %428 : vector<2x128xf32>
      %cst_227 = arith.constant 1.000000e+00 : f32
      %430 = vector.broadcast %cst_227 : f32 to vector<2x128xf32>
      %431 = arith.addf %430, %429 : vector<2x128xf32>
      %432 = arith.divf %430, %431 : vector<2x128xf32>
      %433 = vector.extract_strided_slice %420 {offsets = [0, 256], sizes = [2, 128], strides = [1, 1]} : vector<2x512xf32> to vector<2x128xf32>
      %434 = math.tanh %433 : vector<2x128xf32>
      %435 = vector.extract_strided_slice %420 {offsets = [0, 384], sizes = [2, 128], strides = [1, 1]} : vector<2x512xf32> to vector<2x128xf32>
      %436 = arith.negf %435 : vector<2x128xf32>
      %437 = math.exp %436 : vector<2x128xf32>
      %cst_228 = arith.constant 1.000000e+00 : f32
      %438 = vector.broadcast %cst_228 : f32 to vector<2x128xf32>
      %439 = arith.addf %438, %437 : vector<2x128xf32>
      %440 = arith.divf %438, %439 : vector<2x128xf32>
      %441 = arith.mulf %432, %371 : vector<2x128xf32>
      %442 = arith.mulf %426, %434 : vector<2x128xf32>
      %443 = arith.addf %441, %442 : vector<2x128xf32>
      %444 = math.tanh %443 : vector<2x128xf32>
      %445 = arith.mulf %440, %444 : vector<2x128xf32>
      %446 = arith.truncf %445 : vector<2x128xf32> to vector<2x128xbf16>
      %447 = vector.shape_cast %446 : vector<2x128xbf16> to vector<1x2x128xbf16>
      %448 = arith.index_cast %161 : i32 to index
      %c0_229 = arith.constant 0 : index
      %c128 = arith.constant 128 : index
      %449 = vector.load %arg13[%448, %c0_229, %c128] : memref<4x2x1024xbf16, #tpu.memory_space<vmem>>, vector<1x2x128xbf16>
      tpu.vector_store %arg13[%448, %c0_229, %c128], %447 {strides = array<i32>} : memref<4x2x1024xbf16, #tpu.memory_space<vmem>>, vector<1x2x128xbf16>,
      scf.yield %412, %409, %446, %443 : vector<2x128xbf16>, vector<2x128xf32>, vector<2x128xbf16>, vector<2x128xf32>
    }
    %c4_i32_118 = arith.constant 4 : i32
    %c0_119 = arith.constant 0 : index
    %c0_120 = arith.constant 0 : index
    %125 = vector.load %arg6[%c0_119, %c0_120] : memref<1024x128xbf16, #tpu.memory_space<vmem>>, vector<1024x128xbf16>
    %c0_121 = arith.constant 0 : index
    %c0_122 = arith.constant 0 : index
    %126 = vector.load %arg7[%c0_121, %c0_122] : memref<1024x128xbf16, #tpu.memory_space<vmem>>, vector<1024x128xbf16>
    %c0_123 = arith.constant 0 : index
    %c0_124 = arith.constant 0 : index
    %127 = vector.load %arg8[%c0_123, %c0_124] : memref<1x128xf32, #tpu.memory_space<vmem>>, vector<1x128xf32>
    %c0_125 = arith.constant 0 : index
    %c0_126 = arith.constant 0 : index
    %c0_127 = arith.constant 0 : index
    %128 = vector.load %arg13[%c0_125, %c0_126, %c0_127] : memref<4x2x1024xbf16, #tpu.memory_space<vmem>>, vector<1x2x1024xbf16>
    %129 = vector.shape_cast %128 : vector<1x2x1024xbf16> to vector<2x1024xbf16>
    %cst_128 = arith.constant dense<0.000000e+00> : vector<2x128xf32>
    %130 = tpu.matmul %129, %125, %cst_128 {dimension_numbers = #tpu.dot_dimension_numbers<[1], [0], [0], [1], [0, 0, 1, 1], [], []>} : vector<2x1024xbf16>, vector<1024x128xbf16>, vector<2x128xf32> -> vector<2x128xf32>
    %131 = vector.broadcast %127 : vector<1x128xf32> to vector<2x128xf32>
    %132 = arith.addf %131, %130 : vector<2x128xf32>
    %c1_129 = arith.constant 1 : index
    %c0_130 = arith.constant 0 : index
    %c0_131 = arith.constant 0 : index
    %133 = vector.load %arg13[%c1_129, %c0_130, %c0_131] : memref<4x2x1024xbf16, #tpu.memory_space<vmem>>, vector<1x2x1024xbf16>
    %134 = vector.shape_cast %133 : vector<1x2x1024xbf16> to vector<2x1024xbf16>
    %cst_132 = arith.constant dense<0.000000e+00> : vector<2x128xf32>
    %135 = tpu.matmul %134, %126, %cst_132 {dimension_numbers = #tpu.dot_dimension_numbers<[1], [0], [0], [1], [0, 0, 1, 1], [], []>} : vector<2x1024xbf16>, vector<1024x128xbf16>, vector<2x128xf32> -> vector<2x128xf32>
    %136 = arith.addf %132, %135 : vector<2x128xf32>
    %137 = vector.shape_cast %136 : vector<2x128xf32> to vector<2x1x128xf32>
    %c0_133 = arith.constant 0 : index
    %c0_134 = arith.constant 0 : index
    %c0_135 = arith.constant 0 : index
    %138 = vector.load %arg9[%c0_133, %c0_134, %c0_135] : memref<2x3x128xf32, #tpu.memory_space<vmem>>, vector<2x1x128xf32>
    tpu.vector_store %arg9[%c0_133, %c0_134, %c0_135], %137 {strides = array<i32>} : memref<2x3x128xf32, #tpu.memory_space<vmem>>, vector<2x1x128xf32>,
    %c1_136 = arith.constant 1 : index
    %c0_137 = arith.constant 0 : index
    %c0_138 = arith.constant 0 : index
    %139 = vector.load %arg13[%c1_136, %c0_137, %c0_138] : memref<4x2x1024xbf16, #tpu.memory_space<vmem>>, vector<1x2x1024xbf16>
    %140 = vector.shape_cast %139 : vector<1x2x1024xbf16> to vector<2x1024xbf16>
    %cst_139 = arith.constant dense<0.000000e+00> : vector<2x128xf32>
    %141 = tpu.matmul %140, %125, %cst_139 {dimension_numbers = #tpu.dot_dimension_numbers<[1], [0], [0], [1], [0, 0, 1, 1], [], []>} : vector<2x1024xbf16>, vector<1024x128xbf16>, vector<2x128xf32> -> vector<2x128xf32>
    %142 = vector.broadcast %127 : vector<1x128xf32> to vector<2x128xf32>
    %143 = arith.addf %142, %141 : vector<2x128xf32>
    %c2_140 = arith.constant 2 : index
    %c0_141 = arith.constant 0 : index
    %c0_142 = arith.constant 0 : index
    %144 = vector.load %arg13[%c2_140, %c0_141, %c0_142] : memref<4x2x1024xbf16, #tpu.memory_space<vmem>>, vector<1x2x1024xbf16>
    %145 = vector.shape_cast %144 : vector<1x2x1024xbf16> to vector<2x1024xbf16>
    %cst_143 = arith.constant dense<0.000000e+00> : vector<2x128xf32>
    %146 = tpu.matmul %145, %126, %cst_143 {dimension_numbers = #tpu.dot_dimension_numbers<[1], [0], [0], [1], [0, 0, 1, 1], [], []>} : vector<2x1024xbf16>, vector<1024x128xbf16>, vector<2x128xf32> -> vector<2x128xf32>
    %147 = arith.addf %143, %146 : vector<2x128xf32>
    %148 = vector.shape_cast %147 : vector<2x128xf32> to vector<2x1x128xf32>
    %c0_144 = arith.constant 0 : index
    %c1_145 = arith.constant 1 : index
    %c0_146 = arith.constant 0 : index
    %149 = vector.load %arg9[%c0_144, %c1_145, %c0_146] : memref<2x3x128xf32, #tpu.memory_space<vmem>>, vector<2x1x128xf32>
    tpu.vector_store %arg9[%c0_144, %c1_145, %c0_146], %148 {strides = array<i32>} : memref<2x3x128xf32, #tpu.memory_space<vmem>>, vector<2x1x128xf32>,
    %c2_147 = arith.constant 2 : index
    %c0_148 = arith.constant 0 : index
    %c0_149 = arith.constant 0 : index
    %150 = vector.load %arg13[%c2_147, %c0_148, %c0_149] : memref<4x2x1024xbf16, #tpu.memory_space<vmem>>, vector<1x2x1024xbf16>
    %151 = vector.shape_cast %150 : vector<1x2x1024xbf16> to vector<2x1024xbf16>
    %cst_150 = arith.constant dense<0.000000e+00> : vector<2x128xf32>
    %152 = tpu.matmul %151, %125, %cst_150 {dimension_numbers = #tpu.dot_dimension_numbers<[1], [0], [0], [1], [0, 0, 1, 1], [], []>} : vector<2x1024xbf16>, vector<1024x128xbf16>, vector<2x128xf32> -> vector<2x128xf32>
    %153 = vector.broadcast %127 : vector<1x128xf32> to vector<2x128xf32>
    %154 = arith.addf %153, %152 : vector<2x128xf32>
    %c3_151 = arith.constant 3 : index
    %c0_152 = arith.constant 0 : index
    %c0_153 = arith.constant 0 : index
    %155 = vector.load %arg13[%c3_151, %c0_152, %c0_153] : memref<4x2x1024xbf16, #tpu.memory_space<vmem>>, vector<1x2x1024xbf16>
    %156 = vector.shape_cast %155 : vector<1x2x1024xbf16> to vector<2x1024xbf16>
    %cst_154 = arith.constant dense<0.000000e+00> : vector<2x128xf32>
    %157 = tpu.matmul %156, %126, %cst_154 {dimension_numbers = #tpu.dot_dimension_numbers<[1], [0], [0], [1], [0, 0, 1, 1], [], []>} : vector<2x1024xbf16>, vector<1024x128xbf16>, vector<2x128xf32> -> vector<2x128xf32>
    %158 = arith.addf %154, %157 : vector<2x128xf32>
    %159 = vector.shape_cast %158 : vector<2x128xf32> to vector<2x1x128xf32>
    %c0_155 = arith.constant 0 : index
    %c2_156 = arith.constant 2 : index
    %c0_157 = arith.constant 0 : index
    %160 = vector.load %arg9[%c0_155, %c2_156, %c0_157] : memref<2x3x128xf32, #tpu.memory_space<vmem>>, vector<2x1x128xf32>
    tpu.vector_store %arg9[%c0_155, %c2_156, %c0_157], %159 {strides = array<i32>} : memref<2x3x128xf32, #tpu.memory_space<vmem>>, vector<2x1x128xf32>,
    return
  }
  func.func @transform_0(%arg0: i32) -> (i32, i32) {
    %c0_i32 = arith.constant 0 : i32
    %c0_i32_0 = arith.constant 0 : i32
    %c0_i32_1 = arith.constant 0 : i32
    return %c0_i32, %c0_i32_0 : i32, i32
  }
  func.func @transform_1(%arg0: i32) -> (i32, i32) {
    %c0_i32 = arith.constant 0 : i32
    %c0_i32_0 = arith.constant 0 : i32
    %c0_i32_1 = arith.constant 0 : i32
    return %c0_i32, %c0_i32_0 : i32, i32
  }
  func.func @transform_2(%arg0: i32) -> (i32, i32) {
    %c0_i32 = arith.constant 0 : i32
    %c0_i32_0 = arith.constant 0 : i32
    %c0_i32_1 = arith.constant 0 : i32
    return %c0_i32, %c0_i32_0 : i32, i32
  }
  func.func @transform_3(%arg0: i32) -> (i32, i32) {
    %c0_i32 = arith.constant 0 : i32
    %c0_i32_0 = arith.constant 0 : i32
    %c0_i32_1 = arith.constant 0 : i32
    return %c0_i32, %c0_i32_0 : i32, i32
  }
  func.func @transform_4(%arg0: i32) -> (i32, i32) {
    %c0_i32 = arith.constant 0 : i32
    %c0_i32_0 = arith.constant 0 : i32
    %c0_i32_1 = arith.constant 0 : i32
    return %c0_i32, %c0_i32_0 : i32, i32
  }
  func.func @transform_5(%arg0: i32) -> (i32, i32) {
    %c0_i32 = arith.constant 0 : i32
    %c0_i32_0 = arith.constant 0 : i32
    %c0_i32_1 = arith.constant 0 : i32
    return %c0_i32, %c0_i32_0 : i32, i32
  }
  func.func @transform_6(%arg0: i32) -> (i32, i32) {
    %c0_i32 = arith.constant 0 : i32
    %c0_i32_0 = arith.constant 0 : i32
    %c0_i32_1 = arith.constant 0 : i32
    return %c0_i32, %c0_i32_0 : i32, i32
  }
  func.func @transform_7(%arg0: i32) -> (i32, i32) {
    %c0_i32 = arith.constant 0 : i32
    %c0_i32_0 = arith.constant 0 : i32
    %c0_i32_1 = arith.constant 0 : i32
    return %c0_i32, %c0_i32_0 : i32, i32
  }
  func.func @transform_8(%arg0: i32) -> (i32, i32, i32) {
    %c0_i32 = arith.constant 0 : i32
    %c0_i32_0 = arith.constant 0 : i32
    %c0_i32_1 = arith.constant 0 : i32
    %c0_i32_2 = arith.constant 0 : i32
    return %c0_i32, %c0_i32_0, %c0_i32_1 : i32, i32, i32
  }
}

</mosaic_0001>

<bundles_post_ra>
// kernel: tpu_custom_call.1
= control target key start
LH: loop header
LB: loop body
LE: loop exit
PB: predicated region body
PF: predicated region fallthrough
CT: control target
= control target key end

     0   :  { %13 = vsyncpa [#allocation7], 0  ;;  %s8702_s0 = inlined_call_operand.hbm [shape: bf16[32,32], index: 0, kind: input, shape index: {}]   ;;  %s8703_s1 = inlined_call_operand.hbm [shape: bf16[32,1024], index: 1, kind: input, shape index: {}]   ;;  %s8704_s2 = inlined_call_operand.hbm [shape: f32[1,1024], index: 2, kind: input, shape index: {}]   ;;  %s8705_s3 = inlined_call_operand.hbm [shape: bf16[128,512], index: 3, kind: input, shape index: {}]   ;;  %s8706_s4 = inlined_call_operand.hbm [shape: bf16[128,512], index: 4, kind: input, shape index: {}]   ;;  %s8707_s5 = inlined_call_operand.hbm [shape: bf16[1024,128], index: 5, kind: input, shape index: {}]   ;;  %s8708_s6 = inlined_call_operand.hbm [shape: bf16[1024,128], index: 6, kind: input, shape index: {}]   ;;  %s8709_s7 = inlined_call_operand.vmem [shape: f32[1,128], index: 7, kind: input, shape index: {}]   ;;  %s8710_s8 = inlined_call_operand.vmem [shape: f32[2,3,128], index: 8, kind: output, shape index: {}]  }
   0x1   :  { %14 = vsyncpa [#allocation9], 0 }
   0x2   :  { %15 = vsyncpa [#allocation12], 0 }
   0x3   :  { %16 = vsyncpa [#allocation15], 0  ;;  %s6861_s27 = smov [#allocation8]   ;;  %s6659_s9 = scalar_lea.hbm %s8703_s1, 2048 }
   0x4   :  { %s34_s28 = sshll.u32 %s6861_s27, 4  ;;  %p6660_p0 = scmp.ne.s32.totalorder %s8703_s1, %s6659_s9  ;;  %s35_s28 = int_to_ptr.vmem [resolvable:$true] %s34_s28 }
   0x5   :  { %p6663_p1 = scmp.lt.u32.totalorder %s6659_s9, %s8703_s1 }
   0x7   :  { %p6665_p2 = pnand %p6663_p1, %p6660_p0 }
   0x9   :  { %6668 = shalt.err (!%p6665_p2)
}
   0xa   :  { %s6669_s14 = scalar_lea.vmem %s35_s28, 2048  ;;  %p6674_p4 = scmp.lt.s32.totalorder %s35_s28, %s35_s28 }
   0xb   :  { %p6670_p3 = scmp.ne.s32.totalorder %s35_s28, %s6669_s14  ;;  %p6675_p5 = scmp.lt.s32.totalorder %s6669_s14, %s6669_s14 }
   0xd   :  { %p6676_p6 = por %p6675_p5, %p6674_p4 }
   0xf   :  { %p6677_p7 = pnand %p6676_p6, %p6670_p3 }
  0x11   :  { %6680 = shalt.err (!%p6677_p7)
}
  0x12   :  { %s6862_s15 = smov 512   ;;  %s6863_s16 = smov 32  }
  0x13   :  { %40 = dma.hbm_to_vmem [thread:$0]  %s8703_s1, 2048, %s35_s28, [#allocation9], %s6862_s15, %s6862_s15, %s6863_s16  }
  0x14   :  { %s6864_s19 = smov [#allocation11]   ;;  %s6681_s23 = scalar_lea.hbm %s8705_s3, 4096 }
  0x15   :  { %s56_s20 = sshll.u32 %s6864_s19, 4  ;;  %p6682_p8 = scmp.ne.s32.totalorder %s8705_s3, %s6681_s23  ;;  %s57_s20 = int_to_ptr.vmem [resolvable:$true] %s56_s20 }
  0x16   :  { %p6685_p9 = scmp.lt.u32.totalorder %s6681_s23, %s8705_s3 }
  0x18   :  { %p6687_p10 = pnand %p6685_p9, %p6682_p8 }
  0x1a   :  { %6690 = shalt.err (!%p6687_p10)
}
  0x1b   :  { %s6691_s29 = scalar_lea.vmem %s57_s20, 4096  ;;  %p6696_p12 = scmp.lt.s32.totalorder %s57_s20, %s57_s20 }
  0x1c   :  { %p6692_p11 = scmp.ne.s32.totalorder %s57_s20, %s6691_s29  ;;  %p6697_p13 = scmp.lt.s32.totalorder %s6691_s29, %s6691_s29 }
  0x1e   :  { %p6698_p0 = por %p6697_p13, %p6696_p12 }
  0x20   :  { %p6699_p1 = pnand %p6698_p0, %p6692_p11 }
  0x22   :  { %6702 = shalt.err (!%p6699_p1)
}
  0x23   :  { %s6865_s1 = smov 256   ;;  %s6866_s28 = smov 16  }
  0x24   :  { %62 = dma.hbm_to_vmem [thread:$0]  %s8705_s3, 4096, %s57_s20, [#allocation12], %s6865_s1, %s6865_s1, %s6866_s28  }
  0x25   :  { %s6867_s10 = smov [#allocation14]   ;;  %s6868_s12 = smov [#allocation6]  }
  0x26   :  { %s80_s11 = sshll.u32 %s6867_s10, 4  ;;  %s22_s13 = sshll.u32 %s6868_s12, 4  ;;  %s81_s11 = int_to_ptr.vmem [resolvable:$true] %s80_s11  ;;  %s6950_s13 = int_to_ptr.vmem [resolvable:$true] %s22_s13 }
  0x27   :  { %s6703_s16 = scalar_lea.hbm %s8707_s5, 8192 }
  0x28   :  { %p6704_p2 = scmp.ne.s32.totalorder %s8707_s5, %s6703_s16  ;;  %p6707_p3 = scmp.lt.u32.totalorder %s6703_s16, %s8707_s5 }
  0x2a   :  { %p6709_p4 = pnand %p6707_p3, %p6704_p2 }
  0x2c   :  { %6712 = shalt.err (!%p6709_p4)
}
  0x2d   :  { %s6713_s3 = scalar_lea.vmem %s81_s11, 8192  ;;  %p6718_p6 = scmp.lt.s32.totalorder %s81_s11, %s81_s11 }
  0x2e   :  { %p6714_p5 = scmp.ne.s32.totalorder %s81_s11, %s6713_s3  ;;  %p6719_p7 = scmp.lt.s32.totalorder %s6713_s3, %s6713_s3 }
  0x30   :  { %p6720_p8 = por %p6719_p7, %p6718_p6 }
  0x32   :  { %p6721_p9 = pnand %p6720_p8, %p6714_p5 }
  0x34   :  { %6724 = shalt.err (!%p6721_p9)
}
  0x35   :  { %s6869_s20 = smov 64   ;;  %s6870_s22 = smov 4  }
  0x36   :  { %86 = dma.hbm_to_vmem [thread:$0]  %s8707_s5, 8192, %s81_s11, [#allocation15], %s6869_s20, %s6869_s20, %s6870_s22  }
  0x37   :  { %s6725_s27 = scalar_lea.hbm %s8702_s0, 256 }
  0x38   :  { %p6726_p10 = scmp.ne.s32.totalorder %s8702_s0, %s6725_s27  ;;  %p6729_p11 = scmp.lt.u32.totalorder %s6725_s27, %s8702_s0 }
  0x3a   :  { %p6731_p12 = pnand %p6729_p11, %p6726_p10 }
  0x3c   :  { %6734 = shalt.err (!%p6731_p12)
}
  0x3d   :  { %s6735_s12 = scalar_lea.vmem %s6950_s13, 256  ;;  %p6740_p0 = scmp.lt.s32.totalorder %s6950_s13, %s6950_s13 }
  0x3e   :  { %p6736_p13 = scmp.ne.s32.totalorder %s6950_s13, %s6735_s12  ;;  %p6741_p1 = scmp.lt.s32.totalorder %s6735_s12, %s6735_s12 }
  0x40   :  { %p6742_p2 = por %p6741_p1, %p6740_p0 }
  0x42   :  { %p6743_p3 = pnand %p6742_p2, %p6736_p13 }
  0x44   :  { %6746 = shalt.err (!%p6743_p3)
}
  0x45   :  { %28 = dma.hbm_to_vmem [thread:$0]  %s8702_s0, 256, %s6950_s13, [#allocation7], %s6869_s20, %s6869_s20, %s6870_s22  }
  0x46   :  { %s6871_s14 = smov [#allocation10]   ;;  %s6872_s16 = smov [#allocation13]  }
  0x47   :  { %s47_s15 = sshll.u32 %s6871_s14, 4  ;;  %s68_s17 = sshll.u32 %s6872_s16, 4  ;;  %s48_s15 = int_to_ptr.vmem [resolvable:$true] %s47_s15  ;;  %s6987_s17 = int_to_ptr.vmem [resolvable:$true] %s68_s17 }
  0x48   :  { %s6747_s21 = scalar_lea.hbm %s8704_s2, 128 }
  0x49   :  { %p6748_p4 = scmp.ne.s32.totalorder %s8704_s2, %s6747_s21  ;;  %p6751_p5 = scmp.lt.u32.totalorder %s6747_s21, %s8704_s2 }
  0x4b   :  { %p6753_p6 = pnand %p6751_p5, %p6748_p4 }
  0x4d   :  { %6756 = shalt.err (!%p6753_p6)
}
  0x4e   :  { %s6757_s0 = scalar_lea.vmem %s48_s15, 128  ;;  %p6762_p8 = scmp.lt.s32.totalorder %s48_s15, %s48_s15 }
  0x4f   :  { %p6758_p7 = scmp.ne.s32.totalorder %s48_s15, %s6757_s0  ;;  %p6763_p9 = scmp.lt.s32.totalorder %s6757_s0, %s6757_s0 }
  0x51   :  { %p6764_p10 = por %p6763_p9, %p6762_p8 }
  0x53   :  { %p6765_p11 = pnand %p6764_p10, %p6758_p7 }
  0x55   :  { %6768 = shalt.err (!%p6765_p11)
}
  0x56   :  { %50 = dma.hbm_to_vmem [thread:$0]  %s8704_s2, 128, %s48_s15, [#allocation9]  }
  0x57   :  { %s6769_s30 = scalar_lea.hbm %s8706_s4, 4096 }
  0x58   :  { %p6770_p12 = scmp.ne.s32.totalorder %s8706_s4, %s6769_s30  ;;  %p6773_p13 = scmp.lt.u32.totalorder %s6769_s30, %s8706_s4 }
  0x5a   :  { %p6775_p0 = pnand %p6773_p13, %p6770_p12 }
  0x5c   :  { %6778 = shalt.err (!%p6775_p0)
}
  0x5d   :  { %s6779_s11 = scalar_lea.vmem %s6987_s17, 4096  ;;  %p6784_p2 = scmp.lt.s32.totalorder %s6987_s17, %s6987_s17 }
  0x5e   :  { %p6780_p1 = scmp.ne.s32.totalorder %s6987_s17, %s6779_s11  ;;  %p6785_p3 = scmp.lt.s32.totalorder %s6779_s11, %s6779_s11 }
  0x60   :  { %p6786_p4 = por %p6785_p3, %p6784_p2 }
  0x62   :  { %p6787_p5 = pnand %p6786_p4, %p6780_p1 }
  0x64   :  { %6790 = shalt.err (!%p6787_p5)
}
  0x65   :  { %74 = dma.hbm_to_vmem [thread:$0]  %s8706_s4, 4096, %s6987_s17, [#allocation12], %s6865_s1, %s6865_s1, %s6866_s28  }
  0x66   :  { %s6873_s15 = smov [#allocation16]   ;;  %s6791_s21 = scalar_lea.hbm %s8708_s6, 8192 }
  0x67   :  { %s92_s16 = sshll.u32 %s6873_s15, 4  ;;  %p6792_p6 = scmp.ne.s32.totalorder %s8708_s6, %s6791_s21  ;;  %s93_s16 = int_to_ptr.vmem [resolvable:$true] %s92_s16 }
  0x68   :  { %p6795_p7 = scmp.lt.u32.totalorder %s6791_s21, %s8708_s6 }
  0x6a   :  { %p6797_p8 = pnand %p6795_p7, %p6792_p6 }
  0x6c   :  { %6800 = shalt.err (!%p6797_p8)
}
  0x6d   :  { %s6801_s0 = scalar_lea.vmem %s93_s16, 8192  ;;  %p6806_p10 = scmp.lt.s32.totalorder %s93_s16, %s93_s16 }
  0x6e   :  { %p6802_p9 = scmp.ne.s32.totalorder %s93_s16, %s6801_s0  ;;  %p6807_p11 = scmp.lt.s32.totalorder %s6801_s0, %s6801_s0 }
  0x70   :  { %p6808_p12 = por %p6807_p11, %p6806_p10 }
  0x72   :  { %p6809_p13 = pnand %p6808_p12, %p6802_p9 }
  0x74   :  { %6812 = shalt.err (!%p6809_p13)
}
  0x75   :  { %98 = dma.hbm_to_vmem [thread:$0]  %s8708_s6, 8192, %s93_s16, [#allocation15], %s6869_s20, %s6869_s20, %s6870_s22  }
  0x76   :  { %6833 = dma.done.wait [#allocation7], 256  }
  0x77   :  { %6834 = vsyncadd [#allocation7], 4294967040 }
  0x78   :  { %6835 = dma.done.wait [#allocation9], 2176  }
  0x79   :  { %6836 = vsyncadd [#allocation9], 4294965120 }
  0x7a   :  { %6837 = dma.done.wait [#allocation12], 8192  }
  0x7b   :  { %6838 = vsyncadd [#allocation12], 4294959104 }
  0x7c   :  { %6839 = dma.done.wait [#allocation15], 16384  }
  0x7d   :  { %6840 = vsyncadd [#allocation15], 4294950912  ;;  %v8711_v0 = vmov 0   ;;  %v7038_v1 = vld [vmem:[#allocation11] sm:$0xff]  ;;  %v7040_v2 = vld [vmem:[#allocation11 + $0x8] sm:$0xff]  ;;  %vm275_vm0 = vcmask 261120  }
  0x7e   :  { %314 = vmatprep.mubr.bf16.mxu0 %v8711_v0  ;;  %367 = vmatprep.mubr.bf16.mxu1 %v8711_v0  ;;  %9006 = vst [vmem:[#allocation21_spill] sm:$0xff] %v7038_v1  ;;  %9007 = vst [vmem:[#allocation22_spill] sm:$0xff] %v7040_v2  ;;  %v7042_v3 = vld [vmem:[#allocation11 + $0x10] sm:$0xff]  ;;  %v7044_v4 = vld [vmem:[#allocation11 + $0x18] sm:$0xff]  ;;  %s7337_s6 = smov 0  }
  0x7f   :  { %9008 = vst [vmem:[#allocation23_spill] sm:$0xff] %v7042_v3  ;;  %9009 = vst [vmem:[#allocation24_spill] sm:$0xff] %v7044_v4  ;;  %v7046_v5 = vld [vmem:[#allocation11 + $0x20] sm:$0xff]  ;;  %v7048_v6 = vld [vmem:[#allocation11 + $0x28] sm:$0xff] }
  0x80   :  { %9010 = vst [vmem:[#allocation25_spill] sm:$0xff] %v7046_v5  ;;  %9011 = vst [vmem:[#allocation26_spill] sm:$0xff] %v7048_v6  ;;  %v7050_v7 = vld [vmem:[#allocation11 + $0x30] sm:$0xff]  ;;  %v7052_v8 = vld [vmem:[#allocation11 + $0x38] sm:$0xff] }
  0x81   :  { %9012 = vst [vmem:[#allocation27_spill] sm:$0xff] %v7050_v7  ;;  %9013 = vst [vmem:[#allocation28_spill] sm:$0xff] %v7052_v8  ;;  %v7054_v9 = vld [vmem:[#allocation11 + $0x40] sm:$0xff]  ;;  %v7056_v10 = vld [vmem:[#allocation11 + $0x48] sm:$0xff] }
  0x82   :  { %9014 = vst [vmem:[#allocation29_spill] sm:$0xff] %v7054_v9  ;;  %9015 = vst [vmem:[#allocation30_spill] sm:$0xff] %v7056_v10  ;;  %v7058_v11 = vld [vmem:[#allocation11 + $0x50] sm:$0xff]  ;;  %v7060_v12 = vld [vmem:[#allocation11 + $0x58] sm:$0xff] }
  0x83   :  { %9016 = vst [vmem:[#allocation31_spill] sm:$0xff] %v7058_v11  ;;  %9017 = vst [vmem:[#allocation32_spill] sm:$0xff] %v7060_v12  ;;  %v7062_v13 = vld [vmem:[#allocation11 + $0x60] sm:$0xff]  ;;  %v7064_v14 = vld [vmem:[#allocation11 + $0x68] sm:$0xff] }
  0x84   :  { %9018 = vst [vmem:[#allocation33_spill] sm:$0xff] %v7062_v13  ;;  %9019 = vst [vmem:[#allocation34_spill] sm:$0xff] %v7064_v14  ;;  %v7066_v15 = vld [vmem:[#allocation11 + $0x70] sm:$0xff]  ;;  %v7068_v16 = vld [vmem:[#allocation11 + $0x78] sm:$0xff] }
  0x85   :  { %9020 = vst [vmem:[#allocation35_spill] sm:$0xff] %v7066_v15  ;;  %9021 = vst [vmem:[#allocation36_spill] sm:$0xff] %v7068_v16  ;;  %v7070_v17 = vld [vmem:[#allocation11 + $0x80] sm:$0xff]  ;;  %v7072_v18 = vld [vmem:[#allocation11 + $0x88] sm:$0xff] }
  0x86   :  { %9022 = vst [vmem:[#allocation37_spill] sm:$0xff] %v7070_v17  ;;  %9023 = vst [vmem:[#allocation38_spill] sm:$0xff] %v7072_v18  ;;  %v7074_v19 = vld [vmem:[#allocation11 + $0x90] sm:$0xff]  ;;  %v7076_v20 = vld [vmem:[#allocation11 + $0x98] sm:$0xff] }
  0x87   :  { %9024 = vst [vmem:[#allocation39_spill] sm:$0xff] %v7074_v19  ;;  %9025 = vst [vmem:[#allocation40_spill] sm:$0xff] %v7076_v20  ;;  %v7078_v21 = vld [vmem:[#allocation11 + $0xa0] sm:$0xff]  ;;  %v7080_v22 = vld [vmem:[#allocation11 + $0xa8] sm:$0xff] }
  0x88   :  { %9026 = vst [vmem:[#allocation41_spill] sm:$0xff] %v7078_v21  ;;  %9027 = vst [vmem:[#allocation42_spill] sm:$0xff] %v7080_v22  ;;  %v7082_v23 = vld [vmem:[#allocation11 + $0xb0] sm:$0xff]  ;;  %v7084_v24 = vld [vmem:[#allocation11 + $0xb8] sm:$0xff] }
  0x89   :  { %9028 = vst [vmem:[#allocation43_spill] sm:$0xff] %v7082_v23  ;;  %9029 = vst [vmem:[#allocation44_spill] sm:$0xff] %v7084_v24  ;;  %v7086_v25 = vld [vmem:[#allocation11 + $0xc0] sm:$0xff]  ;;  %v7088_v26 = vld [vmem:[#allocation11 + $0xc8] sm:$0xff] }
  0x8a   :  { %9030 = vst [vmem:[#allocation45_spill] sm:$0xff] %v7086_v25  ;;  %9031 = vst [vmem:[#allocation46_spill] sm:$0xff] %v7088_v26  ;;  %v7090_v27 = vld [vmem:[#allocation11 + $0xd0] sm:$0xff]  ;;  %v7092_v28 = vld [vmem:[#allocation11 + $0xd8] sm:$0xff] }
  0x8b   :  { %9032 = vst [vmem:[#allocation47_spill] sm:$0xff] %v7090_v27  ;;  %9033 = vst [vmem:[#allocation48_spill] sm:$0xff] %v7092_v28  ;;  %v7094_v29 = vld [vmem:[#allocation11 + $0xe0] sm:$0xff]  ;;  %v7096_v30 = vld [vmem:[#allocation11 + $0xe8] sm:$0xff] }
  0x8c   :  { %9034 = vst [vmem:[#allocation49_spill] sm:$0xff] %v7094_v29  ;;  %9035 = vst [vmem:[#allocation50_spill] sm:$0xff] %v7096_v30  ;;  %v7098_v31 = vld [vmem:[#allocation11 + $0xf0] sm:$0xff]  ;;  %v7100_v32 = vld [vmem:[#allocation11 + $0xf8] sm:$0xff] }
  0x8d   :  { %9036 = vst [vmem:[#allocation51_spill] sm:$0xff] %v7098_v31  ;;  %9037 = vst [vmem:[#allocation52_spill] sm:$0xff] %v7100_v32  ;;  %v7102_v33 = vld [vmem:[#allocation13] sm:$0xff]  ;;  %v7104_v34 = vld [vmem:[#allocation13 + $0x8] sm:$0xff] }
  0x8e   :  { %9038 = vst [vmem:[#allocation53_spill] sm:$0xff] %v7102_v33  ;;  %9039 = vst [vmem:[#allocation54_spill] sm:$0xff] %v7104_v34  ;;  %v7106_v35 = vld [vmem:[#allocation13 + $0x10] sm:$0xff]  ;;  %v7108_v36 = vld [vmem:[#allocation13 + $0x18] sm:$0xff] }
  0x8f   :  { %9040 = vst [vmem:[#allocation55_spill] sm:$0xff] %v7106_v35  ;;  %9041 = vst [vmem:[#allocation56_spill] sm:$0xff] %v7108_v36  ;;  %v7110_v37 = vld [vmem:[#allocation13 + $0x20] sm:$0xff]  ;;  %v7112_v38 = vld [vmem:[#allocation13 + $0x28] sm:$0xff] }
  0x90   :  { %9042 = vst [vmem:[#allocation57_spill] sm:$0xff] %v7110_v37  ;;  %9043 = vst [vmem:[#allocation58_spill] sm:$0xff] %v7112_v38  ;;  %v7114_v39 = vld [vmem:[#allocation13 + $0x30] sm:$0xff]  ;;  %v7116_v40 = vld [vmem:[#allocation13 + $0x38] sm:$0xff] }
  0x91   :  { %9044 = vst [vmem:[#allocation59_spill] sm:$0xff] %v7114_v39  ;;  %9045 = vst [vmem:[#allocation60_spill] sm:$0xff] %v7116_v40  ;;  %v7118_v41 = vld [vmem:[#allocation13 + $0x40] sm:$0xff]  ;;  %v7120_v42 = vld [vmem:[#allocation13 + $0x48] sm:$0xff] }
  0x92   :  { %9046 = vst [vmem:[#allocation61_spill] sm:$0xff] %v7118_v41  ;;  %9047 = vst [vmem:[#allocation62_spill] sm:$0xff] %v7120_v42  ;;  %v7122_v43 = vld [vmem:[#allocation13 + $0x50] sm:$0xff]  ;;  %v7124_v44 = vld [vmem:[#allocation13 + $0x58] sm:$0xff] }
  0x93   :  { %9048 = vst [vmem:[#allocation63_spill] sm:$0xff] %v7122_v43  ;;  %9049 = vst [vmem:[#allocation64_spill] sm:$0xff] %v7124_v44  ;;  %v7126_v45 = vld [vmem:[#allocation13 + $0x60] sm:$0xff]  ;;  %v7128_v46 = vld [vmem:[#allocation13 + $0x68] sm:$0xff] }
  0x94   :  { %9050 = vst [vmem:[#allocation65_spill] sm:$0xff] %v7126_v45  ;;  %9051 = vst [vmem:[#allocation66_spill] sm:$0xff] %v7128_v46  ;;  %v7130_v47 = vld [vmem:[#allocation13 + $0x70] sm:$0xff]  ;;  %v7132_v48 = vld [vmem:[#allocation13 + $0x78] sm:$0xff] }
  0x95   :  { %9052 = vst [vmem:[#allocation67_spill] sm:$0xff] %v7130_v47  ;;  %9053 = vst [vmem:[#allocation68_spill] sm:$0xff] %v7132_v48  ;;  %v7134_v49 = vld [vmem:[#allocation13 + $0x80] sm:$0xff]  ;;  %v7136_v50 = vld [vmem:[#allocation13 + $0x88] sm:$0xff] }
  0x96   :  { %9054 = vst [vmem:[#allocation69_spill] sm:$0xff] %v7134_v49  ;;  %9055 = vst [vmem:[#allocation70_spill] sm:$0xff] %v7136_v50  ;;  %v7138_v51 = vld [vmem:[#allocation13 + $0x90] sm:$0xff]  ;;  %v7140_v52 = vld [vmem:[#allocation13 + $0x98] sm:$0xff] }
  0x97   :  { %9056 = vst [vmem:[#allocation71_spill] sm:$0xff] %v7138_v51  ;;  %9057 = vst [vmem:[#allocation72_spill] sm:$0xff] %v7140_v52  ;;  %v7142_v53 = vld [vmem:[#allocation13 + $0xa0] sm:$0xff]  ;;  %v7144_v54 = vld [vmem:[#allocation13 + $0xa8] sm:$0xff] }
  0x98   :  { %9058 = vst [vmem:[#allocation73_spill] sm:$0xff] %v7142_v53  ;;  %9059 = vst [vmem:[#allocation74_spill] sm:$0xff] %v7144_v54  ;;  %v7146_v55 = vld [vmem:[#allocation13 + $0xb0] sm:$0xff]  ;;  %v7148_v56 = vld [vmem:[#allocation13 + $0xb8] sm:$0xff] }
  0x99   :  { %9060 = vst [vmem:[#allocation75_spill] sm:$0xff] %v7146_v55  ;;  %9061 = vst [vmem:[#allocation76_spill] sm:$0xff] %v7148_v56  ;;  %v7150_v57 = vld [vmem:[#allocation13 + $0xc0] sm:$0xff]  ;;  %v7152_v58 = vld [vmem:[#allocation13 + $0xc8] sm:$0xff] }
  0x9a   :  { %9062 = vst [vmem:[#allocation77_spill] sm:$0xff] %v7150_v57  ;;  %9063 = vst [vmem:[#allocation78_spill] sm:$0xff] %v7152_v58  ;;  %v7154_v59 = vld [vmem:[#allocation13 + $0xd0] sm:$0xff]  ;;  %v7156_v60 = vld [vmem:[#allocation13 + $0xd8] sm:$0xff] }
  0x9b   :  { %9064 = vst [vmem:[#allocation79_spill] sm:$0xff] %v7154_v59  ;;  %9065 = vst [vmem:[#allocation80_spill] sm:$0xff] %v7156_v60  ;;  %v7158_v61 = vld [vmem:[#allocation13 + $0xe0] sm:$0xff]  ;;  %v7160_v62 = vld [vmem:[#allocation13 + $0xe8] sm:$0xff] }
  0x9c   :  { %9066 = vst [vmem:[#allocation81_spill] sm:$0xff] %v7158_v61  ;;  %9067 = vst [vmem:[#allocation82_spill] sm:$0xff] %v7160_v62  ;;  %v7162_v63 = vld [vmem:[#allocation13 + $0xf0] sm:$0xff]  ;;  %v7164_v0 = vld [vmem:[#allocation13 + $0xf8] sm:$0xff] }
  0x9d   :  { %9068 = vst [vmem:[#allocation83_spill] sm:$0xff] %v7162_v63  ;;  %9069 = vst [vmem:[#allocation84_spill] sm:$0xff] %v7164_v0  ;;  %v127_v54 = vld [vmem:[#allocation8] sm:$0xff]  ;;  %v128_v56 = vld [vmem:[#allocation8 + $0x8] sm:$0xff] }
  0x9e   :  { %v131_v53 = vld [vmem:[#allocation8 + $0x20] sm:$0xff]  ;;  %v132_v50 = vld [vmem:[#allocation8 + $0x28] sm:$0xff]  ;;  %v129_v63 = vld [vmem:[#allocation8 + $0x10] sm:$0xff] }
  0x9f   :  { %v5458_v55 = vcombine.high %v127_v54, %v131_v53  ;;  %v5457_v57 = vcombine.low %v127_v54, %v131_v53  ;;  %v135_v52 = vld [vmem:[#allocation8 + $0x40] sm:$0xff]  ;;  %v5460_v58 = vcombine.high %v128_v56, %v132_v50  ;;  %v5459_v49 = vcombine.low %v128_v56, %v132_v50  ;;  %v136_v51 = vld [vmem:[#allocation8 + $0x48] sm:$0xff]  ;;  %v133_v0 = vld [vmem:[#allocation8 + $0x30] sm:$0xff] }
  0xa0   :  { %v139_v59 = vld [vmem:[#allocation8 + $0x60] sm:$0xff]  ;;  %v140_v60 = vld [vmem:[#allocation8 + $0x68] sm:$0xff]  ;;  %v130_v48 = vld [vmem:[#allocation8 + $0x18] sm:$0xff]  ;;  %v5462_v47 = vcombine.high %v129_v63, %v133_v0 }
  0xa1   :  { %282 = vmatprep.subr.bf16.mxu0 %v5458_v55  ;;  %v5466_v61 = vcombine.high %v135_v52, %v139_v59  ;;  %v5468_v46 = vcombine.high %v136_v51, %v140_v60  ;;  %335 = vmatprep.subr.bf16.mxu1 %v5460_v58  ;;  %v5465_v62 = vcombine.low %v135_v52, %v139_v59  ;;  %v134_v53 = vld [vmem:[#allocation8 + $0x38] sm:$0xff]  ;;  %v6325_v50 = vld [vmem:[#allocation6] sm:$0xff]  }
  0xa2   :  { %283 = vmatpush1.bf16.msra.mxu0 %v5457_v57  ;;  %336 = vmatpush1.bf16.msra.mxu1 %v5459_v49  ;;  %v5467_v45 = vcombine.low %v136_v51, %v140_v60  ;;  %v5464_v54 = vcombine.high %v130_v48, %v134_v53  ;;  %v137_v56 = vld [vmem:[#allocation8 + $0x50] sm:$0xff]  ;;  %v5461_v55 = vcombine.low %v129_v63, %v133_v0  ;;  %v138_v44 = vld [vmem:[#allocation8 + $0x58] sm:$0xff]  ;;  %v9070_v51 = vmov 0  }
  0xa3   :  { %284 = vmatprep.subr.bf16.mxu0 %v5466_v61  ;;  %337 = vmatprep.subr.bf16.mxu1 %v5468_v46  ;;  %v141_v42 = vld [vmem:[#allocation8 + $0x70] sm:$0xff]  ;;  %v142_v58 = vld [vmem:[#allocation8 + $0x78] sm:$0xff]  ;;  %v5463_v52 = vcombine.low %v130_v48, %v134_v53 }
  0xa4   :  { %v5470_v57 = vcombine.high %v137_v56, %v141_v42  ;;  %v5472_v49 = vcombine.high %v138_v44, %v142_v58  ;;  %v5469_v46 = vcombine.low %v137_v56, %v141_v42  ;;  %v5471_v59 = vcombine.low %v138_v44, %v142_v58  ;;  %v6326_v0 = vld [vmem:[#allocation6 + $0x8] sm:$0xff]  }
  0xa5   :  { %v145_v42 = vlaneseq }
  0xa6   :  { %285 = vmatpush1.bf16.msra.mxu0 %v5465_v62  ;;  %338 = vmatpush1.bf16.msra.mxu1 %v5467_v45 }
  0xa7   :  { %388 = vmatprep.subr.bf16.mxu0 %v5462_v47  ;;  %441 = vmatprep.subr.bf16.mxu1 %v5464_v54  ;;  %v7180_v44 = vshrl.u32 %v145_v42, 7  ;;  %v7183_v47 = vld [vmem:[#allocation10] sm:$0xff] }
  0xa9   :  { %5473 = vmatmul.mubr.msk.bf16.vlgmr.msra.gmra.mrb[0].mxu0 %vm275_vm0, %v6325_v50  ;;  %5475 = vmatmul.mubr.msk.bf16.vlgmr.msra.gmra.mrb[0].mxu1 %vm275_vm0, %v6325_v50  ;;  %9071 = vst [vmem:[#allocation85_spill] sm:$0xff] %v7180_v44  ;;  %v147_v45 = vsub.s32 0, %v7180_v44  ;;  %v155_v48 = vsub.s32 2, %v7180_v44  ;;  %v151_v60 = vsub.s32 1, %v7180_v44  ;;  %v159_v61 = vsub.s32 3, %v7180_v44 }
  0xaa   :  { %389 = vmatpush1.bf16.msra.mxu0 %v5461_v55  ;;  %442 = vmatpush1.bf16.msra.mxu1 %v5463_v52 }
  0xab   :  { %324 = vmatprep.mubr.bf16.mxu0 %v9070_v51  ;;  %377 = vmatprep.mubr.bf16.mxu1 %v9070_v51  ;;  %v7189_v62 = vrot.slane %v7183_v47, %v147_v45  ;;  %v7192_v63 = vrot.slane %v7183_v47, %v155_v48  ;;  %v7195_v53 = vrot.slane %v7183_v47, %v151_v60 }
  0xac   :  { %390 = vmatprep.subr.bf16.mxu0 %v5470_v57  ;;  %443 = vmatprep.subr.bf16.mxu1 %v5472_v49  ;;  %v7198_v54 = vrot.slane %v7183_v47, %v159_v61 }
  0xae   :  { %391 = vmatpush1.bf16.msra.mxu0 %v5469_v46  ;;  %444 = vmatpush1.bf16.msra.mxu1 %v5471_v59 }
  0xb1   :  { %5474 = vmatmul.mubr.msk.bf16.gmra.mrb[4].mxu0 %vm275_vm0, %v6326_v0  ;;  %5476 = vmatmul.mubr.msk.bf16.gmra.mrb[4].mxu1 %vm275_vm0, %v6326_v0 }
  0xb2   :  { %420 = vmatprep.mubr.bf16.mxu0 %v9070_v51  ;;  %473 = vmatprep.mubr.bf16.mxu1 %v9070_v51 }
  0xb9   :  { %5477 = vmatmul.mubr.msk.bf16.vlgmr.msra.gmra.mrb[8].mxu0 %vm275_vm0, %v6325_v50  ;;  %5479 = vmatmul.mubr.msk.bf16.vlgmr.msra.gmra.mrb[8].mxu1 %vm275_vm0, %v6325_v50 }
  0xba   :  { %430 = vmatprep.mubr.bf16.mxu0 %v9070_v51  ;;  %483 = vmatprep.mubr.bf16.mxu1 %v9070_v51  ;;  %v6875_v51 = vmov 1983009808  }
  0xbb   :  { %v541_v59 = vunpack.c.l.s4 %v6875_v51 }
  0xc1   :  { %5478 = vmatmul.mubr.msk.bf16.gmra.mrb[12].mxu0 %vm275_vm0, %v6326_v0  ;;  %5480 = vmatmul.mubr.msk.bf16.gmra.mrb[12].mxu1 %vm275_vm0, %v6326_v0 }
 0x17c   :  { %v316_v50 = vpop.f32.mrb[0].mxu0  ;;  %v369_v55 = vpop.f32.mrb[0].mxu1 }
 0x17d   :  { %v317_v56 = vadd.f32 %v316_v50, %v7189_v62  ;;  %v318_v58 = vpop.f32.mrb[1].mxu0  ;;  %v370_v52 = vadd.f32 %v369_v55, %v7192_v63  ;;  %v371_v49 = vpop.f32.mrb[1].mxu1 }
 0x17e   :  { %v319_v57 = vadd.f32 %v318_v58, %v7195_v53  ;;  %v320_v46 = vpop.f32.mrb[2].mxu0  ;;  %v372_v0 = vadd.f32 %v371_v49, %v7198_v54  ;;  %v373_v45 = vpop.f32.mrb[2].mxu1 }
 0x17f   :  { %494 = vst [vmem:[#allocation2] sm:$0xff] %v317_v56  ;;  %v321_v42 = vadd.f32 %v320_v46, %v7189_v62  ;;  %v322_v48 = vpop.f32.mrb[3].mxu0  ;;  %496 = vst [vmem:[#allocation2 + $0x10] sm:$0xff] %v370_v52  ;;  %v374_v60 = vadd.f32 %v373_v45, %v7192_v63  ;;  %v375_v50 = vpop.f32.mrb[3].mxu1  ;;  %v542_v56 = vunpack.c.0.s8 %v541_v59 }
 0x180   :  { %495 = vst [vmem:[#allocation2 + $0x8] sm:$0xff] %v319_v57  ;;  %v323_v61 = vadd.f32 %v322_v48, %v7195_v53  ;;  %497 = vst [vmem:[#allocation2 + $0x18] sm:$0xff] %v372_v0  ;;  %v376_v55 = vadd.f32 %v375_v50, %v7198_v54 }
 0x181   :  { %502 = vst [vmem:[#allocation2 + $0x40] sm:$0xff] %v321_v42  ;;  %504 = vst [vmem:[#allocation2 + $0x50] sm:$0xff] %v374_v60 }
 0x182   :  { %503 = vst [vmem:[#allocation2 + $0x48] sm:$0xff] %v323_v61  ;;  %505 = vst [vmem:[#allocation2 + $0x58] sm:$0xff] %v376_v55 }
 0x184   :  { %v326_v58 = vpop.f32.mrb[4].mxu0  ;;  %v379_v52 = vpop.f32.mrb[4].mxu1 }
 0x185   :  { %v327_v46 = vadd.f32 %v326_v58, %v7189_v62  ;;  %v328_v57 = vpop.f32.mrb[5].mxu0  ;;  %v380_v60 = vadd.f32 %v379_v52, %v7192_v63  ;;  %v7216_v58 = vsub.s32 %v542_v56, %v7180_v44 }
 0x186   :  { %v526_v42 = vld [vmem:[#allocation2] sm:$0x3]  ;;  %v580_v48 = vld [vmem:[#allocation2] sm:$0xc]  ;;  %v636_v50 = vld [vmem:[#allocation2] sm:$0x30]  ;;  %v329_v59 = vadd.f32 %v328_v57, %v7195_v53 }
 0x187   :  { %v692_v61 = vld [vmem:[#allocation2] sm:$0xc0]  ;;  %v528_v55 = vld [vmem:[#allocation2 + $0x10] sm:$0x3]  ;;  %v582_v49 = vld [vmem:[#allocation2 + $0x10] sm:$0xc] }
 0x188   :  { %510 = vst [vmem:[#allocation2 + $0x80] sm:$0xff] %v327_v46  ;;  %v638_v41 = vld [vmem:[#allocation2 + $0x10] sm:$0x30]  ;;  %v694_v51 = vld [vmem:[#allocation2 + $0x10] sm:$0xc0]  ;;  %512 = vst [vmem:[#allocation2 + $0x90] sm:$0xff] %v380_v60 }
 0x189   :  { %v527_v43 = vld [vmem:[#allocation2 + $0x8] sm:$0x3]  ;;  %511 = vst [vmem:[#allocation2 + $0x88] sm:$0xff] %v329_v59  ;;  %v581_v45 = vld [vmem:[#allocation2 + $0x8] sm:$0xc] }
 0x18a   :  { %v538_v0 = vcombine.low %v526_v42, %v527_v43  ;;  %v637_v38 = vld [vmem:[#allocation2 + $0x8] sm:$0x30]  ;;  %v693_v40 = vld [vmem:[#allocation2 + $0x8] sm:$0xc0]  ;;  %v592_v37 = vcombine.low %v580_v48, %v581_v45  ;;  %v529_v57 = vld [vmem:[#allocation2 + $0x18] sm:$0x3] }
 0x18b   :  { %v648_v52 = vcombine.high %v636_v50, %v637_v38  ;;  %v704_v39 = vcombine.high %v692_v61, %v693_v40  ;;  %v583_v34 = vld [vmem:[#allocation2 + $0x18] sm:$0xc]  ;;  %v639_v36 = vld [vmem:[#allocation2 + $0x18] sm:$0x30]  ;;  %v539_v56 = vcombine.low %v528_v55, %v529_v57  ;;  %v695_v30 = vld [vmem:[#allocation2 + $0x18] sm:$0xc0] }
 0x18c   :  { %v546_v33 = vrot.slane %v538_v0, %v7216_v58  ;;  %v593_v35 = vcombine.low %v582_v49, %v583_v34  ;;  %v649_v46 = vcombine.high %v638_v41, %v639_v36  ;;  %v748_v32 = vld [vmem:[#allocation2 + $0x40] sm:$0x3]  ;;  %v804_v29 = vld [vmem:[#allocation2 + $0x40] sm:$0xc]  ;;  %v600_v60 = vrot.slane %v592_v37, %v7216_v58  ;;  %v860_v38 = vld [vmem:[#allocation2 + $0x40] sm:$0x30] }
 0x18d   :  { %v656_v43 = vrot.slane %v648_v52, %v7216_v58  ;;  %v712_v42 = vrot.slane %v704_v39, %v7216_v58  ;;  %v705_v45 = vcombine.high %v694_v51, %v695_v30  ;;  %v916_v40 = vld [vmem:[#allocation2 + $0x40] sm:$0xc0]  ;;  %v750_v48 = vld [vmem:[#allocation2 + $0x50] sm:$0x3]  ;;  %v553_v50 = vrot.slane %v539_v56, %v7216_v58  ;;  %v806_v36 = vld [vmem:[#allocation2 + $0x50] sm:$0xc] }
 0x18e   :  { %v607_v0 = vrot.slane %v593_v35, %v7216_v58  ;;  %v663_v34 = vrot.slane %v649_v46, %v7216_v58  ;;  %v862_v41 = vld [vmem:[#allocation2 + $0x50] sm:$0x30]  ;;  %v918_v49 = vld [vmem:[#allocation2 + $0x50] sm:$0xc0]  ;;  %v749_v37 = vld [vmem:[#allocation2 + $0x48] sm:$0x3] }
 0x18f   :  { %v719_v59 = vrot.slane %v705_v45, %v7216_v58  ;;  %v805_v61 = vld [vmem:[#allocation2 + $0x48] sm:$0xc]  ;;  %v861_v55 = vld [vmem:[#allocation2 + $0x48] sm:$0x30]  ;;  %v554_v52 = vcombine.low %v546_v33, %v553_v50  ;;  %v760_v51 = vcombine.low %v748_v32, %v749_v37  ;;  %v917_v57 = vld [vmem:[#allocation2 + $0x48] sm:$0xc0] }
 0x190   :  { %v608_v39 = vcombine.high %v600_v60, %v607_v0  ;;  %v664_v30 = vcombine.low %v656_v43, %v663_v34  ;;  %v751_v31 = vld [vmem:[#allocation2 + $0x58] sm:$0x3]  ;;  %v807_v26 = vld [vmem:[#allocation2 + $0x58] sm:$0xc]  ;;  %v816_v28 = vcombine.low %v804_v29, %v805_v61  ;;  %v872_v35 = vcombine.high %v860_v38, %v861_v55  ;;  %v863_v46 = vld [vmem:[#allocation2 + $0x58] sm:$0x30] }
 0x191   :  { %v720_v56 = vcombine.high %v712_v42, %v719_v59  ;;  %v928_v25 = vcombine.high %v916_v40, %v917_v57  ;;  %v919_v27 = vld [vmem:[#allocation2 + $0x58] sm:$0xc0]  ;;  %556 = vst [vmem:[#allocation3] sm:$0xff] %v554_v52  ;;  %v768_v45 = vrot.slane %v760_v51, %v7216_v58  ;;  %v761_v22 = vcombine.low %v750_v48, %v751_v31  ;;  %v381_v0 = vpop.f32.mrb[5].mxu1  ;;  %v330_v31 = vpop.f32.mrb[6].mxu0 }
 0x192   :  { %611 = vst [vmem:[#allocation3 + $0x8] sm:$0xff] %v608_v39  ;;  %667 = vst [vmem:[#allocation3 + $0x10] sm:$0xff] %v664_v30  ;;  %v817_v24 = vcombine.low %v806_v36, %v807_v26  ;;  %v873_v33 = vcombine.high %v862_v41, %v863_v46  ;;  %v824_v32 = vrot.slane %v816_v28, %v7216_v58  ;;  %v9072_v26 = vsub.s32 4, %v7180_v44  ;;  %v383_v41 = vpop.f32.mrb[6].mxu1  ;;  %v7259_v46 = vld [vmem:[#allocation2 + $0x80] sm:$0xc] }
 0x193   :  { %723 = vst [vmem:[#allocation3 + $0x18] sm:$0xff] %v720_v56  ;;  %v880_v60 = vrot.slane %v872_v35, %v7216_v58  ;;  %v936_v43 = vrot.slane %v928_v25, %v7216_v58  ;;  %v929_v29 = vcombine.high %v918_v49, %v919_v27  ;;  %v775_v42 = vrot.slane %v761_v22, %v7216_v58  ;;  %v332_v49 = vpop.f32.mrb[7].mxu0  ;;  %v385_v55 = vpop.f32.mrb[7].mxu1  ;;  %v7257_v35 = vld [vmem:[#allocation2 + $0x80] sm:$0x3] }
 0x194   :  { %v831_v38 = vrot.slane %v817_v24, %v7216_v58  ;;  %v887_v40 = vrot.slane %v873_v33, %v7216_v58  ;;  %v7237_v48 = vrot.slane %v7183_v47, %v9072_v26  ;;  %v9073_v28 = vsub.s32 6, %v7180_v44  ;;  %v422_v52 = vpop.f32.mrb[8].mxu0  ;;  %v475_v57 = vpop.f32.mrb[8].mxu1 }
 0x195   :  { %v943_v50 = vrot.slane %v929_v29, %v7216_v58  ;;  %v9074_v22 = vsub.s32 5, %v7180_v44  ;;  %v776_v27 = vcombine.low %v768_v45, %v775_v42  ;;  %v9075_v59 = vsub.s32 7, %v7180_v44  ;;  %v424_v56 = vpop.f32.mrb[9].mxu0  ;;  %v1029_v29 = vld [vmem:[#allocation2 + $0x88] sm:$0xc] }
 0x196   :  { %v7242_v25 = vrot.slane %v7183_v47, %v9073_v28  ;;  %v832_v34 = vcombine.high %v824_v32, %v831_v38  ;;  %v888_v36 = vcombine.low %v880_v60, %v887_v40  ;;  %v382_v39 = vadd.f32 %v381_v0, %v7198_v54  ;;  %v477_v32 = vpop.f32.mrb[9].mxu1  ;;  %v426_v60 = vpop.f32.mrb[10].mxu0 }
 0x197   :  { %v7247_v24 = vrot.slane %v7183_v47, %v9074_v22  ;;  %v7252_v37 = vrot.slane %v7183_v47, %v9075_v59  ;;  %v944_v61 = vcombine.high %v936_v43, %v943_v50  ;;  %779 = vst [vmem:[#allocation3 + $0x20] sm:$0xff] %v776_v27  ;;  %v331_v30 = vadd.f32 %v330_v31, %v7189_v62  ;;  %v973_v43 = vld [vmem:[#allocation2 + $0x88] sm:$0x3]  ;;  %v428_v40 = vpop.f32.mrb[11].mxu0  ;;  %v1085_v50 = vld [vmem:[#allocation2 + $0x88] sm:$0x30] }
 0x198   :  { %835 = vst [vmem:[#allocation3 + $0x28] sm:$0xff] %v832_v34  ;;  %891 = vst [vmem:[#allocation3 + $0x30] sm:$0xff] %v888_v36  ;;  %v384_v51 = vadd.f32 %v383_v41, %v7192_v63  ;;  %v333_v47 = vadd.f32 %v332_v49, %v7195_v53  ;;  %v386_v45 = vadd.f32 %v385_v55, %v7198_v54  ;;  %v479_v53 = vpop.f32.mrb[10].mxu1  ;;  %v1084_v54 = vld [vmem:[#allocation2 + $0x80] sm:$0x30]  ;;  %v432_v28 = vpop.f32.mrb[12].mxu0 }
 0x199   :  { %947 = vst [vmem:[#allocation3 + $0x38] sm:$0xff] %v944_v61  ;;  %v423_v33 = vadd.f32 %v422_v52, %v7237_v48  ;;  %513 = vst [vmem:[#allocation2 + $0x98] sm:$0xff] %v382_v39  ;;  %v476_v62 = vadd.f32 %v475_v57, %v7242_v25  ;;  %v425_v63 = vadd.f32 %v424_v56, %v7247_v24  ;;  %v481_v26 = vpop.f32.mrb[11].mxu1  ;;  %v1140_v22 = vld [vmem:[#allocation2 + $0x80] sm:$0xc0]  ;;  %v434_v49 = vpop.f32.mrb[13].mxu0 }
 0x19a   :  { %518 = vst [vmem:[#allocation2 + $0xc0] sm:$0xff] %v331_v30  ;;  %520 = vst [vmem:[#allocation2 + $0xd0] sm:$0xff] %v384_v51  ;;  %v478_v42 = vadd.f32 %v477_v32, %v7252_v37  ;;  %v427_v38 = vadd.f32 %v426_v60, %v7237_v48  ;;  %v480_v0 = vadd.f32 %v479_v53, %v7242_v25  ;;  %v1141_v27 = vld [vmem:[#allocation2 + $0x88] sm:$0xc0]  ;;  %v485_v41 = vpop.f32.mrb[12].mxu1  ;;  %v436_v30 = vpop.f32.mrb[14].mxu0 }
 0x19b   :  { %519 = vst [vmem:[#allocation2 + $0xc8] sm:$0xff] %v333_v47  ;;  %521 = vst [vmem:[#allocation2 + $0xd8] sm:$0xff] %v386_v45  ;;  %v429_v31 = vadd.f32 %v428_v40, %v7247_v24  ;;  %v482_v34 = vadd.f32 %v481_v26, %v7252_v37  ;;  %v433_v36 = vadd.f32 %v432_v28, %v7237_v48  ;;  %v487_v39 = vpop.f32.mrb[13].mxu1  ;;  %v974_v51 = vld [vmem:[#allocation2 + $0x90] sm:$0x3] }
 0x19c   :  { %498 = vst [vmem:[#allocation2 + $0x20] sm:$0xff] %v423_v33  ;;  %500 = vst [vmem:[#allocation2 + $0x30] sm:$0xff] %v476_v62  ;;  %v984_v59 = vcombine.low %v7257_v35, %v973_v43  ;;  %v1040_v61 = vcombine.low %v7259_v46, %v1029_v29  ;;  %v486_v55 = vadd.f32 %v485_v41, %v7242_v25  ;;  %v489_v45 = vpop.f32.mrb[14].mxu1  ;;  %v438_v35 = vpop.f32.mrb[15].mxu0  ;;  %v1030_v33 = vld [vmem:[#allocation2 + $0x90] sm:$0xc] }
 0x19d   :  { %499 = vst [vmem:[#allocation2 + $0x28] sm:$0xff] %v425_v63  ;;  %501 = vst [vmem:[#allocation2 + $0x38] sm:$0xff] %v478_v42  ;;  %v435_v52 = vadd.f32 %v434_v49, %v7247_v24  ;;  %v1096_v57 = vcombine.high %v1084_v54, %v1085_v50  ;;  %v488_v56 = vadd.f32 %v487_v39, %v7252_v37  ;;  %v1086_v46 = vld [vmem:[#allocation2 + $0x90] sm:$0x30]  ;;  %v491_v29 = vpop.f32.mrb[15].mxu1 }
 0x19e   :  { %506 = vst [vmem:[#allocation2 + $0x60] sm:$0xff] %v427_v38  ;;  %508 = vst [vmem:[#allocation2 + $0x70] sm:$0xff] %v480_v0  ;;  %v437_v47 = vadd.f32 %v436_v30, %v7237_v48  ;;  %v1152_v32 = vcombine.high %v1140_v22, %v1141_v27  ;;  %v490_v60 = vadd.f32 %v489_v45, %v7242_v25  ;;  %v1142_v62 = vld [vmem:[#allocation2 + $0x90] sm:$0xc0] }
 0x19f   :  { %507 = vst [vmem:[#allocation2 + $0x68] sm:$0xff] %v429_v31  ;;  %509 = vst [vmem:[#allocation2 + $0x78] sm:$0xff] %v482_v34  ;;  %v439_v43 = vadd.f32 %v438_v35, %v7247_v24  ;;  %v492_v63 = vadd.f32 %v491_v29, %v7252_v37  ;;  %v992_v42 = vrot.slane %v984_v59, %v7216_v58 }
 0x1a0   :  { %514 = vst [vmem:[#allocation2 + $0xa0] sm:$0xff] %v433_v36  ;;  %516 = vst [vmem:[#allocation2 + $0xb0] sm:$0xff] %v486_v55  ;;  %v1048_v48 = vrot.slane %v1040_v61, %v7216_v58  ;;  %v975_v38 = vld [vmem:[#allocation2 + $0x98] sm:$0x3]  ;;  %v1031_v53 = vld [vmem:[#allocation2 + $0x98] sm:$0xc]  ;;  %v1104_v54 = vrot.slane %v1096_v57, %v7216_v58  ;;  %v1160_v37 = vrot.slane %v1152_v32, %v7216_v58 }
 0x1a1   :  { %515 = vst [vmem:[#allocation2 + $0xa8] sm:$0xff] %v435_v52  ;;  %517 = vst [vmem:[#allocation2 + $0xb8] sm:$0xff] %v488_v56  ;;  %v1087_v40 = vld [vmem:[#allocation2 + $0x98] sm:$0x30]  ;;  %v985_v25 = vcombine.low %v974_v51, %v975_v38  ;;  %v1041_v50 = vcombine.low %v1030_v33, %v1031_v53  ;;  %v1143_v0 = vld [vmem:[#allocation2 + $0x98] sm:$0xc0] }
 0x1a2   :  { %522 = vst [vmem:[#allocation2 + $0xe0] sm:$0xff] %v437_v47  ;;  %524 = vst [vmem:[#allocation2 + $0xf0] sm:$0xff] %v490_v60  ;;  %v1097_v24 = vcombine.high %v1086_v46, %v1087_v40  ;;  %v1196_v31 = vld [vmem:[#allocation2 + $0xc0] sm:$0x3]  ;;  %v1252_v26 = vld [vmem:[#allocation2 + $0xc0] sm:$0xc]  ;;  %v1153_v28 = vcombine.high %v1142_v62, %v1143_v0 }
 0x1a3   :  { %523 = vst [vmem:[#allocation2 + $0xe8] sm:$0xff] %v439_v43  ;;  %525 = vst [vmem:[#allocation2 + $0xf8] sm:$0xff] %v492_v63  ;;  %v1308_v22 = vld [vmem:[#allocation2 + $0xc0] sm:$0x30]  ;;  %v1364_v27 = vld [vmem:[#allocation2 + $0xc0] sm:$0xc0]  ;;  %v999_v36 = vrot.slane %v985_v25, %v7216_v58  ;;  %v1055_v41 = vrot.slane %v1041_v50, %v7216_v58 }
 0x1a4   :  { %v1198_v34 = vld [vmem:[#allocation2 + $0xd0] sm:$0x3]  ;;  %v1111_v49 = vrot.slane %v1097_v24, %v7216_v58  ;;  %v1254_v59 = vld [vmem:[#allocation2 + $0xd0] sm:$0xc]  ;;  %v1310_v61 = vld [vmem:[#allocation2 + $0xd0] sm:$0x30]  ;;  %v1167_v52 = vrot.slane %v1153_v28, %v7216_v58 }
 0x1a5   :  { %v1366_v55 = vld [vmem:[#allocation2 + $0xd0] sm:$0xc0]  ;;  %v1197_v39 = vld [vmem:[#allocation2 + $0xc8] sm:$0x3]  ;;  %v1253_v30 = vld [vmem:[#allocation2 + $0xc8] sm:$0xc]  ;;  %v1000_v57 = vcombine.low %v992_v42, %v999_v36  ;;  %v1056_v56 = vcombine.high %v1048_v48, %v1055_v41 }
 0x1a6   :  { %v1309_v51 = vld [vmem:[#allocation2 + $0xc8] sm:$0x30]  ;;  %v1112_v47 = vcombine.low %v1104_v54, %v1111_v49  ;;  %v1208_v45 = vcombine.low %v1196_v31, %v1197_v39  ;;  %v1365_v35 = vld [vmem:[#allocation2 + $0xc8] sm:$0xc0]  ;;  %v1199_v33 = vld [vmem:[#allocation2 + $0xd8] sm:$0x3]  ;;  %v1168_v32 = vcombine.high %v1160_v37, %v1167_v52  ;;  %v1264_v60 = vcombine.low %v1252_v26, %v1253_v30 }
 0x1a7   :  { %v1255_v46 = vld [vmem:[#allocation2 + $0xd8] sm:$0xc]  ;;  %v1320_v43 = vcombine.high %v1308_v22, %v1309_v51  ;;  %v1376_v29 = vcombine.high %v1364_v27, %v1365_v35  ;;  %v1311_v62 = vld [vmem:[#allocation2 + $0xd8] sm:$0x30]  ;;  %v1367_v63 = vld [vmem:[#allocation2 + $0xd8] sm:$0xc0]  ;;  %v1209_v40 = vcombine.low %v1198_v34, %v1199_v33 }
 0x1a8   :  { %v530_v38 = vld [vmem:[#allocation2 + $0x20] sm:$0x3]  ;;  %1003 = vst [vmem:[#allocation3 + $0x40] sm:$0xff] %v1000_v57  ;;  %1059 = vst [vmem:[#allocation3 + $0x48] sm:$0xff] %v1056_v56  ;;  %v1216_v53 = vrot.slane %v1208_v45, %v7216_v58  ;;  %v1265_v42 = vcombine.low %v1254_v59, %v1255_v46  ;;  %v1321_v48 = vcombine.high %v1310_v61, %v1311_v62  ;;  %v584_v54 = vld [vmem:[#allocation2 + $0x20] sm:$0xc] }
 0x1a9   :  { %1115 = vst [vmem:[#allocation3 + $0x50] sm:$0xff] %v1112_v47  ;;  %v640_v25 = vld [vmem:[#allocation2 + $0x20] sm:$0x30]  ;;  %v696_v50 = vld [vmem:[#allocation2 + $0x20] sm:$0xc0]  ;;  %1171 = vst [vmem:[#allocation3 + $0x58] sm:$0xff] %v1168_v32  ;;  %v1272_v24 = vrot.slane %v1264_v60, %v7216_v58  ;;  %v1328_v0 = vrot.slane %v1320_v43, %v7216_v58  ;;  %v1384_v31 = vrot.slane %v1376_v29, %v7216_v58 }
 0x1aa   :  { %v1377_v26 = vcombine.high %v1366_v55, %v1367_v63  ;;  %v532_v37 = vld [vmem:[#allocation2 + $0x30] sm:$0x3]  ;;  %v586_v28 = vld [vmem:[#allocation2 + $0x30] sm:$0xc]  ;;  %v642_v22 = vld [vmem:[#allocation2 + $0x30] sm:$0x30]  ;;  %v1223_v27 = vrot.slane %v1209_v40, %v7216_v58  ;;  %v1279_v34 = vrot.slane %v1265_v42, %v7216_v58  ;;  %v1335_v36 = vrot.slane %v1321_v48, %v7216_v58 }
 0x1ab   :  { %v698_v41 = vld [vmem:[#allocation2 + $0x30] sm:$0xc0]  ;;  %v531_v49 = vld [vmem:[#allocation2 + $0x28] sm:$0x3]  ;;  %v585_v59 = vld [vmem:[#allocation2 + $0x28] sm:$0xc] }
 0x1ac   :  { %v1391_v61 = vrot.slane %v1377_v26, %v7216_v58  ;;  %v561_v52 = vcombine.low %v530_v38, %v531_v49  ;;  %v616_v39 = vcombine.low %v584_v54, %v585_v59  ;;  %v641_v30 = vld [vmem:[#allocation2 + $0x28] sm:$0x30]  ;;  %v697_v51 = vld [vmem:[#allocation2 + $0x28] sm:$0xc0]  ;;  %v533_v57 = vld [vmem:[#allocation2 + $0x38] sm:$0x3]  ;;  %v1224_v55 = vcombine.low %v1216_v53, %v1223_v27 }
 0x1ad   :  { %v1280_v56 = vcombine.high %v1272_v24, %v1279_v34  ;;  %v1336_v47 = vcombine.low %v1328_v0, %v1335_v36  ;;  %v672_v45 = vcombine.high %v640_v25, %v641_v30  ;;  %v587_v35 = vld [vmem:[#allocation2 + $0x38] sm:$0xc]  ;;  %v643_v33 = vld [vmem:[#allocation2 + $0x38] sm:$0x30]  ;;  %v699_v46 = vld [vmem:[#allocation2 + $0x38] sm:$0xc0]  ;;  %v728_v29 = vcombine.high %v696_v50, %v697_v51 }
 0x1ae   :  { %v1392_v32 = vcombine.high %v1384_v31, %v1391_v61  ;;  %v569_v60 = vrot.slane %v561_v52, %v7216_v58  ;;  %v624_v43 = vrot.slane %v616_v39, %v7216_v58  ;;  %v752_v62 = vld [vmem:[#allocation2 + $0x60] sm:$0x3]  ;;  %1227 = vst [vmem:[#allocation3 + $0x60] sm:$0xff] %v1224_v55  ;;  %v562_v38 = vcombine.low %v532_v37, %v533_v57  ;;  %v808_v42 = vld [vmem:[#allocation2 + $0x60] sm:$0xc] }
 0x1af   :  { %1283 = vst [vmem:[#allocation3 + $0x68] sm:$0xff] %v1280_v56  ;;  %1339 = vst [vmem:[#allocation3 + $0x70] sm:$0xff] %v1336_v47  ;;  %v680_v63 = vrot.slane %v672_v45, %v7216_v58  ;;  %v617_v53 = vcombine.low %v586_v28, %v587_v35  ;;  %v673_v40 = vcombine.high %v642_v22, %v643_v33  ;;  %v864_v48 = vld [vmem:[#allocation2 + $0x60] sm:$0x30]  ;;  %v920_v54 = vld [vmem:[#allocation2 + $0x60] sm:$0xc0] }
 0x1b0   :  { %1395 = vst [vmem:[#allocation3 + $0x78] sm:$0xff] %v1392_v32  ;;  %v736_v25 = vrot.slane %v728_v29, %v7216_v58  ;;  %v729_v24 = vcombine.high %v698_v41, %v699_v46  ;;  %v754_v0 = vld [vmem:[#allocation2 + $0x70] sm:$0x3]  ;;  %v810_v31 = vld [vmem:[#allocation2 + $0x70] sm:$0xc]  ;;  %v576_v34 = vrot.slane %v562_v38, %v7216_v58 }
 0x1b1   :  { %v866_v26 = vld [vmem:[#allocation2 + $0x70] sm:$0x30]  ;;  %v922_v50 = vld [vmem:[#allocation2 + $0x70] sm:$0xc0]  ;;  %v753_v27 = vld [vmem:[#allocation2 + $0x68] sm:$0x3]  ;;  %v631_v36 = vrot.slane %v617_v53, %v7216_v58  ;;  %v687_v37 = vrot.slane %v673_v40, %v7216_v58 }
 0x1b2   :  { %v784_v28 = vcombine.low %v752_v62, %v753_v27  ;;  %v809_v22 = vld [vmem:[#allocation2 + $0x68] sm:$0xc]  ;;  %v865_v49 = vld [vmem:[#allocation2 + $0x68] sm:$0x30]  ;;  %v921_v59 = vld [vmem:[#allocation2 + $0x68] sm:$0xc0]  ;;  %v743_v61 = vrot.slane %v729_v24, %v7216_v58  ;;  %v577_v55 = vcombine.low %v569_v60, %v576_v34 }
 0x1b3   :  { %v840_v52 = vcombine.low %v808_v42, %v809_v22  ;;  %v896_v39 = vcombine.high %v864_v48, %v865_v49  ;;  %v952_v41 = vcombine.high %v920_v54, %v921_v59  ;;  %v755_v30 = vld [vmem:[#allocation2 + $0x78] sm:$0x3]  ;;  %v811_v51 = vld [vmem:[#allocation2 + $0x78] sm:$0xc]  ;;  %v867_v57 = vld [vmem:[#allocation2 + $0x78] sm:$0x30]  ;;  %v632_v56 = vcombine.high %v624_v43, %v631_v36 }
 0x1b4   :  { %v688_v47 = vcombine.low %v680_v63, %v687_v37  ;;  %v792_v45 = vrot.slane %v784_v28, %v7216_v58  ;;  %v923_v35 = vld [vmem:[#allocation2 + $0x78] sm:$0xc0]  ;;  %v744_v33 = vcombine.high %v736_v25, %v743_v61  ;;  %v976_v62 = vld [vmem:[#allocation2 + $0xa0] sm:$0x3]  ;;  %579 = vst [vmem:[#allocation4] sm:$0xff] %v577_v55  ;;  %v785_v38 = vcombine.low %v754_v0, %v755_v30 }
 0x1b5   :  { %v848_v46 = vrot.slane %v840_v52, %v7216_v58  ;;  %v904_v32 = vrot.slane %v896_v39, %v7216_v58  ;;  %v960_v29 = vrot.slane %v952_v41, %v7216_v58  ;;  %635 = vst [vmem:[#allocation4 + $0x8] sm:$0xff] %v632_v56  ;;  %v841_v53 = vcombine.low %v810_v31, %v811_v51  ;;  %v1032_v43 = vld [vmem:[#allocation2 + $0xa0] sm:$0xc]  ;;  %v1088_v63 = vld [vmem:[#allocation2 + $0xa0] sm:$0x30] }
 0x1b6   :  { %691 = vst [vmem:[#allocation4 + $0x10] sm:$0xff] %v688_v47  ;;  %v897_v40 = vcombine.high %v866_v26, %v867_v57  ;;  %v953_v60 = vcombine.high %v922_v50, %v923_v35  ;;  %v1144_v42 = vld [vmem:[#allocation2 + $0xa0] sm:$0xc0]  ;;  %747 = vst [vmem:[#allocation4 + $0x18] sm:$0xff] %v744_v33  ;;  %v978_v48 = vld [vmem:[#allocation2 + $0xb0] sm:$0x3]  ;;  %v799_v36 = vrot.slane %v785_v38, %v7216_v58 }
 0x1b7   :  { %v1034_v54 = vld [vmem:[#allocation2 + $0xb0] sm:$0xc]  ;;  %v1090_v25 = vld [vmem:[#allocation2 + $0xb0] sm:$0x30]  ;;  %v977_v24 = vld [vmem:[#allocation2 + $0xa8] sm:$0x3]  ;;  %v855_v37 = vrot.slane %v841_v53, %v7216_v58 }
 0x1b8   :  { %v1033_v27 = vld [vmem:[#allocation2 + $0xa8] sm:$0xc]  ;;  %v1089_v34 = vld [vmem:[#allocation2 + $0xa8] sm:$0x30]  ;;  %v911_v28 = vrot.slane %v897_v40, %v7216_v58  ;;  %v967_v0 = vrot.slane %v953_v60, %v7216_v58  ;;  %v1146_v31 = vld [vmem:[#allocation2 + $0xb0] sm:$0xc0]  ;;  %v1008_v22 = vcombine.low %v976_v62, %v977_v24  ;;  %v800_v30 = vcombine.low %v792_v45, %v799_v36 }
 0x1b9   :  { %v1145_v26 = vld [vmem:[#allocation2 + $0xa8] sm:$0xc0]  ;;  %v979_v50 = vld [vmem:[#allocation2 + $0xb8] sm:$0x3]  ;;  %v1064_v49 = vcombine.low %v1032_v43, %v1033_v27  ;;  %v1120_v59 = vcombine.high %v1088_v63, %v1089_v34  ;;  %v1035_v52 = vld [vmem:[#allocation2 + $0xb8] sm:$0xc]  ;;  %v856_v51 = vcombine.high %v848_v46, %v855_v37 }
 0x1ba   :  { %v1176_v61 = vcombine.high %v1144_v42, %v1145_v26  ;;  %v1091_v39 = vld [vmem:[#allocation2 + $0xb8] sm:$0x30]  ;;  %v1147_v41 = vld [vmem:[#allocation2 + $0xb8] sm:$0xc0]  ;;  %v912_v57 = vcombine.low %v904_v32, %v911_v28  ;;  %v968_v55 = vcombine.high %v960_v29, %v967_v0  ;;  %v1200_v56 = vld [vmem:[#allocation2 + $0xe0] sm:$0x3]  ;;  %v1016_v35 = vrot.slane %v1008_v22, %v7216_v58 }
 0x1bb   :  { %v1256_v47 = vld [vmem:[#allocation2 + $0xe0] sm:$0xc]  ;;  %v1072_v33 = vrot.slane %v1064_v49, %v7216_v58  ;;  %v1128_v38 = vrot.slane %v1120_v59, %v7216_v58  ;;  %v1312_v53 = vld [vmem:[#allocation2 + $0xe0] sm:$0x30]  ;;  %v1368_v40 = vld [vmem:[#allocation2 + $0xe0] sm:$0xc0]  ;;  %v1009_v45 = vcombine.low %v978_v48, %v979_v50  ;;  %v1065_v46 = vcombine.low %v1034_v54, %v1035_v52 }
 0x1bc   :  { %v1184_v62 = vrot.slane %v1176_v61, %v7216_v58  ;;  %803 = vst [vmem:[#allocation4 + $0x20] sm:$0xff] %v800_v30  ;;  %859 = vst [vmem:[#allocation4 + $0x28] sm:$0xff] %v856_v51  ;;  %v1121_v32 = vcombine.high %v1090_v25, %v1091_v39  ;;  %v1177_v29 = vcombine.high %v1146_v31, %v1147_v41  ;;  %v1202_v60 = vld [vmem:[#allocation2 + $0xf0] sm:$0x3]  ;;  %v1201_v43 = vld [vmem:[#allocation2 + $0xe8] sm:$0x3] }
 0x1bd   :  { %915 = vst [vmem:[#allocation4 + $0x30] sm:$0xff] %v912_v57  ;;  %971 = vst [vmem:[#allocation4 + $0x38] sm:$0xff] %v968_v55  ;;  %v1257_v63 = vld [vmem:[#allocation2 + $0xe8] sm:$0xc]  ;;  %v1258_v42 = vld [vmem:[#allocation2 + $0xf0] sm:$0xc]  ;;  %v1232_v24 = vcombine.low %v1200_v56, %v1201_v43  ;;  %v1023_v37 = vrot.slane %v1009_v45, %v7216_v58  ;;  %v1079_v28 = vrot.slane %v1065_v46, %v7216_v58 }
 0x1be   :  { %v1288_v27 = vcombine.low %v1256_v47, %v1257_v63  ;;  %v1313_v34 = vld [vmem:[#allocation2 + $0xe8] sm:$0x30]  ;;  %v1369_v36 = vld [vmem:[#allocation2 + $0xe8] sm:$0xc0]  ;;  %v1135_v0 = vrot.slane %v1121_v32, %v7216_v58  ;;  %v1191_v26 = vrot.slane %v1177_v29, %v7216_v58  ;;  %v1314_v48 = vld [vmem:[#allocation2 + $0xf0] sm:$0x30] }
 0x1bf   :  { %v1203_v54 = vld [vmem:[#allocation2 + $0xf8] sm:$0x3]  ;;  %v1259_v25 = vld [vmem:[#allocation2 + $0xf8] sm:$0xc]  ;;  %v1370_v31 = vld [vmem:[#allocation2 + $0xf0] sm:$0xc0]  ;;  %v1344_v50 = vcombine.high %v1312_v53, %v1313_v34  ;;  %v1400_v22 = vcombine.high %v1368_v40, %v1369_v36  ;;  %v1024_v61 = vcombine.low %v1016_v35, %v1023_v37  ;;  %v1080_v52 = vcombine.high %v1072_v33, %v1079_v28 }
 0x1c0   :  { %v1315_v49 = vld [vmem:[#allocation2 + $0xf8] sm:$0x30]  ;;  %v1371_v59 = vld [vmem:[#allocation2 + $0xf8] sm:$0xc0]  ;;  %v1136_v39 = vcombine.low %v1128_v38, %v1135_v0  ;;  %v1192_v41 = vcombine.high %v1184_v62, %v1191_v26  ;;  %v1240_v30 = vrot.slane %v1232_v24, %v7216_v58  ;;  %v1296_v51 = vrot.slane %v1288_v27, %v7216_v58 }
 0x1c1   :  { %v1233_v57 = vcombine.low %v1202_v60, %v1203_v54  ;;  %v1289_v55 = vcombine.low %v1258_v42, %v1259_v25  ;;  %1027 = vst [vmem:[#allocation4 + $0x40] sm:$0xff] %v1024_v61  ;;  %1083 = vst [vmem:[#allocation4 + $0x48] sm:$0xff] %v1080_v52  ;;  %v1352_v56 = vrot.slane %v1344_v50, %v7216_v58  ;;  %v7329_v60 = vmov 0.0  }
 0x1c2   :  { %1139 = vst [vmem:[#allocation4 + $0x50] sm:$0xff] %v1136_v39  ;;  %1195 = vst [vmem:[#allocation4 + $0x58] sm:$0xff] %v1192_v41  ;;  %v1408_v47 = vrot.slane %v1400_v22, %v7216_v58  ;;  %v1345_v53 = vcombine.high %v1314_v48, %v1315_v49  ;;  %v1401_v40 = vcombine.high %v1370_v31, %v1371_v59  ;;  %v7331_v43 = vmov 0  }
 0x1c3   :  { %v1247_v35 = vrot.slane %v1233_v57, %v7216_v58  ;;  %v1303_v33 = vrot.slane %v1289_v55, %v7216_v58  ;;  %v7333_v63 = vmov 0.0   ;;  %v7335_v42 = vmov 0  }
 0x1c4   :  { %v1359_v38 = vrot.slane %v1345_v53, %v7216_v58  ;;  %v1415_v62 = vrot.slane %v1401_v40, %v7216_v58 }
 0x1c5   :  { %v1248_v45 = vcombine.low %v1240_v30, %v1247_v35  ;;  %v1304_v46 = vcombine.high %v1296_v51, %v1303_v33 }
 0x1c6   :  { %v1360_v32 = vcombine.low %v1352_v56, %v1359_v38  ;;  %v1416_v29 = vcombine.high %v1408_v47, %v1415_v62 }
 0x1c7   :  { %1251 = vst [vmem:[#allocation4 + $0x60] sm:$0xff] %v1248_v45  ;;  %1307 = vst [vmem:[#allocation4 + $0x68] sm:$0xff] %v1304_v46 }
 0x1c8   :  { %1363 = vst [vmem:[#allocation4 + $0x70] sm:$0xff] %v1360_v32  ;;  %1419 = vst [vmem:[#allocation4 + $0x78] sm:$0xff] %v1416_v29 }
 0x1c9 LB: > { %v9076_v23 = vld [vmem:[#allocation43_spill] sm:$0xff]  ;;  %v9077_v21 = vld [vmem:[#allocation41_spill] sm:$0xff]  ;;  %v9078_v20 = vld [vmem:[#allocation40_spill] sm:$0xff]  ;;  %9098 = vst [vmem:[#allocation86_spill] sm:$0xff] %v6843_v60  ;;  %v8755_v25 = vmov 0   ;;  %s5731_s28 = sshll.u32 %s6859_s6, 5  ;;  %v6847_v43 = vphi %v7331_v43, %v2961_v43   ;;  %v6843_v60 = vphi %v7329_v60, %v2958_v60   ;;  %s6859_s6 = sphi %s7337_s6, %s1489_s6   ;;  %v6855_v42 = vphi %v7335_v42, %v2819_v42   ;;  %v6851_v63 = vphi %v7333_v63, %v2816_v63  }
 0x1ca   : > { %v9079_v19 = vld [vmem:[#allocation39_spill] sm:$0xff]  ;;  %v9080_v18 = vld [vmem:[#allocation38_spill] sm:$0xff]  ;;  %v9081_v17 = vld [vmem:[#allocation37_spill] sm:$0xff]  ;;  %1694 = vmatprep.mubr.bf16.mxu0 %v8755_v25  ;;  %1735 = vmatprep.mubr.bf16.mxu1 %v8755_v25  ;;  %v7456_v51 = vcombine.high %v9077_v21, %v9076_v23  ;;  %v7466_v47 = vcombine.low %v9077_v21, %v9076_v23  ;;  %s7721_s20 = scalar_lea.vmem [#allocation3], %s5731_s28  ;;  %s1494_s22 = ssub.s32 3, %s6859_s6 }
 0x1cb   : > { %v9082_v16 = vld [vmem:[#allocation36_spill] sm:$0xff]  ;;  %v9083_v15 = vld [vmem:[#allocation35_spill] sm:$0xff]  ;;  %v9084_v14 = vld [vmem:[#allocation34_spill] sm:$0xff]  ;;  %v7436_v52 = vcombine.high %v9081_v17, %v9079_v19  ;;  %v7440_v39 = vcombine.high %v9080_v18, %v9078_v20  ;;  %v7446_v41 = vcombine.low %v9081_v17, %v9079_v19  ;;  %v7450_v30 = vcombine.low %v9080_v18, %v9078_v20  ;;  %s5732_s17 = sshll.u32 %s1494_s22, 5  ;;  %s5520_s26 = sshll.u32 %s6859_s6, 3 }
 0x1cc   : > { %v9085_v13 = vld [vmem:[#allocation33_spill] sm:$0xff]  ;;  %v9086_v12 = vld [vmem:[#allocation32_spill] sm:$0xff]  ;;  %v9087_v11 = vld [vmem:[#allocation31_spill] sm:$0xff]  ;;  %v7420_v49 = vcombine.high %v9084_v14, %v9082_v16  ;;  %v7430_v61 = vcombine.low %v9084_v14, %v9082_v16  ;;  %9111 = vst [vmem:[#allocation99_spill] sm:$0xff] %v7456_v51  ;;  %s7729_s13 = scalar_lea.vmem [#allocation4], %s5732_s17  ;;  %s7737_s27 = scalar_lea.vmem [#allocation5], %s5520_s26 }
 0x1cd   : > { %v9088_v10 = vld [vmem:[#allocation30_spill] sm:$0xff]  ;;  %v9089_v9 = vld [vmem:[#allocation29_spill] sm:$0xff]  ;;  %v9090_v8 = vld [vmem:[#allocation28_spill] sm:$0xff]  ;;  %v7416_v22 = vcombine.high %v9085_v13, %v9083_v15  ;;  %v7426_v59 = vcombine.low %v9085_v13, %v9083_v15  ;;  %9107 = vst [vmem:[#allocation95_spill] sm:$0xff] %v7436_v52  ;;  %s5559_s29 = sshll.u32 %s1494_s22, 3  ;;  %s1489_s6 = sadd.s32 1, %s6859_s6  }
 0x1ce   : > { %v9091_v7 = vld [vmem:[#allocation27_spill] sm:$0xff]  ;;  %v9092_v6 = vld [vmem:[#allocation26_spill] sm:$0xff]  ;;  %v9093_v5 = vld [vmem:[#allocation25_spill] sm:$0xff]  ;;  %v7394_v48 = vcombine.high %v9089_v9, %v9087_v11  ;;  %v7398_v54 = vcombine.high %v9088_v10, %v9086_v12  ;;  %v7406_v31 = vcombine.low %v9089_v9, %v9087_v11  ;;  %v7410_v50 = vcombine.low %v9088_v10, %v9086_v12  ;;  %9104 = vst [vmem:[#allocation92_spill] sm:$0xff] %v7420_v49  ;;  %s7780_s30 = scalar_lea.vmem [#allocation5], %s5559_s29  ;;  %p1486_p0 = scmp.ge.s32.totalorder %s1489_s6, 4  }
 0x1cf   : > { %v9094_v4 = vld [vmem:[#allocation24_spill] sm:$0xff]  ;;  %v9095_v3 = vld [vmem:[#allocation23_spill] sm:$0xff]  ;;  %v9096_v2 = vld [vmem:[#allocation22_spill] sm:$0xff]  ;;  %v7372_v37 = vcombine.high %v9093_v5, %v9091_v7  ;;  %v7376_v28 = vcombine.high %v9092_v6, %v9090_v8  ;;  %v7384_v0 = vcombine.low %v9093_v5, %v9091_v7  ;;  %v7388_v26 = vcombine.low %v9092_v6, %v9090_v8  ;;  %9103 = vst [vmem:[#allocation91_spill] sm:$0xff] %v7416_v22 }
 0x1d0   : > { %v9097_v1 = vld [vmem:[#allocation21_spill] sm:$0xff]  ;;  %v7360_v27 = vcombine.high %v9096_v2, %v9094_v4  ;;  %v7368_v36 = vcombine.low %v9096_v2, %v9094_v4  ;;  %9099 = vst [vmem:[#allocation87_spill] sm:$0xff] %v7394_v48  ;;  %9100 = vst [vmem:[#allocation88_spill] sm:$0xff] %v7398_v54  ;;  %v9112_v57 = vld [vmem:[#allocation44_spill] sm:$0xff] }
 0x1d1   : > { %v7356_v24 = vcombine.high %v9097_v1, %v9095_v3  ;;  %v7364_v34 = vcombine.low %v9097_v1, %v9095_v3  ;;  %9101 = vst [vmem:[#allocation89_spill] sm:$0xff] %v7406_v31  ;;  %9102 = vst [vmem:[#allocation90_spill] sm:$0xff] %v7410_v50  ;;  %v9113_v55 = vld [vmem:[#allocation42_spill] sm:$0xff]  ;;  %v9117_v40 = vld [vmem:[#allocation47_spill] sm:$0xff] }
 0x1d2   : > { %1703 = vmatprep.subr.bf16.mxu1 %v7360_v27  ;;  %9105 = vst [vmem:[#allocation93_spill] sm:$0xff] %v7426_v59  ;;  %9106 = vst [vmem:[#allocation94_spill] sm:$0xff] %v7430_v61  ;;  %v7460_v56 = vcombine.high %v9113_v55, %v9112_v57  ;;  %v7470_v53 = vcombine.low %v9113_v55, %v9112_v57  ;;  %v9118_v35 = vld [vmem:[#allocation45_spill] sm:$0xff]  ;;  %v9120_v38 = vld [vmem:[#allocation48_spill] sm:$0xff] }
 0x1d3   : > { %1662 = vmatprep.subr.bf16.mxu0 %v7356_v24  ;;  %1704 = vmatpush1.bf16.msra.mxu1 %v7368_v36  ;;  %9108 = vst [vmem:[#allocation96_spill] sm:$0xff] %v7440_v39  ;;  %9109 = vst [vmem:[#allocation97_spill] sm:$0xff] %v7446_v41  ;;  %v7476_v33 = vcombine.high %v9118_v35, %v9117_v40  ;;  %v9121_v62 = vld [vmem:[#allocation46_spill] sm:$0xff]  ;;  %v7486_v46 = vcombine.low %v9118_v35, %v9117_v40  ;;  %v9125_v29 = vld [vmem:[#allocation51_spill] sm:$0xff] }
 0x1d4   : > { %1663 = vmatpush1.bf16.msra.mxu0 %v7364_v34  ;;  %1705 = vmatprep.subr.bf16.mxu1 %v7376_v28  ;;  %9110 = vst [vmem:[#allocation98_spill] sm:$0xff] %v7450_v30  ;;  %9114 = vst [vmem:[#allocation100_spill] sm:$0xff] %v7460_v56  ;;  %v7480_v45 = vcombine.high %v9121_v62, %v9120_v38  ;;  %v7490_v32 = vcombine.low %v9121_v62, %v9120_v38  ;;  %v9126_v25 = vld [vmem:[#allocation49_spill] sm:$0xff]  ;;  %v9128_v2 = vld [vmem:[#allocation52_spill] sm:$0xff] }
 0x1d5   : > { %1664 = vmatprep.subr.bf16.mxu0 %v7372_v37  ;;  %9115 = vst [vmem:[#allocation101_spill] sm:$0xff] %v7466_v47  ;;  %9116 = vst [vmem:[#allocation102_spill] sm:$0xff] %v7470_v53  ;;  %v7496_v1 = vcombine.high %v9126_v25, %v9125_v29  ;;  %v9129_v3 = vld [vmem:[#allocation50_spill] sm:$0xff]  ;;  %v7506_v5 = vcombine.low %v9126_v25, %v9125_v29  ;;  %v9133_v7 = vld [vmem:[#allocation55_spill] sm:$0xff]  ;;  %v9148_v25 = vmov 0  }
 0x1d6   : > { %9119 = vst [vmem:[#allocation103_spill] sm:$0xff] %v7476_v33  ;;  %9122 = vst [vmem:[#allocation104_spill] sm:$0xff] %v7480_v45  ;;  %v7500_v4 = vcombine.high %v9129_v3, %v9128_v2  ;;  %v7510_v6 = vcombine.low %v9129_v3, %v9128_v2  ;;  %v9134_v8 = vld [vmem:[#allocation53_spill] sm:$0xff]  ;;  %v9136_v10 = vld [vmem:[#allocation56_spill] sm:$0xff] }
 0x1d7   : > { %1706 = vmatpush1.bf16.msra.mxu1 %v7388_v26  ;;  %9123 = vst [vmem:[#allocation105_spill] sm:$0xff] %v7486_v46  ;;  %9124 = vst [vmem:[#allocation106_spill] sm:$0xff] %v7490_v32  ;;  %v7516_v9 = vcombine.high %v9134_v8, %v9133_v7  ;;  %v9137_v11 = vld [vmem:[#allocation54_spill] sm:$0xff]  ;;  %v7526_v2 = vcombine.low %v9134_v8, %v9133_v7  ;;  %v9139_v13 = vld [vmem:[#allocation59_spill] sm:$0xff] }
 0x1d8   : > { %1665 = vmatpush1.bf16.msra.mxu0 %v7384_v0  ;;  %1707 = vmatprep.subr.bf16.mxu1 %v7398_v54  ;;  %9127 = vst [vmem:[#allocation107_spill] sm:$0xff] %v7496_v1  ;;  %9130 = vst [vmem:[#allocation108_spill] sm:$0xff] %v7500_v4  ;;  %v7520_v12 = vcombine.high %v9137_v11, %v9136_v10  ;;  %v7530_v3 = vcombine.low %v9137_v11, %v9136_v10  ;;  %v9140_v14 = vld [vmem:[#allocation57_spill] sm:$0xff]  ;;  %v9141_v16 = vld [vmem:[#allocation60_spill] sm:$0xff] }
 0x1d9   : > { %1666 = vmatprep.subr.bf16.mxu0 %v7394_v48  ;;  %9131 = vst [vmem:[#allocation109_spill] sm:$0xff] %v7506_v5  ;;  %9132 = vst [vmem:[#allocation110_spill] sm:$0xff] %v7510_v6  ;;  %v7536_v15 = vcombine.high %v9140_v14, %v9139_v13  ;;  %v9142_v17 = vld [vmem:[#allocation58_spill] sm:$0xff]  ;;  %v7548_v7 = vcombine.low %v9140_v14, %v9139_v13  ;;  %v9143_v10 = vld [vmem:[#allocation63_spill] sm:$0xff] }
 0x1da   : > { %9135 = vst [vmem:[#allocation111_spill] sm:$0xff] %v7516_v9  ;;  %9138 = vst [vmem:[#allocation112_spill] sm:$0xff] %v7520_v12  ;;  %v7540_v18 = vcombine.high %v9142_v17, %v9141_v16  ;;  %v7552_v8 = vcombine.low %v9142_v17, %v9141_v16  ;;  %v9144_v11 = vld [vmem:[#allocation61_spill] sm:$0xff]  ;;  %v9147_v21 = vld [vmem:[#allocation62_spill] sm:$0xff] }
 0x1db   : > { %1708 = vmatpush1.bf16.msra.mxu1 %v7410_v50  ;;  %v7558_v19 = vcombine.high %v9144_v11, %v9143_v10  ;;  %v7570_v13 = vcombine.low %v9144_v11, %v9143_v10  ;;  %v9152_v17 = vld [vmem:[#allocation65_spill] sm:$0xff]  ;;  %v9154_v35 = vld [vmem:[#allocation68_spill] sm:$0xff]  ;;  %v9155_v38 = vld [vmem:[#allocation66_spill] sm:$0xff] }
 0x1dc   : > { %1667 = vmatpush1.bf16.msra.mxu0 %v7406_v31  ;;  %1709 = vmatprep.subr.bf16.mxu1 %v7420_v49  ;;  %v7584_v40 = vcombine.high %v9155_v38, %v9154_v35  ;;  %v7594_v11 = vcombine.low %v9155_v38, %v9154_v35  ;;  %v9163_v57 = vld [vmem:[#allocation72_spill] sm:$0xff]  ;;  %v9164_v62 = vld [vmem:[#allocation70_spill] sm:$0xff]  ;;  %v9170_v38 = vld [vmem:[#allocation73_spill] sm:$0xff] }
 0x1dd   : > { %1668 = vmatprep.subr.bf16.mxu0 %v7416_v22  ;;  %v7604_v44 = vcombine.high %v9164_v62, %v9163_v57 }
 0x1de   : > { %9156 = vst [vmem:[#allocation115_spill] sm:$0xff] %v7584_v40  ;;  %9158 = vst [vmem:[#allocation117_spill] sm:$0xff] %v7594_v11 }
 0x1df   : > { %1710 = vmatpush1.bf16.msra.mxu1 %v7430_v61  ;;  %9165 = vst [vmem:[#allocation119_spill] sm:$0xff] %v7604_v44 }
 0x1e0   : > { %1669 = vmatpush1.bf16.msra.mxu0 %v7426_v59  ;;  %1711 = vmatprep.subr.bf16.mxu1 %v7440_v39 }
 0x1e1   : > { %1670 = vmatprep.subr.bf16.mxu0 %v7436_v52 }
 0x1e3   : > { %1712 = vmatpush1.bf16.msra.mxu1 %v7450_v30 }
 0x1e4   : > { %1671 = vmatpush1.bf16.msra.mxu0 %v7446_v41  ;;  %1713 = vmatprep.subr.bf16.mxu1 %v7460_v56 }
 0x1e5   : > { %1672 = vmatprep.subr.bf16.mxu0 %v7456_v51 }
 0x1e7   : > { %1714 = vmatpush1.bf16.msra.mxu1 %v7470_v53 }
 0x1e8   : > { %1673 = vmatpush1.bf16.msra.mxu0 %v7466_v47  ;;  %1715 = vmatprep.subr.bf16.mxu1 %v7480_v45 }
 0x1e9   : > { %1674 = vmatprep.subr.bf16.mxu0 %v7476_v33 }
 0x1eb   : > { %1716 = vmatpush1.bf16.msra.mxu1 %v7490_v32 }
 0x1ec   : > { %1675 = vmatpush1.bf16.msra.mxu0 %v7486_v46  ;;  %1717 = vmatprep.subr.bf16.mxu1 %v7500_v4 }
 0x1ed   : > { %1676 = vmatprep.subr.bf16.mxu0 %v7496_v1 }
 0x1ef   : > { %1718 = vmatpush1.bf16.msra.mxu1 %v7510_v6 }
 0x1f0   : > { %1677 = vmatpush1.bf16.msra.mxu0 %v7506_v5  ;;  %2007 = vmatprep.subr.bf16.mxu1 %v7520_v12 }
 0x1f1   : > { %1966 = vmatprep.subr.bf16.mxu0 %v7516_v9 }
 0x1f2   : > { %1736 = vmatmul.mubr.bf16.vlgmr.msra.gmra.mrb[0].mxu1 %v6855_v42 }
 0x1f3   : > { %1695 = vmatmul.mubr.bf16.vlgmr.msra.gmra.mrb[0].mxu0 %v6855_v42  ;;  %2008 = vmatpush1.bf16.msra.mxu1 %v7530_v3  ;;  %v9145_v42 = vld [vmem:[#allocation64_spill] sm:$0xff] }
 0x1f4   : > { %1967 = vmatpush1.bf16.msra.mxu0 %v7526_v2  ;;  %2009 = vmatprep.subr.bf16.mxu1 %v7540_v18  ;;  %v9146_v20 = vmov %v9145_v42  ;;  %v7562_v23 = vcombine.high %v9147_v21, %v9145_v42  ;;  %v9150_v42 = vld [vmem:[#allocation67_spill] sm:$0xff] }
 0x1f5   : > { %1968 = vmatprep.subr.bf16.mxu0 %v7536_v15  ;;  %1998 = vmatprep.mubr.bf16.mxu0 %v9148_v25  ;;  %v7574_v14 = vcombine.low %v9147_v21, %v9146_v20  ;;  %v9151_v16 = vmov %v9150_v42  ;;  %v7580_v29 = vcombine.high %v9152_v17, %v9150_v42  ;;  %v9159_v42 = vld [vmem:[#allocation71_spill] sm:$0xff]  ;;  %v9161_v21 = vld [vmem:[#allocation69_spill] sm:$0xff] }
 0x1f6   : > { %2039 = vmatprep.mubr.bf16.mxu1 %v9148_v25  ;;  %v7590_v10 = vcombine.low %v9152_v17, %v9151_v16  ;;  %v9160_v20 = vmov %v9159_v42  ;;  %v7600_v55 = vcombine.high %v9161_v21, %v9159_v42  ;;  %v7614_v17 = vcombine.low %v9164_v62, %v9163_v57  ;;  %v9168_v42 = vld [vmem:[#allocation75_spill] sm:$0xff]  ;;  %v9178_v62 = vld [vmem:[#allocation77_spill] sm:$0xff] }
 0x1f7   : > { %2010 = vmatpush1.bf16.msra.mxu1 %v7552_v8  ;;  %9149 = vst [vmem:[#allocation113_spill] sm:$0xff] %v7574_v14  ;;  %9153 = vst [vmem:[#allocation114_spill] sm:$0xff] %v7580_v29  ;;  %v7610_v16 = vcombine.low %v9161_v21, %v9160_v20  ;;  %v9169_v35 = vmov %v9168_v42  ;;  %v7620_v60 = vcombine.high %v9170_v38, %v9168_v42  ;;  %v9176_v42 = vld [vmem:[#allocation79_spill] sm:$0xff] }
 0x1f8   : > { %1969 = vmatpush1.bf16.msra.mxu0 %v7548_v7  ;;  %2011 = vmatprep.subr.bf16.mxu1 %v7562_v23  ;;  %9157 = vst [vmem:[#allocation116_spill] sm:$0xff] %v7590_v10  ;;  %9162 = vst [vmem:[#allocation118_spill] sm:$0xff] %v7600_v55  ;;  %v7630_v20 = vcombine.low %v9170_v38, %v9169_v35  ;;  %v9177_v57 = vmov %v9176_v42 }
 0x1f9   : > { %1970 = vmatprep.subr.bf16.mxu0 %v7558_v19  ;;  %9166 = vst [vmem:[#allocation120_spill] sm:$0xff] %v7610_v16  ;;  %9167 = vst [vmem:[#allocation121_spill] sm:$0xff] %v7614_v17 }
 0x1fa   : > { %9171 = vst [vmem:[#allocation122_spill] sm:$0xff] %v7620_v60  ;;  %9175 = vst [vmem:[#allocation124_spill] sm:$0xff] %v7630_v20 }
 0x1fb   : > { %2012 = vmatpush1.bf16.msra.mxu1 %v7574_v14 }
 0x1fc   : > { %1971 = vmatpush1.bf16.msra.mxu0 %v7570_v13  ;;  %2013 = vmatprep.subr.bf16.mxu1 %v7584_v40  ;;  %v9172_v40 = vld [vmem:[#allocation76_spill] sm:$0xff] }
 0x1fd   : > { %1972 = vmatprep.subr.bf16.mxu0 %v7580_v29 }
 0x1ff   : > { %2014 = vmatpush1.bf16.msra.mxu1 %v7594_v11 }
 0x200   : > { %1973 = vmatpush1.bf16.msra.mxu0 %v7590_v10  ;;  %2015 = vmatprep.subr.bf16.mxu1 %v7604_v44  ;;  %v9173_v10 = vld [vmem:[#allocation74_spill] sm:$0xff]  ;;  %v7640_v44 = vcombine.high %v9178_v62, %v9176_v42  ;;  %v9181_v42 = vld [vmem:[#allocation83_spill] sm:$0xff] }
 0x201   : > { %1974 = vmatprep.subr.bf16.mxu0 %v7600_v55  ;;  %v7624_v29 = vcombine.high %v9173_v10, %v9172_v40  ;;  %v7634_v21 = vcombine.low %v9173_v10, %v9172_v40  ;;  %v9179_v55 = vld [vmem:[#allocation80_spill] sm:$0xff]  ;;  %v7650_v10 = vcombine.low %v9178_v62, %v9177_v57  ;;  %v9182_v38 = vmov %v9181_v42  ;;  %v9183_v40 = vld [vmem:[#allocation81_spill] sm:$0xff] }
 0x203   : > { %9174 = vst [vmem:[#allocation123_spill] sm:$0xff] %v7624_v29  ;;  %2016 = vmatpush1.bf16.msra.mxu1 %v7614_v17 }
 0x204   : > { %1975 = vmatpush1.bf16.msra.mxu0 %v7610_v16  ;;  %2017 = vmatprep.subr.bf16.mxu1 %v7624_v29  ;;  %v9180_v16 = vld [vmem:[#allocation78_spill] sm:$0xff]  ;;  %v7660_v29 = vcombine.high %v9183_v40, %v9181_v42 }
 0x205   : > { %1976 = vmatprep.subr.bf16.mxu0 %v7620_v60  ;;  %v7644_v11 = vcombine.high %v9180_v16, %v9179_v55  ;;  %v7654_v35 = vcombine.low %v9180_v16, %v9179_v55  ;;  %v9184_v60 = vld [vmem:[#allocation84_spill] sm:$0xff]  ;;  %v7670_v16 = vcombine.low %v9183_v40, %v9182_v38 }
 0x206   : > { %v9185_v17 = vmov %v9184_v60 }
 0x207   : > { %2018 = vmatpush1.bf16.msra.mxu1 %v7634_v21 }
 0x208   : > { %1977 = vmatpush1.bf16.msra.mxu0 %v7630_v20  ;;  %2019 = vmatprep.subr.bf16.mxu1 %v7644_v11  ;;  %v9186_v20 = vld [vmem:[#allocation82_spill] sm:$0xff] }
 0x209   : > { %1978 = vmatprep.subr.bf16.mxu0 %v7640_v44  ;;  %v7664_v14 = vcombine.high %v9186_v20, %v9184_v60  ;;  %v7674_v55 = vcombine.low %v9186_v20, %v9185_v17 }
 0x20b   : > { %2020 = vmatpush1.bf16.msra.mxu1 %v7654_v35 }
 0x20c   : > { %1979 = vmatpush1.bf16.msra.mxu0 %v7650_v10  ;;  %2021 = vmatprep.subr.bf16.mxu1 %v7664_v14 }
 0x20d   : > { %1980 = vmatprep.subr.bf16.mxu0 %v7660_v29 }
 0x20f   : > { %2022 = vmatpush1.bf16.msra.mxu1 %v7674_v55 }
 0x210   : > { %1981 = vmatpush1.bf16.msra.mxu0 %v7670_v16  ;;  %2153 = vmatprep.subr.bf16.mxu1 %v7360_v27 }
 0x211   : > { %2112 = vmatprep.subr.bf16.mxu0 %v7356_v24 }
 0x212   : > { %2040 = vmatmul.mubr.bf16.vlgmr.msra.gmra.mrb[4].mxu1 %v6847_v43 }
 0x213   : > { %1999 = vmatmul.mubr.bf16.vlgmr.msra.gmra.mrb[4].mxu0 %v6847_v43  ;;  %2154 = vmatpush1.bf16.msra.mxu1 %v7368_v36 }
 0x214   : > { %2113 = vmatpush1.bf16.msra.mxu0 %v7364_v34  ;;  %2155 = vmatprep.subr.bf16.mxu1 %v7376_v28 }
 0x215   : > { %2114 = vmatprep.subr.bf16.mxu0 %v7372_v37  ;;  %2144 = vmatprep.mubr.bf16.mxu0 %v9148_v25 }
 0x216   : > { %2185 = vmatprep.mubr.bf16.mxu1 %v9148_v25 }
 0x217   : > { %2156 = vmatpush1.bf16.msra.mxu1 %v7388_v26 }
 0x218   : > { %2115 = vmatpush1.bf16.msra.mxu0 %v7384_v0  ;;  %2157 = vmatprep.subr.bf16.mxu1 %v7398_v54 }
 0x219   : > { %2116 = vmatprep.subr.bf16.mxu0 %v7394_v48 }
 0x21b   : > { %2158 = vmatpush1.bf16.msra.mxu1 %v7410_v50 }
 0x21c   : > { %2117 = vmatpush1.bf16.msra.mxu0 %v7406_v31  ;;  %2159 = vmatprep.subr.bf16.mxu1 %v7420_v49 }
 0x21d   : > { %2118 = vmatprep.subr.bf16.mxu0 %v7416_v22 }
 0x21f   : > { %2160 = vmatpush1.bf16.msra.mxu1 %v7430_v61 }
 0x220   : > { %2119 = vmatpush1.bf16.msra.mxu0 %v7426_v59  ;;  %2161 = vmatprep.subr.bf16.mxu1 %v7440_v39 }
 0x221   : > { %2120 = vmatprep.subr.bf16.mxu0 %v7436_v52 }
 0x223   : > { %2162 = vmatpush1.bf16.msra.mxu1 %v7450_v30 }
 0x224   : > { %2121 = vmatpush1.bf16.msra.mxu0 %v7446_v41  ;;  %2163 = vmatprep.subr.bf16.mxu1 %v7460_v56 }
 0x225   : > { %2122 = vmatprep.subr.bf16.mxu0 %v7456_v51 }
 0x227   : > { %2164 = vmatpush1.bf16.msra.mxu1 %v7470_v53 }
 0x228   : > { %2123 = vmatpush1.bf16.msra.mxu0 %v7466_v47  ;;  %2165 = vmatprep.subr.bf16.mxu1 %v7480_v45 }
 0x229   : > { %2124 = vmatprep.subr.bf16.mxu0 %v7476_v33 }
 0x22b   : > { %2166 = vmatpush1.bf16.msra.mxu1 %v7490_v32 }
 0x22c   : > { %2125 = vmatpush1.bf16.msra.mxu0 %v7486_v46  ;;  %2167 = vmatprep.subr.bf16.mxu1 %v7500_v4 }
 0x22d   : > { %2126 = vmatprep.subr.bf16.mxu0 %v7496_v1 }
 0x22f   : > { %2168 = vmatpush1.bf16.msra.mxu1 %v7510_v6 }
 0x230   : > { %2127 = vmatpush1.bf16.msra.mxu0 %v7506_v5  ;;  %2295 = vmatprep.subr.bf16.mxu1 %v7520_v12 }
 0x231   : > { %2254 = vmatprep.subr.bf16.mxu0 %v7516_v9  ;;  %v1501_v9 = vld [vmem:[%s7721_s20] sm:$0xff] }
 0x2c5   : > { %v1737_v43 = vpop.f32.mrb[0].mxu1 }
 0x2c6   : > { %v1696_v60 = vpop.f32.mrb[0].mxu0  ;;  %v1739_v17 = vpop.f32.mrb[1].mxu1 }
 0x2c7   : > { %v1698_v42 = vpop.f32.mrb[1].mxu0  ;;  %v1749_v38 = vcombine.low %v1737_v43, %v1739_v17  ;;  %v1741_v57 = vpop.f32.mrb[2].mxu1 }
 0x2c8   : > { %v1748_v20 = vcombine.low %v1696_v60, %v1698_v42  ;;  %v1700_v40 = vpop.f32.mrb[2].mxu0  ;;  %v1742_v1 = vpop.f32.mrb[3].mxu1 }
 0x2c9   : > { %v1701_v62 = vpop.f32.mrb[3].mxu0  ;;  %v1763_v5 = vrot.slane %v1749_v38, %v7216_v58 }
 0x2ca   : > { %v1756_v4 = vrot.slane %v1748_v20, %v7216_v58 }
 0x2cc   : > { %v1764_v12 = vcombine.low %v1756_v4, %v1763_v5 }
 0x2ce   : > { %v1766_v6 = vadd.f32 %v1764_v12, %v1501_v9 }
 0x2d0   : > { %v5517_v32 = vmul.f32 -1.442695, %v1766_v6  ;;  %v1774_v46 = vrot.slane %v1766_v6, 2  ;;  %v1785_v57 = vrot.slane %v1766_v6, 6  ;;  %v1782_v62 = vrot.slane %v1766_v6, 4 }
 0x2d2   : > { %6327 = vpow2.f32 %v5517_v32  ;;  %v5518_v17 = vmul.f32 -1.442695, %v1774_v46  ;;  %v5519_v40 = vmul.f32 -1.442695, %v1785_v57 }
 0x2d4   : > { %6329 = vpow2.f32 %v5518_v17 }
 0x2d5   : > { %6331 = vpow2.f32 %v5519_v40 }
 0x2dc   : > { %v6328_v1 = vpop.eup %6327 }
 0x2dd   : > { %v1770_v20 = vadd.f32 1.0, %v6328_v1 }
 0x2de   : > { %v6330_v60 = vpop.eup %6329 }
 0x2df   : > { %6333 = vrcp.f32 %v1770_v20  ;;  %v1779_v38 = vadd.f32 1.0, %v6330_v60  ;;  %v6332_v46 = vpop.eup %6331 }
 0x2e0   : > { %6335 = vtanh.f32 %v1782_v62  ;;  %v1790_v45 = vadd.f32 1.0, %v6332_v46 }
 0x2e1   : > { %6337 = vrcp.f32 %v1779_v38  ;;  %v5523_v38 = vld [vmem:[%s7729_s13 + $0x18] sm:$0xff] }
 0x2e2   : > { %6339 = vrcp.f32 %v1790_v45 }
 0x2e5   : > { %v2041_v5 = vpop.f32.mrb[4].mxu1 }
 0x2e6   : > { %v2000_v4 = vpop.f32.mrb[4].mxu0  ;;  %v2043_v12 = vpop.f32.mrb[5].mxu1 }
 0x2e7   : > { %v2002_v9 = vpop.f32.mrb[5].mxu0  ;;  %v2053_v43 = vcombine.low %v2041_v5, %v2043_v12  ;;  %v2045_v17 = vpop.f32.mrb[6].mxu1 }
 0x2e8   : > { %v2052_v32 = vcombine.low %v2000_v4, %v2002_v9  ;;  %v2004_v42 = vpop.f32.mrb[6].mxu0  ;;  %v2046_v1 = vpop.f32.mrb[7].mxu1 }
 0x2e9   : > { %v6334_v6 = vpop.eup %6333  ;;  %v2005_v57 = vpop.f32.mrb[7].mxu0  ;;  %v2067_v62 = vrot.slane %v2053_v43, %v7216_v58 }
 0x2ea   : > { %v6336_v40 = vpop.eup %6335  ;;  %v2060_v20 = vrot.slane %v2052_v32, %v7216_v58 }
 0x2eb   : > { %v6338_v60 = vpop.eup %6337  ;;  %v1794_v5 = vmul.f32 %v6336_v40, %v6334_v6 }
 0x2ec   : > { %v2068_v33 = vcombine.low %v2060_v20, %v2067_v62  ;;  %v1793_v4 = vmul.f32 %v6851_v63, %v6338_v60  ;;  %v6340_v57 = vpop.eup %6339 }
 0x2ee   : > { %v2070_v9 = vadd.f32 %v5523_v38, %v2068_v33  ;;  %v7733_v12 = vadd.f32 %v1794_v5, %v1793_v4  ;;  %v9187_v4 = vld [vmem:[#allocation113_spill] sm:$0xff] }
 0x2f0   : > { %v5556_v42 = vmul.f32 -1.442695, %v2070_v9  ;;  %v2078_v17 = vrot.slane %v2070_v9, 2  ;;  %6341 = vtanh.f32 %v7733_v12  ;;  %v2089_v43 = vrot.slane %v2070_v9, 6 }
 0x2f1   : > { %v2086_v62 = vrot.slane %v2070_v9, 4  ;;  %v9188_v9 = vld [vmem:[#allocation114_spill] sm:$0xff] }
 0x2f2   : > { %6343 = vpow2.f32 %v5556_v42  ;;  %v5557_v32 = vmul.f32 -1.442695, %v2078_v17  ;;  %v5558_v1 = vmul.f32 -1.442695, %v2089_v43  ;;  %v9189_v42 = vld [vmem:[#allocation115_spill] sm:$0xff]  ;;  %v9190_v43 = vld [vmem:[#allocation86_spill] sm:$0xff] }
 0x2f4   : > { %6345 = vpow2.f32 %v5557_v32 }
 0x2f5   : > { %6347 = vpow2.f32 %v5558_v1 }
 0x2fa   : > { %v6342_v46 = vpop.eup %6341 }
 0x2fb   : > { %v1797_v63 = vmul.f32 %v6342_v46, %v6340_v57  ;;  %v9191_v46 = vld [vmem:[#allocation116_spill] sm:$0xff] }
 0x2fc   : > { %v6344_v20 = vpop.eup %6343 }
 0x2fd   : > { %v2074_v6 = vadd.f32 1.0, %v6344_v20  ;;  %v1798_v40 = vpack.c.bf16 %v1797_v63, %v1797_v63  ;;  %v9192_v20 = vld [vmem:[#allocation117_spill] sm:$0xff]  ;;  %v9194_v63 = vld [vmem:[#allocation119_spill] sm:$0xff] }
 0x2fe   : > { %v6346_v33 = vpop.eup %6345 }
 0x2ff   : > { %6349 = vrcp.f32 %v2074_v6  ;;  %v2083_v45 = vadd.f32 1.0, %v6346_v33  ;;  %1801 = vst [vmem:[%s7737_s27] sm:$0x1] %v1798_v40  ;;  %2145 = vmatmul.mubr.bf16.vlgmr.msra.gmra.mrb[8].mxu0 %v1798_v40  ;;  %2186 = vmatmul.mubr.bf16.vlgmr.msra.gmra.mrb[8].mxu1 %v1798_v40  ;;  %v6348_v60 = vpop.eup %6347  ;;  %v9195_v33 = vld [vmem:[#allocation120_spill] sm:$0xff]  ;;  %v9196_v40 = vld [vmem:[#allocation121_spill] sm:$0xff] }
 0x300   : > { %6351 = vtanh.f32 %v2086_v62  ;;  %2255 = vmatpush1.bf16.msra.mxu0 %v7526_v2  ;;  %2296 = vmatpush1.bf16.msra.mxu1 %v7530_v3  ;;  %v2094_v32 = vadd.f32 1.0, %v6348_v60  ;;  %v9193_v62 = vld [vmem:[#allocation118_spill] sm:$0xff]  ;;  %v9198_v60 = vld [vmem:[#allocation123_spill] sm:$0xff] }
 0x301   : > { %6353 = vrcp.f32 %v2083_v45  ;;  %2256 = vmatprep.subr.bf16.mxu0 %v7536_v15  ;;  %2297 = vmatprep.subr.bf16.mxu1 %v7540_v18  ;;  %v9197_v45 = vld [vmem:[#allocation122_spill] sm:$0xff] }
 0x302   : > { %2286 = vmatprep.mubr.bf16.mxu0 %v9148_v25  ;;  %2327 = vmatprep.mubr.bf16.mxu1 %v9148_v25  ;;  %6355 = vrcp.f32 %v2094_v32 }
 0x304   : > { %2257 = vmatpush1.bf16.msra.mxu0 %v7548_v7  ;;  %2298 = vmatpush1.bf16.msra.mxu1 %v7552_v8 }
 0x305   : > { %2258 = vmatprep.subr.bf16.mxu0 %v7558_v19  ;;  %2299 = vmatprep.subr.bf16.mxu1 %v7562_v23 }
 0x308   : > { %2259 = vmatpush1.bf16.msra.mxu0 %v7570_v13  ;;  %2300 = vmatpush1.bf16.msra.mxu1 %v9187_v4 }
 0x309   : > { %v6350_v38 = vpop.eup %6349  ;;  %2260 = vmatprep.subr.bf16.mxu0 %v9188_v9  ;;  %2301 = vmatprep.subr.bf16.mxu1 %v9189_v42 }
 0x30a   : > { %v6352_v5 = vpop.eup %6351 }
 0x30b   : > { %v6354_v17 = vpop.eup %6353  ;;  %v2098_v1 = vmul.f32 %v6352_v5, %v6350_v38  ;;  %v9199_v38 = vld [vmem:[#allocation124_spill] sm:$0xff] }
 0x30c   : > { %v2097_v57 = vmul.f32 %v9190_v43, %v6354_v17  ;;  %2261 = vmatpush1.bf16.msra.mxu0 %v9191_v46  ;;  %2302 = vmatpush1.bf16.msra.mxu1 %v9192_v20  ;;  %v6356_v5 = vpop.eup %6355 }
 0x30d   : > { %2262 = vmatprep.subr.bf16.mxu0 %v9193_v62  ;;  %2303 = vmatprep.subr.bf16.mxu1 %v9194_v63 }
 0x30e   : > { %v7759_v6 = vadd.f32 %v2098_v1, %v2097_v57  ;;  %v9200_v57 = vld [vmem:[#allocation103_spill] sm:$0xff]  ;;  %v9201_v1 = vld [vmem:[#allocation104_spill] sm:$0xff] }
 0x310   : > { %6357 = vtanh.f32 %v7759_v6  ;;  %2263 = vmatpush1.bf16.msra.mxu0 %v9195_v33  ;;  %2304 = vmatpush1.bf16.msra.mxu1 %v9196_v40 }
 0x311   : > { %2264 = vmatprep.subr.bf16.mxu0 %v9197_v45  ;;  %2305 = vmatprep.subr.bf16.mxu1 %v9198_v60 }
 0x314   : > { %2265 = vmatpush1.bf16.msra.mxu0 %v9199_v38  ;;  %2306 = vmatpush1.bf16.msra.mxu1 %v7634_v21 }
 0x315   : > { %2266 = vmatprep.subr.bf16.mxu0 %v7640_v44  ;;  %2307 = vmatprep.subr.bf16.mxu1 %v7644_v11 }
 0x318   : > { %2267 = vmatpush1.bf16.msra.mxu0 %v7650_v10  ;;  %2308 = vmatpush1.bf16.msra.mxu1 %v7654_v35 }
 0x319   : > { %2268 = vmatprep.subr.bf16.mxu0 %v7660_v29  ;;  %2309 = vmatprep.subr.bf16.mxu1 %v7664_v14 }
 0x31a   : > { %v6358_v17 = vpop.eup %6357 }
 0x31b   : > { %v2101_v32 = vmul.f32 %v6358_v17, %v6356_v5  ;;  %v9202_v5 = vld [vmem:[#allocation105_spill] sm:$0xff]  ;;  %v9203_v17 = vld [vmem:[#allocation106_spill] sm:$0xff] }
 0x31c   : > { %2269 = vmatpush1.bf16.msra.mxu0 %v7670_v16  ;;  %2310 = vmatpush1.bf16.msra.mxu1 %v7674_v55 }
 0x31d   : > { %v2102_v43 = vpack.c.bf16 %v2101_v32, %v2101_v32  ;;  %2398 = vmatprep.subr.bf16.mxu0 %v7356_v24  ;;  %2439 = vmatprep.subr.bf16.mxu1 %v7360_v27  ;;  %v9204_v32 = vld [vmem:[#allocation107_spill] sm:$0xff] }
 0x31f   : > { %2105 = vst [vmem:[%s7780_s30 + $0x7] sm:$0x1] %v2102_v43  ;;  %2287 = vmatmul.mubr.bf16.vlgmr.msra.gmra.mrb[12].mxu0 %v2102_v43  ;;  %2328 = vmatmul.mubr.bf16.vlgmr.msra.gmra.mrb[12].mxu1 %v2102_v43  ;;  %v9205_v43 = vld [vmem:[#allocation108_spill] sm:$0xff] }
 0x320   : > { %2399 = vmatpush1.bf16.msra.mxu0 %v7364_v34  ;;  %2440 = vmatpush1.bf16.msra.mxu1 %v7368_v36 }
 0x321   : > { %2400 = vmatprep.subr.bf16.mxu0 %v7372_v37  ;;  %2441 = vmatprep.subr.bf16.mxu1 %v7376_v28 }
 0x322   : > { %2430 = vmatprep.mubr.bf16.mxu0 %v9148_v25  ;;  %2471 = vmatprep.mubr.bf16.mxu1 %v9148_v25 }
 0x324   : > { %2401 = vmatpush1.bf16.msra.mxu0 %v7384_v0  ;;  %2442 = vmatpush1.bf16.msra.mxu1 %v7388_v26 }
 0x325   : > { %2402 = vmatprep.subr.bf16.mxu0 %v7394_v48  ;;  %2443 = vmatprep.subr.bf16.mxu1 %v7398_v54 }
 0x328   : > { %2403 = vmatpush1.bf16.msra.mxu0 %v7406_v31  ;;  %2444 = vmatpush1.bf16.msra.mxu1 %v7410_v50 }
 0x329   : > { %2404 = vmatprep.subr.bf16.mxu0 %v7416_v22  ;;  %2445 = vmatprep.subr.bf16.mxu1 %v7420_v49 }
 0x32c   : > { %2405 = vmatpush1.bf16.msra.mxu0 %v7426_v59  ;;  %2446 = vmatpush1.bf16.msra.mxu1 %v7430_v61  ;;  %v5562_v59 = vld [vmem:[%s7721_s20 + $0x8] sm:$0xff] }
 0x32d   : > { %2406 = vmatprep.subr.bf16.mxu0 %v7436_v52  ;;  %2447 = vmatprep.subr.bf16.mxu1 %v7440_v39 }
 0x330   : > { %2407 = vmatpush1.bf16.msra.mxu0 %v7446_v41  ;;  %2448 = vmatpush1.bf16.msra.mxu1 %v7450_v30  ;;  %v9206_v30 = vld [vmem:[#allocation109_spill] sm:$0xff] }
 0x331   : > { %2408 = vmatprep.subr.bf16.mxu0 %v7456_v51  ;;  %2449 = vmatprep.subr.bf16.mxu1 %v7460_v56  ;;  %v9207_v51 = vld [vmem:[#allocation110_spill] sm:$0xff] }
 0x334   : > { %2409 = vmatpush1.bf16.msra.mxu0 %v7466_v47  ;;  %2450 = vmatpush1.bf16.msra.mxu1 %v7470_v53  ;;  %v9208_v47 = vld [vmem:[#allocation111_spill] sm:$0xff]  ;;  %v9209_v53 = vld [vmem:[#allocation112_spill] sm:$0xff] }
 0x335   : > { %2410 = vmatprep.subr.bf16.mxu0 %v9200_v57  ;;  %2451 = vmatprep.subr.bf16.mxu1 %v9201_v1 }
 0x338   : > { %2411 = vmatpush1.bf16.msra.mxu0 %v9202_v5  ;;  %2452 = vmatpush1.bf16.msra.mxu1 %v9203_v17 }
 0x339   : > { %2412 = vmatprep.subr.bf16.mxu0 %v9204_v32  ;;  %2453 = vmatprep.subr.bf16.mxu1 %v9205_v43 }
 0x33c   : > { %2413 = vmatpush1.bf16.msra.mxu0 %v9206_v30  ;;  %2454 = vmatpush1.bf16.msra.mxu1 %v9207_v51 }
 0x33d   : > { %2540 = vmatprep.subr.bf16.mxu0 %v9208_v47  ;;  %2581 = vmatprep.subr.bf16.mxu1 %v9209_v53 }
 0x3d2   : > { %v2146_v57 = vpop.f32.mrb[8].mxu0  ;;  %v2187_v56 = vpop.f32.mrb[8].mxu1 }
 0x3d3   : > { %v2148_v1 = vpop.f32.mrb[9].mxu0  ;;  %v2189_v41 = vpop.f32.mrb[9].mxu1 }
 0x3d4   : > { %v2198_v5 = vcombine.low %v2146_v57, %v2148_v1  ;;  %v2199_v39 = vcombine.low %v2187_v56, %v2189_v41  ;;  %v2150_v17 = vpop.f32.mrb[10].mxu0  ;;  %v2191_v52 = vpop.f32.mrb[10].mxu1 }
 0x3d5   : > { %v2151_v32 = vpop.f32.mrb[11].mxu0  ;;  %v2192_v61 = vpop.f32.mrb[11].mxu1 }
 0x3d6   : > { %v2206_v43 = vrot.slane %v2198_v5, %v7216_v58  ;;  %v2213_v30 = vrot.slane %v2199_v39, %v7216_v58 }
 0x3d8   : > { %v2214_v51 = vcombine.low %v2206_v43, %v2213_v30 }
 0x3da   : > { %v2216_v49 = vadd.f32 %v5562_v59, %v2214_v51 }
 0x3dc   : > { %v5563_v47 = vmul.f32 -1.442695, %v2216_v49  ;;  %v2224_v22 = vrot.slane %v2216_v49, 2  ;;  %v2235_v50 = vrot.slane %v2216_v49, 6  ;;  %v2232_v41 = vrot.slane %v2216_v49, 4 }
 0x3de   : > { %6359 = vpow2.f32 %v5563_v47  ;;  %v5564_v53 = vmul.f32 -1.442695, %v2224_v22  ;;  %v5565_v31 = vmul.f32 -1.442695, %v2235_v50 }
 0x3e0   : > { %6361 = vpow2.f32 %v5564_v53 }
 0x3e1   : > { %6363 = vpow2.f32 %v5565_v31 }
 0x3e8   : > { %v6360_v57 = vpop.eup %6359 }
 0x3e9   : > { %v2220_v56 = vadd.f32 1.0, %v6360_v57 }
 0x3ea   : > { %v6362_v52 = vpop.eup %6361 }
 0x3eb   : > { %6365 = vrcp.f32 %v2220_v56  ;;  %v2229_v61 = vadd.f32 1.0, %v6362_v52  ;;  %v6364_v1 = vpop.eup %6363 }
 0x3ec   : > { %6367 = vtanh.f32 %v2232_v41  ;;  %v5568_v41 = vld [vmem:[%s7729_s13 + $0x10] sm:$0xff]  ;;  %v2240_v56 = vadd.f32 1.0, %v6364_v1 }
 0x3ed   : > { %6369 = vrcp.f32 %v2229_v61 }
 0x3ee   : > { %6371 = vrcp.f32 %v2240_v56 }
 0x3f2   : > { %v2288_v39 = vpop.f32.mrb[12].mxu0  ;;  %v2329_v30 = vpop.f32.mrb[12].mxu1 }
 0x3f3   : > { %v2290_v59 = vpop.f32.mrb[13].mxu0  ;;  %v2331_v51 = vpop.f32.mrb[13].mxu1 }
 0x3f4   : > { %v2340_v47 = vcombine.low %v2288_v39, %v2290_v59  ;;  %v2341_v22 = vcombine.low %v2329_v30, %v2331_v51  ;;  %v2292_v53 = vpop.f32.mrb[14].mxu0  ;;  %v2333_v5 = vpop.f32.mrb[14].mxu1 }
 0x3f5   : > { %v6366_v50 = vpop.eup %6365  ;;  %v2293_v17 = vpop.f32.mrb[15].mxu0 }
 0x3f6   : > { %v2334_v49 = vpop.f32.mrb[15].mxu1  ;;  %v6368_v32 = vpop.eup %6367  ;;  %v2348_v31 = vrot.slane %v2340_v47, %v7216_v58  ;;  %v2355_v43 = vrot.slane %v2341_v22, %v7216_v58 }
 0x3f7   : > { %v6370_v57 = vpop.eup %6369  ;;  %v2244_v54 = vmul.f32 %v6368_v32, %v6366_v50 }
 0x3f8   : > { %v2356_v52 = vcombine.low %v2348_v31, %v2355_v43  ;;  %v2243_v61 = vmul.f32 %v6370_v57, %v7733_v12  ;;  %v6372_v22 = vpop.eup %6371 }
 0x3fa   : > { %v2358_v48 = vadd.f32 %v5568_v41, %v2356_v52  ;;  %v7824_v39 = vadd.f32 %v2244_v54, %v2243_v61 }
 0x3fc   : > { %v5569_v30 = vmul.f32 -1.442695, %v2358_v48  ;;  %v2366_v59 = vrot.slane %v2358_v48, 2  ;;  %6373 = vtanh.f32 %v7824_v39  ;;  %v2377_v47 = vrot.slane %v2358_v48, 6 }
 0x3fd   : > { %v2374_v17 = vrot.slane %v2358_v48, 4 }
 0x3fe   : > { %6375 = vpow2.f32 %v5569_v30  ;;  %v5570_v51 = vmul.f32 -1.442695, %v2366_v59  ;;  %v5571_v53 = vmul.f32 -1.442695, %v2377_v47  ;;  %v9212_v47 = vld [vmem:[#allocation89_spill] sm:$0xff] }
 0x400   : > { %6377 = vpow2.f32 %v5570_v51 }
 0x401   : > { %6379 = vpow2.f32 %v5571_v53  ;;  %v9218_v53 = vld [vmem:[#allocation95_spill] sm:$0xff] }
 0x406   : > { %v6374_v1 = vpop.eup %6373 }
 0x407   : > { %v2247_v12 = vmul.f32 %v6374_v1, %v6372_v22  ;;  %v9217_v22 = vld [vmem:[#allocation94_spill] sm:$0xff] }
 0x408   : > { %v6376_v5 = vpop.eup %6375  ;;  %v9221_v1 = vld [vmem:[#allocation98_spill] sm:$0xff] }
 0x409   : > { %v2362_v50 = vadd.f32 1.0, %v6376_v5  ;;  %v2248_v54 = vpack.c.bf16 %v2247_v12, %v2247_v12  ;;  %v9222_v5 = vld [vmem:[#allocation99_spill] sm:$0xff]  ;;  %v9224_v12 = vld [vmem:[#allocation101_spill] sm:$0xff] }
 0x40a   : > { %v6378_v49 = vpop.eup %6377 }
 0x40b   : > { %6381 = vrcp.f32 %v2362_v50  ;;  %v2371_v32 = vadd.f32 1.0, %v6378_v49  ;;  %2249 = vst [vmem:[%s7737_s27 + $0x2] sm:$0x1] %v2248_v54  ;;  %2431 = vmatmul.mubr.bf16.vlgmr.msra.gmra.mrb[16].mxu0 %v2248_v54  ;;  %2472 = vmatmul.mubr.bf16.vlgmr.msra.gmra.mrb[16].mxu1 %v2248_v54  ;;  %v6380_v48 = vpop.eup %6379  ;;  %v9225_v50 = vld [vmem:[#allocation102_spill] sm:$0xff]  ;;  %v9226_v49 = vld [vmem:[#allocation103_spill] sm:$0xff]  ;;  %v9227_v54 = vld [vmem:[#allocation104_spill] sm:$0xff] }
 0x40c   : > { %6383 = vtanh.f32 %v2374_v17  ;;  %2541 = vmatpush1.bf16.msra.mxu0 %v7526_v2  ;;  %2582 = vmatpush1.bf16.msra.mxu1 %v7530_v3  ;;  %v2382_v41 = vadd.f32 1.0, %v6380_v48  ;;  %v9223_v17 = vld [vmem:[#allocation100_spill] sm:$0xff]  ;;  %v9229_v48 = vld [vmem:[#allocation106_spill] sm:$0xff] }
 0x40d   : > { %6385 = vrcp.f32 %v2371_v32  ;;  %2542 = vmatprep.subr.bf16.mxu0 %v7536_v15  ;;  %2583 = vmatprep.subr.bf16.mxu1 %v7540_v18  ;;  %v9228_v32 = vld [vmem:[#allocation105_spill] sm:$0xff] }
 0x40e   : > { %2572 = vmatprep.mubr.bf16.mxu0 %v9148_v25  ;;  %2613 = vmatprep.mubr.bf16.mxu1 %v9148_v25  ;;  %6387 = vrcp.f32 %v2382_v41  ;;  %v9233_v41 = vld [vmem:[#allocation110_spill] sm:$0xff] }
 0x410   : > { %2543 = vmatpush1.bf16.msra.mxu0 %v7548_v7  ;;  %2584 = vmatpush1.bf16.msra.mxu1 %v7552_v8 }
 0x411   : > { %2544 = vmatprep.subr.bf16.mxu0 %v7558_v19  ;;  %2585 = vmatprep.subr.bf16.mxu1 %v7562_v23 }
 0x414   : > { %2545 = vmatpush1.bf16.msra.mxu0 %v7570_v13  ;;  %2586 = vmatpush1.bf16.msra.mxu1 %v9187_v4 }
 0x415   : > { %v6382_v31 = vpop.eup %6381  ;;  %2546 = vmatprep.subr.bf16.mxu0 %v9188_v9  ;;  %2587 = vmatprep.subr.bf16.mxu1 %v9189_v42 }
 0x416   : > { %v6384_v43 = vpop.eup %6383 }
 0x417   : > { %v6386_v57 = vpop.eup %6385  ;;  %v2386_v52 = vmul.f32 %v6384_v43, %v6382_v31  ;;  %v9230_v31 = vld [vmem:[#allocation107_spill] sm:$0xff]  ;;  %v9231_v43 = vld [vmem:[#allocation108_spill] sm:$0xff] }
 0x418   : > { %v2385_v56 = vmul.f32 %v6386_v57, %v7759_v6  ;;  %2547 = vmatpush1.bf16.msra.mxu0 %v9191_v46  ;;  %2588 = vmatpush1.bf16.msra.mxu1 %v9192_v20  ;;  %v6388_v6 = vpop.eup %6387  ;;  %v9232_v57 = vld [vmem:[#allocation109_spill] sm:$0xff] }
 0x419   : > { %2548 = vmatprep.subr.bf16.mxu0 %v9193_v62  ;;  %2589 = vmatprep.subr.bf16.mxu1 %v9194_v63 }
 0x41a   : > { %v7847_v61 = vadd.f32 %v2386_v52, %v2385_v56  ;;  %v9234_v56 = vld [vmem:[#allocation111_spill] sm:$0xff]  ;;  %v9235_v52 = vld [vmem:[#allocation112_spill] sm:$0xff] }
 0x41c   : > { %6389 = vtanh.f32 %v7847_v61  ;;  %2549 = vmatpush1.bf16.msra.mxu0 %v9195_v33  ;;  %2590 = vmatpush1.bf16.msra.mxu1 %v9196_v40 }
 0x41d   : > { %2550 = vmatprep.subr.bf16.mxu0 %v9197_v45  ;;  %2591 = vmatprep.subr.bf16.mxu1 %v9198_v60 }
 0x420   : > { %2551 = vmatpush1.bf16.msra.mxu0 %v9199_v38  ;;  %2592 = vmatpush1.bf16.msra.mxu1 %v7634_v21 }
 0x421   : > { %2552 = vmatprep.subr.bf16.mxu0 %v7640_v44  ;;  %2593 = vmatprep.subr.bf16.mxu1 %v7644_v11 }
 0x424   : > { %2553 = vmatpush1.bf16.msra.mxu0 %v7650_v10  ;;  %2594 = vmatpush1.bf16.msra.mxu1 %v7654_v35 }
 0x425   : > { %2554 = vmatprep.subr.bf16.mxu0 %v7660_v29  ;;  %2595 = vmatprep.subr.bf16.mxu1 %v7664_v14 }
 0x426   : > { %v6390_v30 = vpop.eup %6389 }
 0x427   : > { %v2389_v59 = vmul.f32 %v6390_v30, %v6388_v6 }
 0x428   : > { %2555 = vmatpush1.bf16.msra.mxu0 %v7670_v16  ;;  %2596 = vmatpush1.bf16.msra.mxu1 %v7674_v55 }
 0x429   : > { %v2390_v51 = vpack.c.bf16 %v2389_v59, %v2389_v59  ;;  %2683 = vmatprep.subr.bf16.mxu0 %v7356_v24  ;;  %2724 = vmatprep.subr.bf16.mxu1 %v7360_v27  ;;  %v9210_v24 = vld [vmem:[#allocation87_spill] sm:$0xff]  ;;  %v9211_v27 = vld [vmem:[#allocation88_spill] sm:$0xff] }
 0x42b   : > { %2391 = vst [vmem:[%s7780_s30 + $0x5] sm:$0x1] %v2390_v51  ;;  %2573 = vmatmul.mubr.bf16.vlgmr.msra.gmra.mrb[20].mxu0 %v2390_v51  ;;  %2614 = vmatmul.mubr.bf16.vlgmr.msra.gmra.mrb[20].mxu1 %v2390_v51 }
 0x42c   : > { %2684 = vmatpush1.bf16.msra.mxu0 %v7364_v34  ;;  %2725 = vmatpush1.bf16.msra.mxu1 %v7368_v36  ;;  %v9213_v34 = vld [vmem:[#allocation90_spill] sm:$0xff]  ;;  %v9214_v36 = vld [vmem:[#allocation91_spill] sm:$0xff] }
 0x42d   : > { %2685 = vmatprep.subr.bf16.mxu0 %v7372_v37  ;;  %2726 = vmatprep.subr.bf16.mxu1 %v7376_v28  ;;  %v9215_v37 = vld [vmem:[#allocation92_spill] sm:$0xff]  ;;  %v9216_v28 = vld [vmem:[#allocation93_spill] sm:$0xff] }
 0x42e   : > { %2715 = vmatprep.mubr.bf16.mxu0 %v9148_v25  ;;  %2756 = vmatprep.mubr.bf16.mxu1 %v9148_v25 }
 0x430   : > { %2686 = vmatpush1.bf16.msra.mxu0 %v7384_v0  ;;  %2727 = vmatpush1.bf16.msra.mxu1 %v7388_v26  ;;  %v9219_v0 = vld [vmem:[#allocation96_spill] sm:$0xff]  ;;  %v9220_v26 = vld [vmem:[#allocation97_spill] sm:$0xff] }
 0x431   : > { %2687 = vmatprep.subr.bf16.mxu0 %v9210_v24  ;;  %2728 = vmatprep.subr.bf16.mxu1 %v9211_v27 }
 0x434   : > { %2688 = vmatpush1.bf16.msra.mxu0 %v9212_v47  ;;  %2729 = vmatpush1.bf16.msra.mxu1 %v9213_v34 }
 0x435   : > { %2689 = vmatprep.subr.bf16.mxu0 %v9214_v36  ;;  %2730 = vmatprep.subr.bf16.mxu1 %v9215_v37 }
 0x438   : > { %2690 = vmatpush1.bf16.msra.mxu0 %v9216_v28  ;;  %2731 = vmatpush1.bf16.msra.mxu1 %v9217_v22 }
 0x439   : > { %2691 = vmatprep.subr.bf16.mxu0 %v9218_v53  ;;  %2732 = vmatprep.subr.bf16.mxu1 %v9219_v0  ;;  %v5574_v53 = vld [vmem:[%s7721_s20 + $0x10] sm:$0xff] }
 0x43c   : > { %2692 = vmatpush1.bf16.msra.mxu0 %v9220_v26  ;;  %2733 = vmatpush1.bf16.msra.mxu1 %v9221_v1 }
 0x43d   : > { %2693 = vmatprep.subr.bf16.mxu0 %v9222_v5  ;;  %2734 = vmatprep.subr.bf16.mxu1 %v9223_v17 }
 0x440   : > { %2694 = vmatpush1.bf16.msra.mxu0 %v9224_v12  ;;  %2735 = vmatpush1.bf16.msra.mxu1 %v9225_v50 }
 0x441   : > { %2695 = vmatprep.subr.bf16.mxu0 %v9226_v49  ;;  %2736 = vmatprep.subr.bf16.mxu1 %v9227_v54 }
 0x444   : > { %2696 = vmatpush1.bf16.msra.mxu0 %v9228_v32  ;;  %2737 = vmatpush1.bf16.msra.mxu1 %v9229_v48 }
 0x445   : > { %2697 = vmatprep.subr.bf16.mxu0 %v9230_v31  ;;  %2738 = vmatprep.subr.bf16.mxu1 %v9231_v43 }
 0x448   : > { %2698 = vmatpush1.bf16.msra.mxu0 %v9232_v57  ;;  %2739 = vmatpush1.bf16.msra.mxu1 %v9233_v41 }
 0x449   : > { %2825 = vmatprep.subr.bf16.mxu0 %v9234_v56  ;;  %2866 = vmatprep.subr.bf16.mxu1 %v9235_v52 }
 0x4de   : > { %v2432_v6 = vpop.f32.mrb[16].mxu0  ;;  %v2473_v30 = vpop.f32.mrb[16].mxu1 }
 0x4df   : > { %v2434_v59 = vpop.f32.mrb[17].mxu0  ;;  %v2475_v51 = vpop.f32.mrb[17].mxu1 }
 0x4e0   : > { %v2484_v24 = vcombine.low %v2432_v6, %v2434_v59  ;;  %v2485_v27 = vcombine.low %v2473_v30, %v2475_v51  ;;  %v2436_v47 = vpop.f32.mrb[18].mxu0  ;;  %v2477_v34 = vpop.f32.mrb[18].mxu1 }
 0x4e1   : > { %v2437_v36 = vpop.f32.mrb[19].mxu0  ;;  %v2478_v37 = vpop.f32.mrb[19].mxu1 }
 0x4e2   : > { %v2492_v28 = vrot.slane %v2484_v24, %v7216_v58  ;;  %v2499_v22 = vrot.slane %v2485_v27, %v7216_v58 }
 0x4e4   : > { %v2500_v0 = vcombine.low %v2492_v28, %v2499_v22  ;;  %v5580_v22 = vld [vmem:[%s7729_s13 + $0x8] sm:$0xff] }
 0x4e6   : > { %v2502_v26 = vadd.f32 %v5574_v53, %v2500_v0 }
 0x4e8   : > { %v5575_v1 = vmul.f32 -1.442695, %v2502_v26  ;;  %v2510_v5 = vrot.slane %v2502_v26, 2  ;;  %v2521_v12 = vrot.slane %v2502_v26, 6  ;;  %v2518_v54 = vrot.slane %v2502_v26, 4 }
 0x4ea   : > { %6391 = vpow2.f32 %v5575_v1  ;;  %v5576_v17 = vmul.f32 -1.442695, %v2510_v5  ;;  %v5577_v50 = vmul.f32 -1.442695, %v2521_v12 }
 0x4ec   : > { %6393 = vpow2.f32 %v5576_v17 }
 0x4ed   : > { %6395 = vpow2.f32 %v5577_v50 }
 0x4f4   : > { %v6392_v49 = vpop.eup %6391 }
 0x4f5   : > { %v2506_v32 = vadd.f32 1.0, %v6392_v49 }
 0x4f6   : > { %v6394_v48 = vpop.eup %6393 }
 0x4f7   : > { %6397 = vrcp.f32 %v2506_v32  ;;  %v2515_v31 = vadd.f32 1.0, %v6394_v48  ;;  %v6396_v52 = vpop.eup %6395 }
 0x4f8   : > { %6399 = vtanh.f32 %v2518_v54  ;;  %v2526_v53 = vadd.f32 1.0, %v6396_v52 }
 0x4f9   : > { %6401 = vrcp.f32 %v2515_v31 }
 0x4fa   : > { %6403 = vrcp.f32 %v2526_v53 }
 0x4fe   : > { %v2574_v43 = vpop.f32.mrb[20].mxu0  ;;  %v2615_v57 = vpop.f32.mrb[20].mxu1 }
 0x4ff   : > { %v2576_v41 = vpop.f32.mrb[21].mxu0  ;;  %v2617_v56 = vpop.f32.mrb[21].mxu1 }
 0x500   : > { %v2626_v6 = vcombine.low %v2574_v43, %v2576_v41  ;;  %v2627_v30 = vcombine.low %v2615_v57, %v2617_v56  ;;  %v2578_v59 = vpop.f32.mrb[22].mxu0  ;;  %v2619_v51 = vpop.f32.mrb[22].mxu1 }
 0x501   : > { %v6398_v24 = vpop.eup %6397  ;;  %v2579_v27 = vpop.f32.mrb[23].mxu0 }
 0x502   : > { %v2620_v47 = vpop.f32.mrb[23].mxu1  ;;  %v6400_v34 = vpop.eup %6399  ;;  %v2634_v36 = vrot.slane %v2626_v6, %v7216_v58  ;;  %v2641_v37 = vrot.slane %v2627_v30, %v7216_v58 }
 0x503   : > { %v6402_v28 = vpop.eup %6401  ;;  %v2530_v1 = vmul.f32 %v6400_v34, %v6398_v24 }
 0x504   : > { %v2642_v0 = vcombine.low %v2634_v36, %v2641_v37  ;;  %v2529_v26 = vmul.f32 %v6402_v28, %v7824_v39  ;;  %v6404_v32 = vpop.eup %6403 }
 0x506   : > { %v2644_v5 = vadd.f32 %v5580_v22, %v2642_v0  ;;  %v7908_v17 = vadd.f32 %v2530_v1, %v2529_v26 }
 0x508   : > { %v5581_v12 = vmul.f32 -1.442695, %v2644_v5  ;;  %v2652_v50 = vrot.slane %v2644_v5, 2  ;;  %6405 = vtanh.f32 %v7908_v17  ;;  %v2663_v54 = vrot.slane %v2644_v5, 6 }
 0x509   : > { %v2660_v57 = vrot.slane %v2644_v5, 4 }
 0x50a   : > { %6407 = vpow2.f32 %v5581_v12  ;;  %v5582_v49 = vmul.f32 -1.442695, %v2652_v50  ;;  %v5583_v48 = vmul.f32 -1.442695, %v2663_v54 }
 0x50c   : > { %6409 = vpow2.f32 %v5582_v49 }
 0x50d   : > { %6411 = vpow2.f32 %v5583_v48 }
 0x512   : > { %v6406_v31 = vpop.eup %6405 }
 0x513   : > { %v2533_v39 = vmul.f32 %v6406_v31, %v6404_v32  ;;  %v2824_v31 = vld [vmem:[%s7729_s13] sm:$0xff] }
 0x514   : > { %v6408_v43 = vpop.eup %6407 }
 0x515   : > { %v2648_v41 = vadd.f32 1.0, %v6408_v43  ;;  %v2534_v52 = vpack.c.bf16 %v2533_v39, %v2533_v39 }
 0x516   : > { %v6410_v56 = vpop.eup %6409 }
 0x517   : > { %6413 = vrcp.f32 %v2648_v41  ;;  %v2657_v6 = vadd.f32 1.0, %v6410_v56  ;;  %2535 = vst [vmem:[%s7737_s27 + $0x4] sm:$0x1] %v2534_v52  ;;  %2716 = vmatmul.mubr.bf16.vlgmr.msra.gmra.mrb[24].mxu0 %v2534_v52  ;;  %2757 = vmatmul.mubr.bf16.vlgmr.msra.gmra.mrb[24].mxu1 %v2534_v52  ;;  %v6412_v30 = vpop.eup %6411 }
 0x518   : > { %6415 = vtanh.f32 %v2660_v57  ;;  %2826 = vmatpush1.bf16.msra.mxu0 %v7526_v2  ;;  %2867 = vmatpush1.bf16.msra.mxu1 %v7530_v3 }
 0x519   : > { %6417 = vrcp.f32 %v2657_v6  ;;  %2827 = vmatprep.subr.bf16.mxu0 %v7536_v15  ;;  %2868 = vmatprep.subr.bf16.mxu1 %v7540_v18  ;;  %v2668_v18 = vadd.f32 1.0, %v6412_v30 }
 0x51a   : > { %2857 = vmatprep.mubr.bf16.mxu0 %v9148_v25  ;;  %2898 = vmatprep.mubr.bf16.mxu1 %v9148_v25 }
 0x51b   : > { %6419 = vrcp.f32 %v2668_v18 }
 0x51c   : > { %2828 = vmatpush1.bf16.msra.mxu0 %v7548_v7  ;;  %2869 = vmatpush1.bf16.msra.mxu1 %v7552_v8 }
 0x51d   : > { %2829 = vmatprep.subr.bf16.mxu0 %v7558_v19  ;;  %2870 = vmatprep.subr.bf16.mxu1 %v7562_v23 }
 0x520   : > { %2830 = vmatpush1.bf16.msra.mxu0 %v7570_v13  ;;  %2871 = vmatpush1.bf16.msra.mxu1 %v9187_v4 }
 0x521   : > { %v6414_v2 = vpop.eup %6413  ;;  %2831 = vmatprep.subr.bf16.mxu0 %v9188_v9  ;;  %2872 = vmatprep.subr.bf16.mxu1 %v9189_v42 }
 0x522   : > { %v6416_v3 = vpop.eup %6415 }
 0x523   : > { %v6418_v15 = vpop.eup %6417  ;;  %v2672_v8 = vmul.f32 %v6416_v3, %v6414_v2 }
 0x524   : > { %v2671_v7 = vmul.f32 %v6418_v15, %v7847_v61  ;;  %2832 = vmatpush1.bf16.msra.mxu0 %v9191_v46  ;;  %2873 = vmatpush1.bf16.msra.mxu1 %v9192_v20 }
 0x525   : > { %2833 = vmatprep.subr.bf16.mxu0 %v9193_v62  ;;  %2874 = vmatprep.subr.bf16.mxu1 %v9194_v63  ;;  %v6420_v19 = vpop.eup %6419 }
 0x526   : > { %v7931_v13 = vadd.f32 %v2672_v8, %v2671_v7 }
 0x528   : > { %6421 = vtanh.f32 %v7931_v13  ;;  %2834 = vmatpush1.bf16.msra.mxu0 %v9195_v33  ;;  %2875 = vmatpush1.bf16.msra.mxu1 %v9196_v40 }
 0x529   : > { %2835 = vmatprep.subr.bf16.mxu0 %v9197_v45  ;;  %2876 = vmatprep.subr.bf16.mxu1 %v9198_v60 }
 0x52c   : > { %2836 = vmatpush1.bf16.msra.mxu0 %v9199_v38  ;;  %2877 = vmatpush1.bf16.msra.mxu1 %v7634_v21 }
 0x52d   : > { %2837 = vmatprep.subr.bf16.mxu0 %v7640_v44  ;;  %2878 = vmatprep.subr.bf16.mxu1 %v7644_v11 }
 0x530   : > { %2838 = vmatpush1.bf16.msra.mxu0 %v7650_v10  ;;  %2879 = vmatpush1.bf16.msra.mxu1 %v7654_v35 }
 0x531   : > { %2839 = vmatprep.subr.bf16.mxu0 %v7660_v29  ;;  %2880 = vmatprep.subr.bf16.mxu1 %v7664_v14 }
 0x532   : > { %v6422_v23 = vpop.eup %6421 }
 0x533   : > { %v2675_v25 = vmul.f32 %v6422_v23, %v6420_v19 }
 0x534   : > { %2840 = vmatpush1.bf16.msra.mxu0 %v7670_v16  ;;  %2881 = vmatpush1.bf16.msra.mxu1 %v7674_v55  ;;  %v5586_v55 = vld [vmem:[%s7721_s20 + $0x18] sm:$0xff] }
 0x535   : > { %v2676_v21 = vpack.c.bf16 %v2675_v25, %v2675_v25 }
 0x537   : > { %2677 = vst [vmem:[%s7780_s30 + $0x3] sm:$0x1] %v2676_v21  ;;  %2858 = vmatmul.mubr.bf16.vlgmr.msra.gmra.mrb[28].mxu0 %v2676_v21  ;;  %2899 = vmatmul.mubr.bf16.vlgmr.msra.gmra.mrb[28].mxu1 %v2676_v21 }
 0x5ea   : > { %v2717_v11 = vpop.f32.mrb[24].mxu0  ;;  %v2758_v44 = vpop.f32.mrb[24].mxu1 }
 0x5eb   : > { %v2719_v10 = vpop.f32.mrb[25].mxu0  ;;  %v2760_v4 = vpop.f32.mrb[25].mxu1 }
 0x5ec   : > { %v2769_v35 = vcombine.low %v2717_v11, %v2719_v10  ;;  %v2770_v9 = vcombine.low %v2758_v44, %v2760_v4  ;;  %v2721_v42 = vpop.f32.mrb[26].mxu0  ;;  %v2762_v29 = vpop.f32.mrb[26].mxu1 }
 0x5ed   : > { %v2722_v46 = vpop.f32.mrb[27].mxu0  ;;  %v2763_v14 = vpop.f32.mrb[27].mxu1 }
 0x5ee   : > { %v2777_v20 = vrot.slane %v2769_v35, %v7216_v58  ;;  %v2784_v16 = vrot.slane %v2770_v9, %v7216_v58  ;;  %v6456_v14 = vld [vmem:[#allocation14 + $0xc0] sm:$0xff] (%p1486_p0)  }
 0x5ef   :  { %5762 = vmatprep.subr.bf16.mxu1 (%p1486_p0), %v6456_v14  ;;  %v8072_v14 = vld [vmem:[#allocation14 + $0x198] sm:$0xff] (%p1486_p0)  }
 0x5f0   : > { %v2785_v62 = vcombine.low %v2777_v20, %v2784_v16  ;;  %v6457_v20 = vld [vmem:[#allocation14] sm:$0xff] (%p1486_p0)  }
 0x5f1   :  { %v6458_v16 = vld [vmem:[#allocation14 + $0x80] sm:$0xff] (%p1486_p0)  }
 0x5f2   : > { %v2787_v63 = vadd.f32 %v5586_v55, %v2785_v62  ;;  %v6459_v55 = vld [vmem:[#allocation14 + $0x48] sm:$0xff] (%p1486_p0)   ;;  %5763 = vmatpush3.bf16.msra.mxu1 (%p1486_p0), %v6458_v16  ;;  %v8078_v16 = vld [vmem:[#allocation14 + $0x120] sm:$0xff] (%p1486_p0)  }
 0x5f3   :  { %v6460_v62 = vld [vmem:[#allocation14 + $0xc8] sm:$0xff] (%p1486_p0)  }
 0x5f4   : > { %v5587_v33 = vmul.f32 -1.442695, %v2787_v63  ;;  %v2795_v40 = vrot.slane %v2787_v63, 2  ;;  %v2806_v60 = vrot.slane %v2787_v63, 6  ;;  %v2803_v59 = vrot.slane %v2787_v63, 4  ;;  %5764 = vmatprep.subr.bf16.mxu1 (%p1486_p0), %v6460_v62  ;;  %v8084_v62 = vld [vmem:[#allocation14 + $0x1a0] sm:$0xff] (%p1486_p0)  }
 0x5f6   : > { %6423 = vpow2.f32 %v5587_v33  ;;  %v5588_v45 = vmul.f32 -1.442695, %v2795_v40  ;;  %v5589_v38 = vmul.f32 -1.442695, %v2806_v60  ;;  %v6461_v33 = vld [vmem:[#allocation14 + $0x8] sm:$0xff] (%p1486_p0)  }
 0x5f7   :  { %v6462_v40 = vld [vmem:[#allocation14 + $0x88] sm:$0xff] (%p1486_p0)  }
 0x5f8   : > { %6425 = vpow2.f32 %v5588_v45  ;;  %v6463_v45 = vld [vmem:[#allocation14 + $0x50] sm:$0xff] (%p1486_p0)   ;;  %5765 = vmatpush3.bf16.msra.mxu1 (%p1486_p0), %v6462_v40  ;;  %v8090_v40 = vld [vmem:[#allocation14 + $0x128] sm:$0xff] (%p1486_p0)  }
 0x5f9   : > { %6427 = vpow2.f32 %v5589_v38  ;;  %v6465_v38 = vld [vmem:[#allocation14 + $0x10] sm:$0xff] (%p1486_p0)  }
 0x600   : > { %v6424_v61 = vpop.eup %6423 }
 0x601   : > { %v2791_v51 = vadd.f32 1.0, %v6424_v61  ;;  %v6469_v61 = vld [vmem:[#allocation14 + $0x18] sm:$0xff] (%p1486_p0)  }
 0x602   : > { %v6426_v24 = vpop.eup %6425 }
 0x603   : > { %6429 = vrcp.f32 %v2791_v51  ;;  %v2800_v27 = vadd.f32 1.0, %v6426_v24  ;;  %v6428_v28 = vpop.eup %6427  ;;  %v6471_v51 = vld [vmem:[#allocation14 + $0x60] sm:$0xff] (%p1486_p0)  }
 0x604   : > { %6431 = vtanh.f32 %v2803_v59  ;;  %v2811_v48 = vadd.f32 1.0, %v6428_v28  ;;  %v6470_v59 = vld [vmem:[#allocation14 + $0x98] sm:$0xff] (%p1486_p0)   ;;  %v7970_v24 = vld [vmem:[#allocation14 + $0xe0] sm:$0xff] (%p1486_p0)   ;;  %v7987_v28 = vld [vmem:[#allocation14 + $0xa8] sm:$0xff] (%p1486_p0)  }
 0x605   : > { %6433 = vrcp.f32 %v2800_v27  ;;  %v7972_v27 = vld [vmem:[#allocation14 + $0x20] sm:$0xff] (%p1486_p0)  }
 0x606   : > { %6435 = vrcp.f32 %v2811_v48 }
 0x60a   : > { %v2859_v47 = vpop.f32.mrb[28].mxu0  ;;  %v2900_v34 = vpop.f32.mrb[28].mxu1 }
 0x60b   : > { %v2861_v36 = vpop.f32.mrb[29].mxu0  ;;  %v2902_v37 = vpop.f32.mrb[29].mxu1 }
 0x60c   : > { %v2911_v22 = vcombine.low %v2859_v47, %v2861_v36  ;;  %v2912_v53 = vcombine.low %v2900_v34, %v2902_v37  ;;  %v2863_v0 = vpop.f32.mrb[30].mxu0  ;;  %v2904_v26 = vpop.f32.mrb[30].mxu1  ;;  %v7975_v47 = vld [vmem:[#allocation14 + $0xa0] sm:$0xff] (%p1486_p0)   ;;  %v7978_v34 = vld [vmem:[#allocation14 + $0x68] sm:$0xff] (%p1486_p0)  }
 0x60d   : > { %v6430_v1 = vpop.eup %6429  ;;  %v2864_v5 = vpop.f32.mrb[31].mxu0  ;;  %v7981_v36 = vld [vmem:[#allocation14 + $0xe8] sm:$0xff] (%p1486_p0)   ;;  %v7996_v0 = vld [vmem:[#allocation14 + $0x30] sm:$0xff] (%p1486_p0)  }
 0x60e   : > { %v2905_v12 = vpop.f32.mrb[31].mxu1  ;;  %v6432_v50 = vpop.eup %6431  ;;  %v2919_v49 = vrot.slane %v2911_v22, %v7216_v58  ;;  %v2926_v54 = vrot.slane %v2912_v53, %v7216_v58  ;;  %v6466_v58 = vld [vmem:[#allocation14 + $0x90] sm:$0xff] (%p1486_p0)   ;;  %v7984_v37 = vld [vmem:[#allocation14 + $0x28] sm:$0xff] (%p1486_p0)   ;;  %v8005_v5 = vld [vmem:[#allocation14 + $0xf8] sm:$0xff] (%p1486_p0)  }
 0x60f   : > { %v6434_v32 = vpop.eup %6433  ;;  %v2815_v57 = vmul.f32 %v6432_v50, %v6430_v1  ;;  %v7990_v22 = vld [vmem:[#allocation14 + $0x70] sm:$0xff] (%p1486_p0)   ;;  %v8002_v1 = vld [vmem:[#allocation14 + $0x78] sm:$0xff] (%p1486_p0)  }
 0x610   : > { %v2814_v43 = vmul.f32 %v6434_v32, %v7908_v17  ;;  %v2927_v39 = vcombine.low %v2919_v49, %v2926_v54  ;;  %v6436_v2 = vpop.eup %6435  ;;  %v7993_v53 = vld [vmem:[#allocation14 + $0xf0] sm:$0xff] (%p1486_p0)   ;;  %v8008_v12 = vld [vmem:[#allocation14 + $0x38] sm:$0xff] (%p1486_p0)   ;;  %v8014_v54 = vld [vmem:[#allocation14 + $0x140] sm:$0xff] (%p1486_p0)   ;;  %v6877_v32 = vmov (%p1486_p0), 1966171168  }
 0x611   :  { %v7999_v26 = vld [vmem:[#allocation14 + $0xb0] sm:$0xff] (%p1486_p0)   ;;  %v8011_v50 = vld [vmem:[#allocation14 + $0xb8] sm:$0xff] (%p1486_p0)   ;;  %v3224_v48 = vunpack.c.l.s4 (%p1486_p0), %v6877_v32 }
 0x612   : > { %v2816_v63 = vadd.f32 %v2815_v57, %v2814_v43   ;;  %v2929_v41 = vadd.f32 %v2927_v39, %v2824_v31  ;;  %v8018_v31 = vld [vmem:[#allocation14 + $0x1c0] sm:$0xff] (%p1486_p0)   ;;  %v8122_v32 = vld [vmem:[#allocation14 + $0x1b8] sm:$0xff] (%p1486_p0)  }
 0x613   :  { %v3225_v57 = vunpack.c.0.s8 (%p1486_p0), %v3224_v48  ;;  %v9236_v39 = vld [vmem:[#allocation85_spill] sm:$0xff] (%p1486_p0)  ;;  %9237 = vst [vmem:[#allocation21_spill] sm:$0xff] (%p1486_p0), %v8122_v32 }
 0x614   : > { %6437 = vtanh.f32 %v2816_v63  ;;  %v5592_v56 = vmul.f32 -1.442695, %v2929_v41  ;;  %v2937_v52 = vrot.slane %v2929_v41, 2  ;;  %v2948_v30 = vrot.slane %v2929_v41, 6  ;;  %v6467_v63 = vld [vmem:[#allocation14 + $0x58] sm:$0xff] (%p1486_p0)   ;;  %v8125_v48 = vld [vmem:[#allocation16 + $0xc0] sm:$0xff] (%p1486_p0)  }
 0x615   : > { %v2945_v8 = vrot.slane %v2929_v41, 4  ;;  %v8022_v41 = vsub.s32 (%p1486_p0), %v3225_v57, %v9236_v39  ;;  %9238 = vst [vmem:[#allocation22_spill] sm:$0xff] (%p1486_p0), %v8125_v48  ;;  %v8131_v39 = vld [vmem:[#allocation16 + $0x48] sm:$0xff] (%p1486_p0)  }
 0x616   : > { %6439 = vpow2.f32 %v5592_v56  ;;  %v5593_v6 = vmul.f32 -1.442695, %v2937_v52  ;;  %v5594_v15 = vmul.f32 -1.442695, %v2948_v30  ;;  %9240 = vst [vmem:[#allocation24_spill] sm:$0xff] (%p1486_p0), %v8131_v39 }
 0x618   : > { %6441 = vpow2.f32 %v5593_v6 }
 0x619   : > { %6443 = vpow2.f32 %v5594_v15  ;;  %v8032_v15 = vld [vmem:[#allocation14 + $0x100] sm:$0xff] (%p1486_p0)  }
 0x61e   : > { %v6438_v3 = vpop.eup %6437 }
 0x61f   : > { %v2818_v18 = vmul.f32 %v6438_v3, %v6436_v2 }
 0x620   : > { %v6440_v7 = vpop.eup %6439 }
 0x621   : > { %v2819_v42 = vpack.c.bf16 %v2818_v18, %v2818_v18   ;;  %v2933_v17 = vadd.f32 1.0, %v6440_v7 }
 0x622   : > { %v6442_v19 = vpop.eup %6441 }
 0x623   : > { %2820 = vst [vmem:[%s7737_s27 + $0x6] sm:$0x1] %v2819_v42  ;;  %6445 = vrcp.f32 %v2933_v17  ;;  %v2942_v23 = vadd.f32 1.0, %v6442_v19  ;;  %v6444_v25 = vpop.eup %6443  ;;  %v6464_v42 = vld [vmem:[#allocation14 + $0xd0] sm:$0xff] (%p1486_p0)   ;;  %v8037_v19 = vld [vmem:[#allocation14 + $0x180] sm:$0xff] (%p1486_p0)  }
 0x624   : > { %6447 = vtanh.f32 %v2945_v8  ;;  %v2953_v10 = vadd.f32 1.0, %v6444_v25  ;;  %5766 = vmatprep.subr.bf16.mxu1 (%p1486_p0), %v6464_v42  ;;  %v8035_v8 = vld [vmem:[#allocation14 + $0x148] sm:$0xff] (%p1486_p0)  }
 0x625   : > { %6449 = vrcp.f32 %v2942_v23  ;;  %5767 = vmatpush3.bf16.msra.mxu1 (%p1486_p0), %v6466_v58  ;;  %v8039_v23 = vld [vmem:[#allocation14 + $0x1c8] sm:$0xff] (%p1486_p0)   ;;  %v8102_v58 = vld [vmem:[#allocation14 + $0x130] sm:$0xff] (%p1486_p0)  }
 0x626   : > { %6451 = vrcp.f32 %v2953_v10  ;;  %v8051_v10 = vld [vmem:[#allocation14 + $0x1d0] sm:$0xff] (%p1486_p0)   ;;  %v8096_v42 = vld [vmem:[#allocation14 + $0x1a8] sm:$0xff] (%p1486_p0)  }
 0x62d   : > { %v6446_v21 = vpop.eup %6445 }
 0x62e   : > { %v6448_v11 = vpop.eup %6447 }
 0x62f   : > { %v6450_v44 = vpop.eup %6449  ;;  %v2957_v35 = vmul.f32 %v6448_v11, %v6446_v21  ;;  %v8042_v21 = vld [vmem:[#allocation14 + $0x108] sm:$0xff] (%p1486_p0)   ;;  %v8045_v11 = vld [vmem:[#allocation14 + $0x150] sm:$0xff] (%p1486_p0)  }
 0x630   : > { %v2956_v4 = vmul.f32 %v6450_v44, %v7931_v13  ;;  %v6452_v9 = vpop.eup %6451  ;;  %v6455_v13 = vld [vmem:[#allocation14 + $0x40] sm:$0xff] (%p1486_p0)   ;;  %v8048_v44 = vld [vmem:[#allocation14 + $0x188] sm:$0xff] (%p1486_p0)  }
 0x631   :  { %5740 = vmatprep.subr.bf16.mxu0 (%p1486_p0), %v6455_v13  ;;  %v8069_v13 = vld [vmem:[#allocation14 + $0x160] sm:$0xff] (%p1486_p0)  }
 0x632   : > { %v2958_v60 = vadd.f32 %v2957_v35, %v2956_v4   ;;  %5741 = vmatpush3.bf16.msra.mxu0 (%p1486_p0), %v6457_v20  ;;  %v8054_v4 = vld [vmem:[#allocation14 + $0x110] sm:$0xff] (%p1486_p0)   ;;  %v8057_v35 = vld [vmem:[#allocation14 + $0x158] sm:$0xff] (%p1486_p0)   ;;  %v8075_v20 = vld [vmem:[#allocation14 + $0x1e0] sm:$0xff] (%p1486_p0)  }
 0x633   :  { %5742 = vmatprep.subr.bf16.mxu0 (%p1486_p0), %v6459_v55  ;;  %v8081_v55 = vld [vmem:[#allocation14 + $0x168] sm:$0xff] (%p1486_p0)  }
 0x634   : > { %6453 = vtanh.f32 %v2958_v60  ;;  %v6468_v60 = vld [vmem:[#allocation14 + $0xd8] sm:$0xff] (%p1486_p0)  }
 0x635   :  { %5768 = vmatprep.subr.bf16.mxu1 (%p1486_p0), %v6468_v60  ;;  %v8108_v60 = vld [vmem:[#allocation14 + $0x1b0] sm:$0xff] (%p1486_p0)  }
 0x636   :  { %5743 = vmatpush3.bf16.msra.mxu0 (%p1486_p0), %v6461_v33  ;;  %5769 = vmatpush3.bf16.msra.mxu1 (%p1486_p0), %v6470_v59  ;;  %v8087_v33 = vld [vmem:[#allocation14 + $0x1e8] sm:$0xff] (%p1486_p0)   ;;  %v8114_v59 = vld [vmem:[#allocation14 + $0x138] sm:$0xff] (%p1486_p0)  }
 0x637   :  { %5744 = vmatprep.subr.bf16.mxu0 (%p1486_p0), %v6463_v45  ;;  %5770 = vmatprep.subr.bf16.mxu1 (%p1486_p0), %v7970_v24  ;;  %v8093_v45 = vld [vmem:[#allocation14 + $0x170] sm:$0xff] (%p1486_p0)  }
 0x63a   :  { %5745 = vmatpush3.bf16.msra.mxu0 (%p1486_p0), %v6465_v38  ;;  %5771 = vmatpush3.bf16.msra.mxu1 (%p1486_p0), %v7975_v47  ;;  %v8099_v38 = vld [vmem:[#allocation14 + $0x1f0] sm:$0xff] (%p1486_p0)  }
 0x63b   :  { %5746 = vmatprep.subr.bf16.mxu0 (%p1486_p0), %v6467_v63  ;;  %5772 = vmatprep.subr.bf16.mxu1 (%p1486_p0), %v7981_v36  ;;  %v8105_v63 = vld [vmem:[#allocation14 + $0x178] sm:$0xff] (%p1486_p0)  }
 0x63d   :  { %1488 = sbr.rel (!%p1486_p0) target bundleno = 457 (0x1c9), region = 130 }
 0x63e   : > { %v6454_v29 = vpop.eup %6453  ;;  %5747 = vmatpush3.bf16.msra.mxu0 (%p1486_p0), %v6469_v61  ;;  %5773 = vmatpush3.bf16.msra.mxu1 (%p1486_p0), %v7987_v28  ;;  %v8111_v61 = vld [vmem:[#allocation14 + $0x1f8] sm:$0xff] (%p1486_p0)  }
 0x63f   : > { %v2960_v46 = vmul.f32 %v6454_v29, %v6452_v9  ;;  %5748 = vmatprep.subr.bf16.mxu0 (%p1486_p0), %v6471_v51  ;;  %5774 = vmatprep.subr.bf16.mxu1 (%p1486_p0), %v7993_v53  ;;  %v8060_v9 = vld [vmem:[#allocation14 + $0x190] sm:$0xff] (%p1486_p0)   ;;  %v8063_v29 = vld [vmem:[#allocation14 + $0x1d8] sm:$0xff] (%p1486_p0)  }
 0x641   : > { %v2961_v43 = vpack.c.bf16 %v2960_v46, %v2960_v46   ;;  %v8066_v46 = vld [vmem:[#allocation14 + $0x118] sm:$0xff] (%p1486_p0)  }
 0x642   :  { %5749 = vmatpush3.bf16.msra.mxu0 (%p1486_p0), %v7972_v27  ;;  %5775 = vmatpush3.bf16.msra.mxu1 (%p1486_p0), %v7999_v26 }
 0x643   : > { %2962 = vst [vmem:[%s7780_s30 + $0x1] sm:$0x1] %v2961_v43  ;;  %5750 = vmatprep.subr.bf16.mxu0 (%p1486_p0), %v7978_v34  ;;  %5776 = vmatprep.subr.bf16.mxu1 (%p1486_p0), %v8005_v5 }
 0x646   :  { %5751 = vmatpush3.bf16.msra.mxu0 %v7984_v37  ;;  %5777 = vmatpush3.bf16.msra.mxu1 %v8011_v50 }
 0x647   :  { %5752 = vmatprep.subr.bf16.mxu0 %v7990_v22  ;;  %5806 = vmatprep.subr.bf16.mxu1 %v8018_v31 }
 0x64a   :  { %5753 = vmatpush3.bf16.msra.mxu0 %v7996_v0  ;;  %v3220_v49 = vld [vmem:[#allocation5] sm:$0xff] }
 0x64b   :  { %5754 = vmatprep.subr.bf16.mxu0 %v8002_v1  ;;  %v3222_v43 = vcombine.high %v3220_v49, %v3220_v49  ;;  %v3229_v56 = vrot.slane %v3220_v49, %v8022_v41  ;;  %v8119_v49 = vld [vmem:[#allocation16 + $0x40] sm:$0xff]  }
 0x64d   :  { %v8026_v52 = vrot.slane %v3222_v43, %v8022_v41  ;;  %v3237_v6 = vcombine.high %v3229_v56, %v3229_v56  ;;  %v3245_v30 = vrot.slane %v3229_v56, %v8022_v41  ;;  %v8128_v43 = vld [vmem:[#allocation16] sm:$0xff]  }
 0x64e   :  { %5755 = vmatpush3.bf16.msra.mxu0 %v8008_v12  ;;  %9239 = vst [vmem:[#allocation23_spill] sm:$0xff] %v8128_v43  ;;  %v8134_v56 = vld [vmem:[#allocation16 + $0x80] sm:$0xff]  }
 0x64f   :  { %5784 = vmatprep.subr.bf16.mxu0 %v8014_v54  ;;  %v3238_v2 = vcombine.high %v8026_v52, %v8026_v52  ;;  %v3259_v3 = vrot.slane %v3237_v6, %v8022_v41  ;;  %v3267_v7 = vcombine.high %v3245_v30, %v3245_v30  ;;  %v3252_v51 = vrot.slane %v8026_v52, %v8022_v41  ;;  %v8137_v52 = vld [vmem:[#allocation16 + $0xc8] sm:$0xff]  }
 0x650   :  { %9241 = vst [vmem:[#allocation25_spill] sm:$0xff] %v8134_v56  ;;  %9242 = vst [vmem:[#allocation26_spill] sm:$0xff] %v8137_v52  ;;  %v8140_v6 = vld [vmem:[#allocation16 + $0x8] sm:$0xff]  }
 0x651   :  { %v3266_v18 = vrot.slane %v3238_v2, %v8022_v41  ;;  %3695 = vmatprep.mubr.bf16.mxu0 %v3259_v3  ;;  %v3269_v17 = vcombine.high %v3259_v3, %v3259_v3  ;;  %v3268_v57 = vcombine.high %v3252_v51, %v3252_v51  ;;  %9243 = vst [vmem:[#allocation27_spill] sm:$0xff] %v8140_v6  ;;  %v8146_v2 = vld [vmem:[#allocation16 + $0x88] sm:$0xff]   ;;  %v8149_v3 = vld [vmem:[#allocation16 + $0xd0] sm:$0xff]  }
 0x652   :  { %3696 = vmatmul.mubr.bf16.vlgmr.msra.gmra.mrb[0].mxu0 %v3245_v30  ;;  %v8143_v30 = vld [vmem:[#allocation16 + $0x50] sm:$0xff]   ;;  %9245 = vst [vmem:[#allocation29_spill] sm:$0xff] %v8146_v2  ;;  %9246 = vst [vmem:[#allocation30_spill] sm:$0xff] %v8149_v3 }
 0x653   :  { %v3270_v25 = vcombine.high %v3266_v18, %v3266_v18  ;;  %3735 = vmatprep.mubr.bf16.mxu1 %v3269_v17  ;;  %5785 = vmatpush3.bf16.msra.mxu0 %v8032_v15  ;;  %9244 = vst [vmem:[#allocation28_spill] sm:$0xff] %v8143_v30  ;;  %v8158_v17 = vld [vmem:[#allocation16 + $0x90] sm:$0xff]  }
 0x654   :  { %3736 = vmatmul.mubr.bf16.vlgmr.msra.gmra.mrb[0].mxu1 %v3267_v7  ;;  %5786 = vmatprep.subr.bf16.mxu0 %v8035_v8  ;;  %v8155_v7 = vld [vmem:[#allocation16 + $0x58] sm:$0xff]   ;;  %9249 = vst [vmem:[#allocation33_spill] sm:$0xff] %v8158_v17 }
 0x655   :  { %5807 = vmatpush3.bf16.msra.mxu1 %v8037_v19  ;;  %3775 = vmatprep.mubr.bf16.mxu0 %v3266_v18  ;;  %v8152_v18 = vld [vmem:[#allocation16 + $0x10] sm:$0xff]   ;;  %9248 = vst [vmem:[#allocation32_spill] sm:$0xff] %v8155_v7 }
 0x656   :  { %5808 = vmatprep.subr.bf16.mxu1 %v8039_v23  ;;  %3815 = vmatprep.mubr.bf16.mxu1 %v3270_v25  ;;  %9247 = vst [vmem:[#allocation31_spill] sm:$0xff] %v8152_v18  ;;  %v8161_v25 = vld [vmem:[#allocation16 + $0xd8] sm:$0xff]  }
 0x657   :  { %5787 = vmatpush3.bf16.msra.mxu0 %v8042_v21  ;;  %9250 = vst [vmem:[#allocation34_spill] sm:$0xff] %v8161_v25 }
 0x658   :  { %5788 = vmatprep.subr.bf16.mxu0 %v8045_v11 }
 0x659   :  { %5809 = vmatpush3.bf16.msra.mxu1 %v8048_v44 }
 0x65a   :  { %5810 = vmatprep.subr.bf16.mxu1 %v8051_v10 }
 0x65b   :  { %5789 = vmatpush3.bf16.msra.mxu0 %v8054_v4 }
 0x65c   :  { %5790 = vmatprep.subr.bf16.mxu0 %v8057_v35 }
 0x65d   :  { %5811 = vmatpush3.bf16.msra.mxu1 %v8060_v9 }
 0x65e   :  { %5812 = vmatprep.subr.bf16.mxu1 %v8063_v29 }
 0x65f   :  { %5791 = vmatpush3.bf16.msra.mxu0 %v8066_v46 }
 0x660   :  { %5792 = vmatprep.subr.bf16.mxu0 %v8069_v13 }
 0x661   :  { %5813 = vmatpush3.bf16.msra.mxu1 %v8072_v14 }
 0x662   :  { %5814 = vmatprep.subr.bf16.mxu1 %v8075_v20 }
 0x663   :  { %5793 = vmatpush3.bf16.msra.mxu0 %v8078_v16 }
 0x664   :  { %5794 = vmatprep.subr.bf16.mxu0 %v8081_v55 }
 0x665   :  { %5815 = vmatpush3.bf16.msra.mxu1 %v8084_v62 }
 0x666   :  { %5816 = vmatprep.subr.bf16.mxu1 %v8087_v33 }
 0x667   :  { %5795 = vmatpush3.bf16.msra.mxu0 %v8090_v40 }
 0x668   :  { %5796 = vmatprep.subr.bf16.mxu0 %v8093_v45 }
 0x669   :  { %5817 = vmatpush3.bf16.msra.mxu1 %v8096_v42 }
 0x66a   :  { %5818 = vmatprep.subr.bf16.mxu1 %v8099_v38 }
 0x66b   :  { %5797 = vmatpush3.bf16.msra.mxu0 %v8102_v58 }
 0x66c   :  { %5798 = vmatprep.subr.bf16.mxu0 %v8105_v63 }
 0x66d   :  { %5819 = vmatpush3.bf16.msra.mxu1 %v8108_v60 }
 0x66e   :  { %5820 = vmatprep.subr.bf16.mxu1 %v8111_v61 }
 0x66f   :  { %5799 = vmatpush3.bf16.msra.mxu0 %v8114_v59 }
 0x670   :  { %5828 = vmatprep.subr.bf16.mxu0 %v8119_v49 }
 0x671   :  { %5821 = vmatpush3.bf16.msra.mxu1 %v8122_v32  ;;  %v8284_v32 = vld [vmem:[#allocation16 + $0x158] sm:$0xff]  }
 0x672   :  { %3776 = vmatmul.mubr.bf16.vlgmr.msra.gmra.mrb[4].mxu0 %v3252_v51  ;;  %5850 = vmatprep.subr.bf16.mxu1 %v8125_v48  ;;  %v8164_v51 = vld [vmem:[#allocation16 + $0x18] sm:$0xff]   ;;  %v8266_v48 = vld [vmem:[#allocation16 + $0x108] sm:$0xff]   ;;  %9280 = vst [vmem:[#allocation64_spill] sm:$0xff] %v8284_v32 }
 0x673   :  { %5829 = vmatpush3.bf16.msra.mxu0 %v8128_v43  ;;  %9251 = vst [vmem:[#allocation35_spill] sm:$0xff] %v8164_v51  ;;  %v8242_v43 = vld [vmem:[#allocation16 + $0x1c0] sm:$0xff]   ;;  %9275 = vst [vmem:[#allocation59_spill] sm:$0xff] %v8266_v48 }
 0x674   :  { %3816 = vmatmul.mubr.bf16.vlgmr.msra.gmra.mrb[4].mxu1 %v3268_v57  ;;  %5830 = vmatprep.subr.bf16.mxu0 %v8131_v39  ;;  %v8167_v57 = vld [vmem:[#allocation16 + $0x60] sm:$0xff]   ;;  %v8210_v39 = vld [vmem:[#allocation16 + $0xb0] sm:$0xff]   ;;  %9270 = vst [vmem:[#allocation54_spill] sm:$0xff] %v8242_v43 }
 0x675   :  { %5851 = vmatpush3.bf16.msra.mxu1 %v8134_v56  ;;  %9252 = vst [vmem:[#allocation36_spill] sm:$0xff] %v8167_v57  ;;  %9265 = vst [vmem:[#allocation49_spill] sm:$0xff] %v8210_v39 }
 0x676   :  { %5852 = vmatprep.subr.bf16.mxu1 %v8137_v52 }
 0x677   :  { %5831 = vmatpush3.bf16.msra.mxu0 %v8140_v6  ;;  %v3831_v6 = vld [vmem:[#allocation5 + $0x8] sm:$0xff] }
 0x678   :  { %5832 = vmatprep.subr.bf16.mxu0 %v8143_v30  ;;  %v8170_v30 = vld [vmem:[#allocation16 + $0x98] sm:$0xff]   ;;  %v3833_v52 = vcombine.high %v3831_v6, %v3831_v6 }
 0x679   :  { %5853 = vmatpush3.bf16.msra.mxu1 %v8146_v2  ;;  %9253 = vst [vmem:[#allocation37_spill] sm:$0xff] %v8170_v30  ;;  %v8173_v2 = vld [vmem:[#allocation16 + $0xe0] sm:$0xff]  }
 0x67a   :  { %5854 = vmatprep.subr.bf16.mxu1 %v8149_v3  ;;  %9254 = vst [vmem:[#allocation38_spill] sm:$0xff] %v8173_v2  ;;  %v8176_v3 = vld [vmem:[#allocation16 + $0x20] sm:$0xff]  }
 0x67b   :  { %5833 = vmatpush3.bf16.msra.mxu0 %v8152_v18  ;;  %9255 = vst [vmem:[#allocation39_spill] sm:$0xff] %v8176_v3  ;;  %v8179_v18 = vld [vmem:[#allocation16 + $0x68] sm:$0xff]  }
 0x67c   :  { %5834 = vmatprep.subr.bf16.mxu0 %v8155_v7  ;;  %9256 = vst [vmem:[#allocation40_spill] sm:$0xff] %v8179_v18  ;;  %v8182_v7 = vld [vmem:[#allocation16 + $0xa0] sm:$0xff]  }
 0x67d   :  { %5855 = vmatpush3.bf16.msra.mxu1 %v8158_v17  ;;  %9257 = vst [vmem:[#allocation41_spill] sm:$0xff] %v8182_v7  ;;  %v8185_v17 = vld [vmem:[#allocation16 + $0xe8] sm:$0xff]  }
 0x67e   :  { %5856 = vmatprep.subr.bf16.mxu1 %v8161_v25  ;;  %9258 = vst [vmem:[#allocation42_spill] sm:$0xff] %v8185_v17  ;;  %v8188_v25 = vld [vmem:[#allocation16 + $0x28] sm:$0xff]  }
 0x67f   :  { %5835 = vmatpush3.bf16.msra.mxu0 %v8164_v51  ;;  %9259 = vst [vmem:[#allocation43_spill] sm:$0xff] %v8188_v25  ;;  %v8191_v51 = vld [vmem:[#allocation16 + $0x70] sm:$0xff]  }
 0x680   :  { %5836 = vmatprep.subr.bf16.mxu0 %v8167_v57  ;;  %9260 = vst [vmem:[#allocation44_spill] sm:$0xff] %v8191_v51  ;;  %v8194_v57 = vld [vmem:[#allocation16 + $0xa8] sm:$0xff]  }
 0x681   :  { %5857 = vmatpush3.bf16.msra.mxu1 %v8170_v30  ;;  %9261 = vst [vmem:[#allocation45_spill] sm:$0xff] %v8194_v57  ;;  %v3840_v30 = vrot.slane %v3831_v6, %v8022_v41 }
 0x682   :  { %5858 = vmatprep.subr.bf16.mxu1 %v8173_v2  ;;  %v8198_v2 = vld [vmem:[#allocation16 + $0xf0] sm:$0xff]  }
 0x683   :  { %5837 = vmatpush3.bf16.msra.mxu0 %v8176_v3  ;;  %9262 = vst [vmem:[#allocation46_spill] sm:$0xff] %v8198_v2  ;;  %v8201_v3 = vld [vmem:[#allocation16 + $0x30] sm:$0xff]   ;;  %v3848_v56 = vcombine.high %v3840_v30, %v3840_v30 }
 0x684   :  { %5838 = vmatprep.subr.bf16.mxu0 %v8179_v18  ;;  %9263 = vst [vmem:[#allocation47_spill] sm:$0xff] %v8201_v3  ;;  %v8204_v18 = vrot.slane %v3833_v52, %v8022_v41  ;;  %v8221_v52 = vld [vmem:[#allocation16 + $0x38] sm:$0xff]  }
 0x685   :  { %5859 = vmatpush3.bf16.msra.mxu1 %v8182_v7  ;;  %v8207_v7 = vld [vmem:[#allocation16 + $0x78] sm:$0xff]   ;;  %v8213_v6 = vrot.slane %v3848_v56, %v8022_v41  ;;  %9267 = vst [vmem:[#allocation51_spill] sm:$0xff] %v8221_v52  ;;  %v8230_v56 = vrot.slane %v3840_v30, %v8022_v41 }
 0x686   :  { %5860 = vmatprep.subr.bf16.mxu1 %v8185_v17  ;;  %9264 = vst [vmem:[#allocation48_spill] sm:$0xff] %v8207_v7  ;;  %v8218_v17 = vld [vmem:[#allocation16 + $0xf8] sm:$0xff]  }
 0x687   :  { %5839 = vmatpush3.bf16.msra.mxu0 %v8188_v25  ;;  %v3849_v25 = vcombine.high %v8204_v18, %v8204_v18  ;;  %9266 = vst [vmem:[#allocation50_spill] sm:$0xff] %v8218_v17  ;;  %4306 = vmatprep.mubr.bf16.mxu0 %v8213_v6  ;;  %v8249_v30 = vcombine.high %v8230_v56, %v8230_v56 }
 0x688   :  { %5840 = vmatprep.subr.bf16.mxu0 %v8191_v51  ;;  %v8232_v51 = vld [vmem:[#allocation16 + $0x140] sm:$0xff]  }
 0x689   :  { %5861 = vmatpush3.bf16.msra.mxu1 %v8194_v57  ;;  %v8226_v57 = vcombine.high %v8213_v6, %v8213_v6  ;;  %9268 = vst [vmem:[#allocation52_spill] sm:$0xff] %v8232_v51 }
 0x68a   :  { %5862 = vmatprep.subr.bf16.mxu1 %v8198_v2  ;;  %v8235_v2 = vld [vmem:[#allocation16 + $0xb8] sm:$0xff]  }
 0x68b   :  { %5841 = vmatpush3.bf16.msra.mxu0 %v8201_v3  ;;  %9269 = vst [vmem:[#allocation53_spill] sm:$0xff] %v8235_v2  ;;  %4346 = vmatprep.mubr.bf16.mxu1 %v8226_v57  ;;  %v8239_v3 = vrot.slane %v3849_v25, %v8022_v41  ;;  %v8255_v25 = vld [vmem:[#allocation16 + $0x180] sm:$0xff]  }
 0x68c   :  { %5842 = vmatprep.subr.bf16.mxu0 %v8207_v7  ;;  %v8245_v7 = vld [vmem:[#allocation16 + $0x100] sm:$0xff]   ;;  %9273 = vst [vmem:[#allocation57_spill] sm:$0xff] %v8255_v25 }
 0x68d   :  { %5863 = vmatpush3.bf16.msra.mxu1 %v8210_v39  ;;  %9271 = vst [vmem:[#allocation55_spill] sm:$0xff] %v8245_v7  ;;  %v8252_v39 = vld [vmem:[#allocation16 + $0x148] sm:$0xff]  }
 0x68e   :  { %5864 = vmatprep.subr.bf16.mxu1 %v8218_v17  ;;  %9272 = vst [vmem:[#allocation56_spill] sm:$0xff] %v8252_v39  ;;  %v8259_v17 = vcombine.high %v8239_v3, %v8239_v3 }
 0x68f   :  { %5843 = vmatpush3.bf16.msra.mxu0 %v8221_v52  ;;  %v8263_v52 = vld [vmem:[#allocation16 + $0x1c8] sm:$0xff]  }
 0x690   :  { %5872 = vmatprep.subr.bf16.mxu0 %v8232_v51  ;;  %9274 = vst [vmem:[#allocation58_spill] sm:$0xff] %v8263_v52  ;;  %v8274_v51 = vld [vmem:[#allocation16 + $0x188] sm:$0xff]  }
 0x691   :  { %5865 = vmatpush3.bf16.msra.mxu1 %v8235_v2  ;;  %v8271_v2 = vld [vmem:[#allocation16 + $0x150] sm:$0xff]   ;;  %9277 = vst [vmem:[#allocation61_spill] sm:$0xff] %v8274_v51 }
 0x692   :  { %4307 = vmatmul.mubr.bf16.vlgmr.msra.gmra.mrb[8].mxu0 %v8230_v56  ;;  %5894 = vmatprep.subr.bf16.mxu1 %v8242_v43  ;;  %9276 = vst [vmem:[#allocation60_spill] sm:$0xff] %v8271_v2  ;;  %v8278_v43 = vld [vmem:[#allocation16 + $0x1d0] sm:$0xff]  }
 0x693   :  { %5873 = vmatpush3.bf16.msra.mxu0 %v8245_v7  ;;  %4386 = vmatprep.mubr.bf16.mxu0 %v8239_v3  ;;  %9278 = vst [vmem:[#allocation62_spill] sm:$0xff] %v8278_v43  ;;  %v8281_v7 = vld [vmem:[#allocation16 + $0x110] sm:$0xff]  }
 0x694   :  { %4347 = vmatmul.mubr.bf16.vlgmr.msra.gmra.mrb[8].mxu1 %v8249_v30  ;;  %5874 = vmatprep.subr.bf16.mxu0 %v8252_v39  ;;  %9279 = vst [vmem:[#allocation63_spill] sm:$0xff] %v8281_v7  ;;  %v8287_v39 = vld [vmem:[#allocation16 + $0x190] sm:$0xff]  }
 0x695   :  { %5895 = vmatpush3.bf16.msra.mxu1 %v8255_v25  ;;  %4426 = vmatprep.mubr.bf16.mxu1 %v8259_v17  ;;  %9281 = vst [vmem:[#allocation65_spill] sm:$0xff] %v8287_v39  ;;  %v8290_v25 = vld [vmem:[#allocation16 + $0x1d8] sm:$0xff]  }
 0x696   :  { %5896 = vmatprep.subr.bf16.mxu1 %v8263_v52  ;;  %9282 = vst [vmem:[#allocation66_spill] sm:$0xff] %v8290_v25  ;;  %v8293_v52 = vld [vmem:[#allocation16 + $0x118] sm:$0xff]  }
 0x697   :  { %5875 = vmatpush3.bf16.msra.mxu0 %v8266_v48  ;;  %9283 = vst [vmem:[#allocation67_spill] sm:$0xff] %v8293_v52  ;;  %v8296_v48 = vld [vmem:[#allocation16 + $0x160] sm:$0xff]  }
 0x698   :  { %5876 = vmatprep.subr.bf16.mxu0 %v8271_v2  ;;  %9284 = vst [vmem:[#allocation68_spill] sm:$0xff] %v8296_v48  ;;  %v8299_v2 = vld [vmem:[#allocation16 + $0x198] sm:$0xff]  }
 0x699   :  { %5897 = vmatpush3.bf16.msra.mxu1 %v8274_v51  ;;  %9285 = vst [vmem:[#allocation69_spill] sm:$0xff] %v8299_v2  ;;  %v8302_v51 = vld [vmem:[#allocation16 + $0x1e0] sm:$0xff]  }
 0x69a   :  { %5898 = vmatprep.subr.bf16.mxu1 %v8278_v43  ;;  %9286 = vst [vmem:[#allocation70_spill] sm:$0xff] %v8302_v51  ;;  %v8305_v43 = vld [vmem:[#allocation16 + $0x120] sm:$0xff]  }
 0x69b   :  { %5877 = vmatpush3.bf16.msra.mxu0 %v8281_v7  ;;  %9287 = vst [vmem:[#allocation71_spill] sm:$0xff] %v8305_v43  ;;  %v8308_v7 = vld [vmem:[#allocation16 + $0x168] sm:$0xff]  }
 0x69c   :  { %5878 = vmatprep.subr.bf16.mxu0 %v8284_v32  ;;  %9288 = vst [vmem:[#allocation72_spill] sm:$0xff] %v8308_v7  ;;  %v8311_v32 = vld [vmem:[#allocation16 + $0x1a0] sm:$0xff]  }
 0x69d   :  { %5899 = vmatpush3.bf16.msra.mxu1 %v8287_v39  ;;  %9289 = vst [vmem:[#allocation73_spill] sm:$0xff] %v8311_v32  ;;  %v8314_v39 = vld [vmem:[#allocation16 + $0x1e8] sm:$0xff]  }
 0x69e   :  { %5900 = vmatprep.subr.bf16.mxu1 %v8290_v25  ;;  %9290 = vst [vmem:[#allocation74_spill] sm:$0xff] %v8314_v39  ;;  %v8317_v25 = vld [vmem:[#allocation16 + $0x128] sm:$0xff]  }
 0x69f   :  { %5879 = vmatpush3.bf16.msra.mxu0 %v8293_v52  ;;  %9291 = vst [vmem:[#allocation75_spill] sm:$0xff] %v8317_v25  ;;  %v8320_v52 = vld [vmem:[#allocation16 + $0x170] sm:$0xff]  }
 0x6a0   :  { %5880 = vmatprep.subr.bf16.mxu0 %v8296_v48  ;;  %9292 = vst [vmem:[#allocation76_spill] sm:$0xff] %v8320_v52  ;;  %v8323_v48 = vld [vmem:[#allocation16 + $0x1a8] sm:$0xff]  }
 0x6a1   :  { %5901 = vmatpush3.bf16.msra.mxu1 %v8299_v2  ;;  %v8326_v2 = vld [vmem:[#allocation16 + $0x1f0] sm:$0xff]  }
 0x6a2   :  { %5902 = vmatprep.subr.bf16.mxu1 %v8302_v51  ;;  %9293 = vst [vmem:[#allocation77_spill] sm:$0xff] %v8326_v2  ;;  %v8329_v51 = vld [vmem:[#allocation16 + $0x130] sm:$0xff]  }
 0x6a3   :  { %5881 = vmatpush3.bf16.msra.mxu0 %v8305_v43  ;;  %9294 = vst [vmem:[#allocation78_spill] sm:$0xff] %v8329_v51  ;;  %v8332_v43 = vld [vmem:[#allocation16 + $0x178] sm:$0xff]  }
 0x6a4   :  { %5882 = vmatprep.subr.bf16.mxu0 %v8308_v7  ;;  %v8335_v7 = vld [vmem:[#allocation16 + $0x1b0] sm:$0xff]  }
 0x6a5   :  { %5903 = vmatpush3.bf16.msra.mxu1 %v8311_v32  ;;  %9295 = vst [vmem:[#allocation79_spill] sm:$0xff] %v8335_v7  ;;  %v8338_v32 = vld [vmem:[#allocation16 + $0x1f8] sm:$0xff]  }
 0x6a6   :  { %5904 = vmatprep.subr.bf16.mxu1 %v8314_v39  ;;  %v8341_v39 = vld [vmem:[#allocation16 + $0x138] sm:$0xff]  }
 0x6a7   :  { %5883 = vmatpush3.bf16.msra.mxu0 %v8317_v25  ;;  %9296 = vst [vmem:[#allocation80_spill] sm:$0xff] %v8341_v39  ;;  %v8346_v25 = vrot.slane %v8204_v18, %v8022_v41  ;;  %v8362_v18 = vld [vmem:[#allocation14 + $0xc0] sm:$0xff]  }
 0x6a8   :  { %5884 = vmatprep.subr.bf16.mxu0 %v8320_v52  ;;  %v8349_v52 = vld [vmem:[#allocation16 + $0x1b8] sm:$0xff]   ;;  %9299 = vst [vmem:[#allocation83_spill] sm:$0xff] %v8362_v18 }
 0x6a9   :  { %5905 = vmatpush3.bf16.msra.mxu1 %v8323_v48  ;;  %9297 = vst [vmem:[#allocation81_spill] sm:$0xff] %v8349_v52 }
 0x6aa   :  { %5906 = vmatprep.subr.bf16.mxu1 %v8326_v2  ;;  %v8355_v2 = vcombine.high %v8346_v25, %v8346_v25 }
 0x6ab   :  { %5885 = vmatpush3.bf16.msra.mxu0 %v8329_v51  ;;  %v8357_v51 = vld [vmem:[#allocation14 + $0x40] sm:$0xff]  }
 0x6ac   :  { %5886 = vmatprep.subr.bf16.mxu0 %v8332_v43  ;;  %9298 = vst [vmem:[#allocation82_spill] sm:$0xff] %v8357_v51 }
 0x6ad   :  { %5907 = vmatpush3.bf16.msra.mxu1 %v8335_v7  ;;  %v8365_v7 = vld [vmem:[#allocation14] sm:$0xff]  }
 0x6ae   :  { %5908 = vmatprep.subr.bf16.mxu1 %v8338_v32  ;;  %9300 = vst [vmem:[#allocation84_spill] sm:$0xff] %v8365_v7 }
 0x6af   :  { %5887 = vmatpush3.bf16.msra.mxu0 %v8341_v39  ;;  %v8370_v39 = vld [vmem:[#allocation14 + $0x48] sm:$0xff]  }
 0x6b0   :  { %5916 = vmatprep.subr.bf16.mxu0 %v8357_v51  ;;  %9301 = vst [vmem:[#allocation85_spill] sm:$0xff] %v8370_v39  ;;  %v8373_v51 = vld [vmem:[#allocation14 + $0x80] sm:$0xff]  }
 0x6b1   :  { %5909 = vmatpush3.bf16.msra.mxu1 %v8349_v52  ;;  %v8377_v52 = vld [vmem:[#allocation14 + $0xc8] sm:$0xff]  }
 0x6b2   :  { %4387 = vmatmul.mubr.bf16.vlgmr.msra.gmra.mrb[12].mxu0 %v8346_v25  ;;  %5938 = vmatprep.subr.bf16.mxu1 %v8362_v18  ;;  %9302 = vst [vmem:[#allocation125_spill] sm:$0xff] %v8377_v52  ;;  %v8380_v18 = vld [vmem:[#allocation14 + $0x8] sm:$0xff]  }
 0x6b3   :  { %5917 = vmatpush3.bf16.msra.mxu0 %v8365_v7  ;;  %4553 = vmatprep.mubr.bf16.mxu0 %v8213_v6  ;;  %9303 = vst [vmem:[#allocation126_spill] sm:$0xff] %v8380_v18  ;;  %v8383_v6 = vld [vmem:[#allocation14 + $0x50] sm:$0xff]   ;;  %v8386_v7 = vld [vmem:[#allocation14 + $0x88] sm:$0xff]  }
 0x6b4   :  { %4427 = vmatmul.mubr.bf16.vlgmr.msra.gmra.mrb[12].mxu1 %v8355_v2  ;;  %5918 = vmatprep.subr.bf16.mxu0 %v8370_v39  ;;  %9304 = vst [vmem:[#allocation127_spill] sm:$0xff] %v8383_v6  ;;  %9305 = vst [vmem:[#allocation128_spill] sm:$0xff] %v8386_v7  ;;  %v8389_v39 = vld [vmem:[#allocation14 + $0xd0] sm:$0xff]  }
 0x6b5   :  { %5939 = vmatpush3.bf16.msra.mxu1 %v8373_v51  ;;  %4593 = vmatprep.mubr.bf16.mxu1 %v8226_v57  ;;  %9306 = vst [vmem:[#allocation129_spill] sm:$0xff] %v8389_v39  ;;  %v8392_v57 = vld [vmem:[#allocation14 + $0x10] sm:$0xff]  }
 0x6b6   :  { %5940 = vmatprep.subr.bf16.mxu1 %v8377_v52  ;;  %9307 = vst [vmem:[#allocation130_spill] sm:$0xff] %v8392_v57  ;;  %v8395_v52 = vld [vmem:[#allocation14 + $0x58] sm:$0xff]  }
 0x6b7   :  { %5919 = vmatpush3.bf16.msra.mxu0 %v8380_v18  ;;  %v8398_v18 = vld [vmem:[#allocation14 + $0x90] sm:$0xff]  }
 0x6b8   :  { %5920 = vmatprep.subr.bf16.mxu0 %v8383_v6  ;;  %v8401_v6 = vld [vmem:[#allocation14 + $0xd8] sm:$0xff]  }
 0x6b9   :  { %5941 = vmatpush3.bf16.msra.mxu1 %v8386_v7  ;;  %v8404_v7 = vld [vmem:[#allocation14 + $0x18] sm:$0xff]  }
 0x6ba   :  { %5942 = vmatprep.subr.bf16.mxu1 %v8389_v39  ;;  %v8407_v39 = vld [vmem:[#allocation14 + $0x60] sm:$0xff]  }
 0x6bb   :  { %5921 = vmatpush3.bf16.msra.mxu0 %v8392_v57  ;;  %v8410_v57 = vld [vmem:[#allocation14 + $0x98] sm:$0xff]  }
 0x6bc   :  { %5922 = vmatprep.subr.bf16.mxu0 %v8395_v52 }
 0x6bd   :  { %5943 = vmatpush3.bf16.msra.mxu1 %v8398_v18 }
 0x6be   :  { %5944 = vmatprep.subr.bf16.mxu1 %v8401_v6 }
 0x6bf   :  { %5923 = vmatpush3.bf16.msra.mxu0 %v8404_v7 }
 0x6c0   :  { %5924 = vmatprep.subr.bf16.mxu0 %v8407_v39 }
 0x6c1   :  { %5945 = vmatpush3.bf16.msra.mxu1 %v8410_v57 }
 0x6c2   :  { %5946 = vmatprep.subr.bf16.mxu1 %v7970_v24  ;;  %v4683_v24 = vld [vmem:[#allocation5 + $0x10] sm:$0xff] }
 0x6c3   :  { %5925 = vmatpush3.bf16.msra.mxu0 %v7972_v27  ;;  %v4692_v27 = vrot.slane %v4683_v24, %v8022_v41 }
 0x6c4   :  { %5926 = vmatprep.subr.bf16.mxu0 %v7978_v34 }
 0x6c5   :  { %5947 = vmatpush3.bf16.msra.mxu1 %v7975_v47  ;;  %v4700_v47 = vcombine.high %v4692_v27, %v4692_v27 }
 0x6c6   :  { %5948 = vmatprep.subr.bf16.mxu1 %v7981_v36  ;;  %v9308_v36 = vld [vmem:[#allocation21_spill] sm:$0xff] }
 0x6c7   :  { %5927 = vmatpush3.bf16.msra.mxu0 %v7984_v37  ;;  %v8463_v34 = vrot.slane %v4700_v47, %v8022_v41  ;;  %v9351_v47 = vld [vmem:[#allocation64_spill] sm:$0xff] }
 0x6c8   :  { %5928 = vmatprep.subr.bf16.mxu0 %v7990_v22  ;;  %v9310_v22 = vld [vmem:[#allocation23_spill] sm:$0xff] }
 0x6c9   :  { %5949 = vmatpush3.bf16.msra.mxu1 %v7987_v28  ;;  %v8471_v37 = vcombine.high %v8463_v34, %v8463_v34  ;;  %v9309_v28 = vld [vmem:[#allocation22_spill] sm:$0xff] }
 0x6ca   :  { %5950 = vmatprep.subr.bf16.mxu1 %v7993_v53  ;;  %v9311_v53 = vld [vmem:[#allocation24_spill] sm:$0xff] }
 0x6cb   :  { %5929 = vmatpush3.bf16.msra.mxu0 %v7996_v0  ;;  %v9312_v0 = vld [vmem:[#allocation25_spill] sm:$0xff] }
 0x6cc   :  { %5930 = vmatprep.subr.bf16.mxu0 %v8002_v1  ;;  %v9314_v1 = vld [vmem:[#allocation27_spill] sm:$0xff] }
 0x6cd   :  { %5951 = vmatpush3.bf16.msra.mxu1 %v7999_v26  ;;  %v9313_v26 = vld [vmem:[#allocation26_spill] sm:$0xff] }
 0x6ce   :  { %5952 = vmatprep.subr.bf16.mxu1 %v8005_v5  ;;  %v9315_v5 = vld [vmem:[#allocation28_spill] sm:$0xff] }
 0x6cf   :  { %5931 = vmatpush3.bf16.msra.mxu0 %v8008_v12  ;;  %v9316_v12 = vld [vmem:[#allocation29_spill] sm:$0xff] }
 0x6d0   :  { %5960 = vmatprep.subr.bf16.mxu0 %v8014_v54  ;;  %v9318_v54 = vld [vmem:[#allocation31_spill] sm:$0xff] }
 0x6d1   :  { %5953 = vmatpush3.bf16.msra.mxu1 %v8011_v50  ;;  %v9317_v50 = vld [vmem:[#allocation30_spill] sm:$0xff] }
 0x6d2   :  { %4554 = vmatmul.mubr.bf16.vlgmr.msra.gmra.mrb[16].mxu0 %v8230_v56  ;;  %5982 = vmatprep.subr.bf16.mxu1 %v8018_v31  ;;  %v9319_v31 = vld [vmem:[#allocation32_spill] sm:$0xff]  ;;  %v9346_v56 = vld [vmem:[#allocation59_spill] sm:$0xff] }
 0x6d3   :  { %5961 = vmatpush3.bf16.msra.mxu0 %v8032_v15  ;;  %4633 = vmatprep.mubr.bf16.mxu0 %v8239_v3  ;;  %v9320_v15 = vld [vmem:[#allocation33_spill] sm:$0xff] }
 0x6d4   :  { %4594 = vmatmul.mubr.bf16.vlgmr.msra.gmra.mrb[16].mxu1 %v8249_v30  ;;  %5962 = vmatprep.subr.bf16.mxu0 %v8035_v8  ;;  %v9321_v8 = vld [vmem:[#allocation34_spill] sm:$0xff]  ;;  %v9344_v3 = vld [vmem:[#allocation57_spill] sm:$0xff]  ;;  %v9347_v30 = vld [vmem:[#allocation60_spill] sm:$0xff] }
 0x6d5   :  { %5983 = vmatpush3.bf16.msra.mxu1 %v8037_v19  ;;  %4673 = vmatprep.mubr.bf16.mxu1 %v8259_v17  ;;  %v9322_v19 = vld [vmem:[#allocation35_spill] sm:$0xff]  ;;  %v9345_v17 = vld [vmem:[#allocation58_spill] sm:$0xff] }
 0x6d6   :  { %5984 = vmatprep.subr.bf16.mxu1 %v8039_v23  ;;  %v9323_v23 = vld [vmem:[#allocation36_spill] sm:$0xff] }
 0x6d7   :  { %5963 = vmatpush3.bf16.msra.mxu0 %v8042_v21  ;;  %v9324_v21 = vld [vmem:[#allocation37_spill] sm:$0xff] }
 0x6d8   :  { %5964 = vmatprep.subr.bf16.mxu0 %v8045_v11  ;;  %v4685_v11 = vcombine.high %v4683_v24, %v4683_v24  ;;  %v9349_v24 = vld [vmem:[#allocation62_spill] sm:$0xff] }
 0x6d9   :  { %5985 = vmatpush3.bf16.msra.mxu1 %v8048_v44  ;;  %v9325_v44 = vld [vmem:[#allocation38_spill] sm:$0xff] }
 0x6da   :  { %5986 = vmatprep.subr.bf16.mxu1 %v8051_v10  ;;  %v9326_v10 = vld [vmem:[#allocation39_spill] sm:$0xff] }
 0x6db   :  { %5965 = vmatpush3.bf16.msra.mxu0 %v8054_v4  ;;  %v9327_v4 = vld [vmem:[#allocation40_spill] sm:$0xff] }
 0x6dc   :  { %5966 = vmatprep.subr.bf16.mxu0 %v8057_v35  ;;  %v9328_v35 = vld [vmem:[#allocation41_spill] sm:$0xff] }
 0x6dd   :  { %5987 = vmatpush3.bf16.msra.mxu1 %v8060_v9  ;;  %v4699_v9 = vrot.slane %v4685_v11, %v8022_v41  ;;  %v9360_v11 = vld [vmem:[#allocation73_spill] sm:$0xff] }
 0x6de   :  { %5988 = vmatprep.subr.bf16.mxu1 %v8063_v29  ;;  %v9329_v29 = vld [vmem:[#allocation42_spill] sm:$0xff] }
 0x6df   :  { %5967 = vmatpush3.bf16.msra.mxu0 %v8066_v46  ;;  %v9330_v46 = vld [vmem:[#allocation43_spill] sm:$0xff] }
 0x6e0   :  { %5968 = vmatprep.subr.bf16.mxu0 %v8069_v13  ;;  %v9331_v13 = vld [vmem:[#allocation44_spill] sm:$0xff] }
 0x6e1   :  { %5989 = vmatpush3.bf16.msra.mxu1 %v8072_v14  ;;  %v9332_v14 = vld [vmem:[#allocation45_spill] sm:$0xff] }
 0x6e2   :  { %5990 = vmatprep.subr.bf16.mxu1 %v8075_v20  ;;  %v4701_v20 = vcombine.high %v4699_v9, %v4699_v9 }
 0x6e3   :  { %5969 = vmatpush3.bf16.msra.mxu0 %v8078_v16  ;;  %v9333_v16 = vld [vmem:[#allocation46_spill] sm:$0xff] }
 0x6e4   :  { %5970 = vmatprep.subr.bf16.mxu0 %v8081_v55  ;;  %v9334_v55 = vld [vmem:[#allocation47_spill] sm:$0xff] }
 0x6e5   :  { %5991 = vmatpush3.bf16.msra.mxu1 %v8084_v62  ;;  %v9335_v62 = vld [vmem:[#allocation48_spill] sm:$0xff] }
 0x6e6   :  { %5992 = vmatprep.subr.bf16.mxu1 %v8087_v33  ;;  %v8506_v33 = vrot.slane %v4692_v27, %v8022_v41  ;;  %v9350_v27 = vld [vmem:[#allocation63_spill] sm:$0xff] }
 0x6e7   :  { %5971 = vmatpush3.bf16.msra.mxu0 %v8090_v40  ;;  %v9336_v40 = vld [vmem:[#allocation49_spill] sm:$0xff] }
 0x6e8   :  { %5972 = vmatprep.subr.bf16.mxu0 %v8093_v45  ;;  %v8510_v45 = vrot.slane %v4701_v20, %v8022_v41 }
 0x6e9   :  { %5993 = vmatpush3.bf16.msra.mxu1 %v8096_v42  ;;  %v9337_v42 = vld [vmem:[#allocation50_spill] sm:$0xff] }
 0x6ea   :  { %5994 = vmatprep.subr.bf16.mxu1 %v8099_v38  ;;  %v9338_v38 = vld [vmem:[#allocation51_spill] sm:$0xff] }
 0x6eb   :  { %5973 = vmatpush3.bf16.msra.mxu0 %v8102_v58  ;;  %v8516_v58 = vcombine.high %v8506_v33, %v8506_v33 }
 0x6ec   :  { %5974 = vmatprep.subr.bf16.mxu0 %v8105_v63  ;;  %v9339_v63 = vld [vmem:[#allocation52_spill] sm:$0xff] }
 0x6ed   :  { %5995 = vmatpush3.bf16.msra.mxu1 %v8108_v60  ;;  %v9340_v60 = vld [vmem:[#allocation53_spill] sm:$0xff] }
 0x6ee   :  { %5996 = vmatprep.subr.bf16.mxu1 %v8111_v61  ;;  %v8522_v61 = vcombine.high %v8510_v45, %v8510_v45 }
 0x6ef   :  { %5975 = vmatpush3.bf16.msra.mxu0 %v8114_v59  ;;  %v9341_v59 = vld [vmem:[#allocation54_spill] sm:$0xff] }
 0x6f0   :  { %6004 = vmatprep.subr.bf16.mxu0 %v8119_v49  ;;  %v9342_v49 = vld [vmem:[#allocation55_spill] sm:$0xff] }
 0x6f1   :  { %5997 = vmatpush3.bf16.msra.mxu1 %v9308_v36  ;;  %v9352_v36 = vld [vmem:[#allocation65_spill] sm:$0xff] }
 0x6f2   :  { %4634 = vmatmul.mubr.bf16.vlgmr.msra.gmra.mrb[20].mxu0 %v8346_v25  ;;  %6026 = vmatprep.subr.bf16.mxu1 %v9309_v28  ;;  %v9348_v25 = vld [vmem:[#allocation61_spill] sm:$0xff]  ;;  %v9353_v28 = vld [vmem:[#allocation66_spill] sm:$0xff] }
 0x6f3   :  { %6005 = vmatpush3.bf16.msra.mxu0 %v9310_v22  ;;  %4774 = vmatprep.mubr.bf16.mxu0 %v8463_v34  ;;  %v9354_v22 = vld [vmem:[#allocation67_spill] sm:$0xff] }
 0x6f4   :  { %4674 = vmatmul.mubr.bf16.vlgmr.msra.gmra.mrb[20].mxu1 %v8355_v2  ;;  %6006 = vmatprep.subr.bf16.mxu0 %v9311_v53  ;;  %v9343_v2 = vld [vmem:[#allocation56_spill] sm:$0xff] }
 0x6f5   :  { %6027 = vmatpush3.bf16.msra.mxu1 %v9312_v0  ;;  %4814 = vmatprep.mubr.bf16.mxu1 %v8471_v37  ;;  %v9355_v53 = vld [vmem:[#allocation68_spill] sm:$0xff]  ;;  %v9356_v0 = vld [vmem:[#allocation69_spill] sm:$0xff] }
 0x6f6   :  { %6028 = vmatprep.subr.bf16.mxu1 %v9313_v26  ;;  %v9357_v26 = vld [vmem:[#allocation70_spill] sm:$0xff] }
 0x6f7   :  { %6007 = vmatpush3.bf16.msra.mxu0 %v9314_v1  ;;  %v9358_v1 = vld [vmem:[#allocation71_spill] sm:$0xff] }
 0x6f8   :  { %6008 = vmatprep.subr.bf16.mxu0 %v9315_v5  ;;  %v9359_v5 = vld [vmem:[#allocation72_spill] sm:$0xff] }
 0x6f9   :  { %6029 = vmatpush3.bf16.msra.mxu1 %v9316_v12 }
 0x6fa   :  { %6030 = vmatprep.subr.bf16.mxu1 %v9317_v50 }
 0x6fb   :  { %6009 = vmatpush3.bf16.msra.mxu0 %v9318_v54 }
 0x6fc   :  { %6010 = vmatprep.subr.bf16.mxu0 %v9319_v31 }
 0x6fd   :  { %6031 = vmatpush3.bf16.msra.mxu1 %v9320_v15 }
 0x6fe   :  { %6032 = vmatprep.subr.bf16.mxu1 %v9321_v8 }
 0x6ff   :  { %6011 = vmatpush3.bf16.msra.mxu0 %v9322_v19 }
 0x700   :  { %6012 = vmatprep.subr.bf16.mxu0 %v9323_v23 }
 0x701   :  { %6033 = vmatpush3.bf16.msra.mxu1 %v9324_v21 }
 0x702   :  { %6034 = vmatprep.subr.bf16.mxu1 %v9325_v44 }
 0x703   :  { %6013 = vmatpush3.bf16.msra.mxu0 %v9326_v10 }
 0x704   :  { %6014 = vmatprep.subr.bf16.mxu0 %v9327_v4 }
 0x705   :  { %6035 = vmatpush3.bf16.msra.mxu1 %v9328_v35 }
 0x706   :  { %6036 = vmatprep.subr.bf16.mxu1 %v9329_v29 }
 0x707   :  { %6015 = vmatpush3.bf16.msra.mxu0 %v9330_v46 }
 0x708   :  { %6016 = vmatprep.subr.bf16.mxu0 %v9331_v13 }
 0x709   :  { %6037 = vmatpush3.bf16.msra.mxu1 %v9332_v14 }
 0x70a   :  { %6038 = vmatprep.subr.bf16.mxu1 %v9333_v16 }
 0x70b   :  { %6017 = vmatpush3.bf16.msra.mxu0 %v9334_v55 }
 0x70c   :  { %6018 = vmatprep.subr.bf16.mxu0 %v9335_v62 }
 0x70d   :  { %6039 = vmatpush3.bf16.msra.mxu1 %v9336_v40 }
 0x70e   :  { %6040 = vmatprep.subr.bf16.mxu1 %v9337_v42 }
 0x70f   :  { %6019 = vmatpush3.bf16.msra.mxu0 %v9338_v38 }
 0x710   :  { %6048 = vmatprep.subr.bf16.mxu0 %v9339_v63 }
 0x711   :  { %6041 = vmatpush3.bf16.msra.mxu1 %v9340_v60 }
 0x712   :  { %4775 = vmatmul.mubr.bf16.vlgmr.msra.gmra.mrb[24].mxu0 %v8506_v33  ;;  %6070 = vmatprep.subr.bf16.mxu1 %v9341_v59 }
 0x713   :  { %6049 = vmatpush3.bf16.msra.mxu0 %v9342_v49  ;;  %4854 = vmatprep.mubr.bf16.mxu0 %v8510_v45 }
 0x714   :  { %4815 = vmatmul.mubr.bf16.vlgmr.msra.gmra.mrb[24].mxu1 %v8516_v58  ;;  %6050 = vmatprep.subr.bf16.mxu0 %v9343_v2 }
 0x715   :  { %6071 = vmatpush3.bf16.msra.mxu1 %v9344_v3  ;;  %4894 = vmatprep.mubr.bf16.mxu1 %v8522_v61 }
 0x716   :  { %6072 = vmatprep.subr.bf16.mxu1 %v9345_v17 }
 0x717   :  { %6051 = vmatpush3.bf16.msra.mxu0 %v9346_v56  ;;  %v9365_v56 = vld [vmem:[#allocation78_spill] sm:$0xff] }
 0x718   :  { %6052 = vmatprep.subr.bf16.mxu0 %v9347_v30 }
 0x719   :  { %6073 = vmatpush3.bf16.msra.mxu1 %v9348_v25 }
 0x71a   :  { %6074 = vmatprep.subr.bf16.mxu1 %v9349_v24 }
 0x71b   :  { %6053 = vmatpush3.bf16.msra.mxu0 %v9350_v27  ;;  %v9361_v27 = vld [vmem:[#allocation74_spill] sm:$0xff] }
 0x71c   :  { %6054 = vmatprep.subr.bf16.mxu0 %v9351_v47 }
 0x71d   :  { %6075 = vmatpush3.bf16.msra.mxu1 %v9352_v36 }
 0x71e   :  { %6076 = vmatprep.subr.bf16.mxu1 %v9353_v28 }
 0x71f   :  { %6055 = vmatpush3.bf16.msra.mxu0 %v9354_v22  ;;  %v9362_v22 = vld [vmem:[#allocation75_spill] sm:$0xff] }
 0x720   :  { %6056 = vmatprep.subr.bf16.mxu0 %v9355_v53 }
 0x721   :  { %6077 = vmatpush3.bf16.msra.mxu1 %v9356_v0  ;;  %v9363_v0 = vld [vmem:[#allocation76_spill] sm:$0xff] }
 0x722   :  { %6078 = vmatprep.subr.bf16.mxu1 %v9357_v26 }
 0x723   :  { %6057 = vmatpush3.bf16.msra.mxu0 %v9358_v1  ;;  %v9364_v1 = vld [vmem:[#allocation77_spill] sm:$0xff] }
 0x724   :  { %6058 = vmatprep.subr.bf16.mxu0 %v9359_v5 }
 0x725   :  { %6079 = vmatpush3.bf16.msra.mxu1 %v9360_v11  ;;  %v5756_v20 = vpop.f32.mrb[0].mxu0 }
 0x726   :  { %v5757_v47 = vpop.f32.mrb[1].mxu0  ;;  %6080 = vmatprep.subr.bf16.mxu1 %v9361_v27 }
 0x727   :  { %v5778_v36 = vpop.f32.mrb[0].mxu1  ;;  %v5758_v28 = vadd.f32 %v5757_v47, %v5756_v20  ;;  %v5759_v24 = vpop.f32.mrb[2].mxu0  ;;  %6059 = vmatpush3.bf16.msra.mxu0 %v9362_v22  ;;  %v9366_v47 = vld [vmem:[#allocation79_spill] sm:$0xff] }
 0x728   :  { %v5779_v53 = vpop.f32.mrb[1].mxu1  ;;  %v5760_v25 = vpop.f32.mrb[3].mxu0  ;;  %6060 = vmatprep.subr.bf16.mxu0 %v9363_v0  ;;  %v8556_v24 = vrot.slane %v4699_v9, %v8022_v41  ;;  %v9371_v9 = vld [vmem:[#allocation84_spill] sm:$0xff]  ;;  %v9374_v20 = vld [vmem:[#allocation126_spill] sm:$0xff] }
 0x729   :  { %v5780_v26 = vadd.f32 %v5779_v53, %v5778_v36  ;;  %v5781_v30 = vpop.f32.mrb[2].mxu1  ;;  %6081 = vmatpush3.bf16.msra.mxu1 %v8323_v48  ;;  %v9367_v25 = vld [vmem:[#allocation80_spill] sm:$0xff]  ;;  %v9368_v36 = vld [vmem:[#allocation82_spill] sm:$0xff]  ;;  %v9370_v53 = vld [vmem:[#allocation83_spill] sm:$0xff] }
 0x72a   :  { %v5782_v5 = vpop.f32.mrb[3].mxu1  ;;  %6082 = vmatprep.subr.bf16.mxu1 %v9364_v1  ;;  %v8563_v30 = vcombine.high %v8556_v24, %v8556_v24 }
 0x72b   :  { %v3738_v11 = vadd.f32 %v5780_v26, %v5758_v28  ;;  %6061 = vmatpush3.bf16.msra.mxu0 %v9365_v56  ;;  %v9369_v28 = vld [vmem:[#allocation81_spill] sm:$0xff]  ;;  %v9373_v5 = vld [vmem:[#allocation125_spill] sm:$0xff] }
 0x72c   :  { %6062 = vmatprep.subr.bf16.mxu0 %v8332_v43  ;;  %v9372_v26 = vld [vmem:[#allocation85_spill] sm:$0xff] }
 0x72d   :  { %6083 = vmatpush3.bf16.msra.mxu1 %v9366_v47 }
 0x72e   :  { %6084 = vmatprep.subr.bf16.mxu1 %v8338_v32 }
 0x72f   :  { %6063 = vmatpush3.bf16.msra.mxu0 %v9367_v25 }
 0x730   :  { %6092 = vmatprep.subr.bf16.mxu0 %v9368_v36  ;;  %v9375_v36 = vld [vmem:[#allocation127_spill] sm:$0xff] }
 0x731   :  { %6085 = vmatpush3.bf16.msra.mxu1 %v9369_v28  ;;  %v9376_v28 = vld [vmem:[#allocation128_spill] sm:$0xff] }
 0x732   :  { %4855 = vmatmul.mubr.bf16.vlgmr.msra.gmra.mrb[28].mxu0 %v8556_v24  ;;  %6114 = vmatprep.subr.bf16.mxu1 %v9370_v53  ;;  %v9377_v53 = vld [vmem:[#allocation129_spill] sm:$0xff] }
 0x733   :  { %6093 = vmatpush3.bf16.msra.mxu0 %v9371_v9  ;;  %5021 = vmatprep.mubr.bf16.mxu0 %v8463_v34  ;;  %v9378_v9 = vld [vmem:[#allocation130_spill] sm:$0xff]  ;;  %v6605_v34 = vld [vmem:[#allocation14 + $0x20] sm:$0xff]  }
 0x734   :  { %4895 = vmatmul.mubr.bf16.vlgmr.msra.gmra.mrb[28].mxu1 %v8563_v30  ;;  %6094 = vmatprep.subr.bf16.mxu0 %v9372_v26 }
 0x735   :  { %6115 = vmatpush3.bf16.msra.mxu1 %v8373_v51  ;;  %5061 = vmatprep.mubr.bf16.mxu1 %v8471_v37  ;;  %v6604_v51 = vld [vmem:[#allocation14 + $0xe0] sm:$0xff]   ;;  %v6606_v37 = vld [vmem:[#allocation14 + $0x68] sm:$0xff]  }
 0x736   :  { %6116 = vmatprep.subr.bf16.mxu1 %v9373_v5  ;;  %v6608_v5 = vld [vmem:[#allocation14 + $0xe8] sm:$0xff]  }
 0x737   :  { %6095 = vmatpush3.bf16.msra.mxu0 %v9374_v20 }
 0x738   :  { %6096 = vmatprep.subr.bf16.mxu0 %v9375_v36 }
 0x739   :  { %6117 = vmatpush3.bf16.msra.mxu1 %v9376_v28  ;;  %v6607_v28 = vld [vmem:[#allocation14 + $0xa0] sm:$0xff]  }
 0x73a   :  { %6118 = vmatprep.subr.bf16.mxu1 %v9377_v53 }
 0x73b   :  { %6097 = vmatpush3.bf16.msra.mxu0 %v9378_v9 }
 0x73c   :  { %6098 = vmatprep.subr.bf16.mxu0 %v8395_v52 }
 0x73d   :  { %6119 = vmatpush3.bf16.msra.mxu1 %v8398_v18 }
 0x73e   :  { %6120 = vmatprep.subr.bf16.mxu1 %v8401_v6 }
 0x73f   :  { %6099 = vmatpush3.bf16.msra.mxu0 %v8404_v7  ;;  %v6609_v7 = vld [vmem:[#allocation14 + $0x28] sm:$0xff]  }
 0x740   :  { %6100 = vmatprep.subr.bf16.mxu0 %v8407_v39 }
 0x741   :  { %6121 = vmatpush3.bf16.msra.mxu1 %v8410_v57  ;;  %v6610_v57 = vld [vmem:[#allocation14 + $0x70] sm:$0xff]  }
 0x742   :  { %6122 = vmatprep.subr.bf16.mxu1 %v6604_v51 }
 0x743   :  { %6101 = vmatpush3.bf16.msra.mxu0 %v6605_v34  ;;  %v6611_v34 = vld [vmem:[#allocation14 + $0xa8] sm:$0xff]  }
 0x744   :  { %6102 = vmatprep.subr.bf16.mxu0 %v6606_v37 }
 0x745   :  { %6123 = vmatpush3.bf16.msra.mxu1 %v6607_v28  ;;  %v5800_v26 = vpop.f32.mrb[4].mxu0  ;;  %v6612_v28 = vld [vmem:[#allocation14 + $0xf0] sm:$0xff]  }
 0x746   :  { %v5801_v52 = vpop.f32.mrb[5].mxu0  ;;  %6124 = vmatprep.subr.bf16.mxu1 %v6608_v5  ;;  %v6613_v5 = vld [vmem:[#allocation14 + $0x30] sm:$0xff]  }
 0x747   :  { %v5822_v18 = vpop.f32.mrb[4].mxu1  ;;  %v5802_v6 = vadd.f32 %v5801_v52, %v5800_v26  ;;  %v5803_v20 = vpop.f32.mrb[6].mxu0  ;;  %6103 = vmatpush3.bf16.msra.mxu0 %v6609_v7  ;;  %v6614_v26 = vld [vmem:[#allocation14 + $0x78] sm:$0xff]   ;;  %v6615_v52 = vld [vmem:[#allocation14 + $0xb0] sm:$0xff]  }
 0x748   :  { %v5823_v39 = vpop.f32.mrb[5].mxu1  ;;  %v5804_v36 = vpop.f32.mrb[7].mxu0  ;;  %6104 = vmatprep.subr.bf16.mxu0 %v6610_v57  ;;  %v6616_v20 = vld [vmem:[#allocation14 + $0xf8] sm:$0xff]   ;;  %v6623_v57 = vld [vmem:[#allocation14 + $0x180] sm:$0xff]  }
 0x749   :  { %v3778_v53 = vadd.f32 %v5802_v6, %v3738_v11  ;;  %v5824_v9 = vadd.f32 %v5823_v39, %v5822_v18  ;;  %v5825_v51 = vpop.f32.mrb[6].mxu1  ;;  %6125 = vmatpush3.bf16.msra.mxu1 %v6611_v34  ;;  %v6617_v7 = vld [vmem:[#allocation14 + $0x38] sm:$0xff]   ;;  %v6618_v11 = vld [vmem:[#allocation14 + $0x140] sm:$0xff]   ;;  %v6622_v36 = vld [vmem:[#allocation14 + $0x148] sm:$0xff]  }
 0x74a   :  { %v5826_v37 = vpop.f32.mrb[7].mxu1  ;;  %6126 = vmatprep.subr.bf16.mxu1 %v6612_v28  ;;  %v6619_v18 = vld [vmem:[#allocation14 + $0xb8] sm:$0xff]   ;;  %v6620_v6 = vld [vmem:[#allocation14 + $0x1c0] sm:$0xff]   ;;  %v6626_v51 = vld [vmem:[#allocation14 + $0x150] sm:$0xff]  }
 0x74b   :  { %v8587_v25 = vadd.f32 %v5824_v9, %v3778_v53  ;;  %6105 = vmatpush3.bf16.msra.mxu0 %v6613_v5  ;;  %v6621_v39 = vld [vmem:[#allocation14 + $0x100] sm:$0xff]   ;;  %v6624_v53 = vld [vmem:[#allocation14 + $0x1c8] sm:$0xff]   ;;  %v6628_v34 = vld [vmem:[#allocation14 + $0x1d0] sm:$0xff]  }
 0x74c   :  { %6106 = vmatprep.subr.bf16.mxu0 %v6614_v26  ;;  %v6625_v9 = vld [vmem:[#allocation14 + $0x108] sm:$0xff]   ;;  %v6629_v37 = vld [vmem:[#allocation14 + $0x110] sm:$0xff]   ;;  %v6632_v28 = vld [vmem:[#allocation14 + $0x1d8] sm:$0xff]  }
 0x74d   :  { %6127 = vmatpush3.bf16.msra.mxu1 %v6615_v52  ;;  %v6633_v5 = vld [vmem:[#allocation14 + $0x118] sm:$0xff]   ;;  %v6636_v52 = vld [vmem:[#allocation14 + $0x1e0] sm:$0xff]  }
 0x74e   :  { %6128 = vmatprep.subr.bf16.mxu1 %v6616_v20  ;;  %v6635_v26 = vld [vmem:[#allocation14 + $0x198] sm:$0xff]   ;;  %v8593_v20 = vld [vmem:[#allocation5 + $0x18] sm:$0xff] }
 0x74f   :  { %6107 = vmatpush3.bf16.msra.mxu0 %v6617_v7  ;;  %v6637_v7 = vld [vmem:[#allocation14 + $0x120] sm:$0xff]  }
 0x750   :  { %6136 = vmatprep.subr.bf16.mxu0 %v6618_v11  ;;  %v6638_v11 = vld [vmem:[#allocation14 + $0x168] sm:$0xff]  }
 0x751   :  { %6129 = vmatpush3.bf16.msra.mxu1 %v6619_v18  ;;  %v6639_v18 = vld [vmem:[#allocation14 + $0x1a0] sm:$0xff]  }
 0x752   :  { %5022 = vmatmul.mubr.bf16.vlgmr.msra.gmra.mrb[32].mxu0 %v8506_v33  ;;  %6158 = vmatprep.subr.bf16.mxu1 %v6620_v6  ;;  %v6627_v33 = vld [vmem:[#allocation14 + $0x188] sm:$0xff]  }
 0x753   :  { %6137 = vmatpush3.bf16.msra.mxu0 %v6621_v39  ;;  %5101 = vmatprep.mubr.bf16.mxu0 %v8510_v45  ;;  %v6630_v45 = vld [vmem:[#allocation14 + $0x158] sm:$0xff]   ;;  %v8597_v39 = vrot.slane %v8593_v20, %v8022_v41 }
 0x754   :  { %5062 = vmatmul.mubr.bf16.vlgmr.msra.gmra.mrb[32].mxu1 %v8516_v58  ;;  %6138 = vmatprep.subr.bf16.mxu0 %v6622_v36  ;;  %v6631_v58 = vld [vmem:[#allocation14 + $0x190] sm:$0xff]  }
 0x755   :  { %6159 = vmatpush3.bf16.msra.mxu1 %v6623_v57  ;;  %5141 = vmatprep.mubr.bf16.mxu1 %v8522_v61  ;;  %v6634_v61 = vld [vmem:[#allocation14 + $0x160] sm:$0xff]   ;;  %v6640_v57 = vld [vmem:[#allocation14 + $0x1e8] sm:$0xff]  }
 0x756   :  { %6160 = vmatprep.subr.bf16.mxu1 %v6624_v53 }
 0x757   :  { %6139 = vmatpush3.bf16.msra.mxu0 %v6625_v9 }
 0x758   :  { %6140 = vmatprep.subr.bf16.mxu0 %v6626_v51 }
 0x759   :  { %6161 = vmatpush3.bf16.msra.mxu1 %v6627_v33  ;;  %v6641_v33 = vld [vmem:[#allocation14 + $0x128] sm:$0xff]  }
 0x75a   :  { %6162 = vmatprep.subr.bf16.mxu1 %v6628_v34 }
 0x75b   :  { %6141 = vmatpush3.bf16.msra.mxu0 %v6629_v37 }
 0x75c   :  { %6142 = vmatprep.subr.bf16.mxu0 %v6630_v45  ;;  %v6642_v45 = vld [vmem:[#allocation14 + $0x170] sm:$0xff]  }
 0x75d   :  { %6163 = vmatpush3.bf16.msra.mxu1 %v6631_v58 }
 0x75e   :  { %6164 = vmatprep.subr.bf16.mxu1 %v6632_v28 }
 0x75f   :  { %6143 = vmatpush3.bf16.msra.mxu0 %v6633_v5  ;;  %v6643_v5 = vld [vmem:[#allocation14 + $0x1a8] sm:$0xff]  }
 0x760   :  { %6144 = vmatprep.subr.bf16.mxu0 %v6634_v61  ;;  %v5168_v61 = vcombine.high %v8597_v39, %v8597_v39 }
 0x761   :  { %6165 = vmatpush3.bf16.msra.mxu1 %v6635_v26 }
 0x762   :  { %6166 = vmatprep.subr.bf16.mxu1 %v6636_v52  ;;  %v6644_v52 = vld [vmem:[#allocation14 + $0x1f0] sm:$0xff]  }
 0x763   :  { %6145 = vmatpush3.bf16.msra.mxu0 %v6637_v7 }
 0x764   :  { %6146 = vmatprep.subr.bf16.mxu0 %v6638_v11  ;;  %v6645_v11 = vld [vmem:[#allocation14 + $0x130] sm:$0xff]  }
 0x765   :  { %6167 = vmatpush3.bf16.msra.mxu1 %v6639_v18  ;;  %v5844_v6 = vpop.f32.mrb[8].mxu0  ;;  %v6646_v18 = vld [vmem:[#allocation14 + $0x178] sm:$0xff]  }
 0x766   :  { %v5845_v36 = vpop.f32.mrb[9].mxu0  ;;  %6168 = vmatprep.subr.bf16.mxu1 %v6640_v57  ;;  %v6648_v57 = vld [vmem:[#allocation14 + $0x1f8] sm:$0xff]  }
 0x767   :  { %v5866_v53 = vpop.f32.mrb[8].mxu1  ;;  %v5846_v9 = vadd.f32 %v5845_v36, %v5844_v6  ;;  %v5847_v51 = vpop.f32.mrb[10].mxu0  ;;  %6147 = vmatpush3.bf16.msra.mxu0 %v6641_v33  ;;  %v6647_v6 = vld [vmem:[#allocation14 + $0x1b0] sm:$0xff]   ;;  %v5190_v36 = vrot.slane %v5168_v61, %v8022_v41  ;;  %v6651_v33 = vld [vmem:[#allocation14 + $0x1b8] sm:$0xff]  }
 0x768   :  { %v5867_v34 = vpop.f32.mrb[9].mxu1  ;;  %v5848_v37 = vpop.f32.mrb[11].mxu0  ;;  %6148 = vmatprep.subr.bf16.mxu0 %v6642_v45  ;;  %v6650_v51 = vld [vmem:[#allocation16 + $0x40] sm:$0xff]   ;;  %v6654_v45 = vld [vmem:[#allocation16 + $0x48] sm:$0xff]   ;;  %v6658_v61 = vld [vmem:[#allocation16 + $0x50] sm:$0xff]  }
 0x769   :  { %v5868_v58 = vadd.f32 %v5867_v34, %v5866_v53  ;;  %v5869_v28 = vpop.f32.mrb[10].mxu1  ;;  %6169 = vmatpush3.bf16.msra.mxu1 %v6643_v5  ;;  %v6649_v53 = vld [vmem:[#allocation14 + $0x138] sm:$0xff]   ;;  %v5200_v34 = vcombine.high %v5190_v36, %v5190_v36  ;;  %v6653_v37 = vld [vmem:[#allocation16] sm:$0xff]   ;;  %v6657_v5 = vld [vmem:[#allocation16 + $0x8] sm:$0xff]  }
 0x76a   :  { %v5870_v26 = vpop.f32.mrb[11].mxu1  ;;  %6170 = vmatprep.subr.bf16.mxu1 %v6644_v52  ;;  %v6656_v28 = vld [vmem:[#allocation16 + $0xc8] sm:$0xff]   ;;  %v9391_v52 = vld [vmem:[#allocation71_spill] sm:$0xff] }
 0x76b   :  { %v4349_v7 = vadd.f32 %v5868_v58, %v5846_v9  ;;  %6149 = vmatpush3.bf16.msra.mxu0 %v6645_v11  ;;  %v6652_v9 = vld [vmem:[#allocation16 + $0xc0] sm:$0xff]   ;;  %v9390_v26 = vld [vmem:[#allocation70_spill] sm:$0xff] }
 0x76c   :  { %6150 = vmatprep.subr.bf16.mxu0 %v6646_v18  ;;  %v6655_v58 = vld [vmem:[#allocation16 + $0x80] sm:$0xff]  }
 0x76d   :  { %6171 = vmatpush3.bf16.msra.mxu1 %v6647_v6  ;;  %v9393_v11 = vld [vmem:[#allocation73_spill] sm:$0xff] }
 0x76e   :  { %6172 = vmatprep.subr.bf16.mxu1 %v6648_v57 }
 0x76f   :  { %6151 = vmatpush3.bf16.msra.mxu0 %v6649_v53 }
 0x770   :  { %6180 = vmatprep.subr.bf16.mxu0 %v6650_v51 }
 0x771   :  { %6173 = vmatpush3.bf16.msra.mxu1 %v6651_v33 }
 0x772   :  { %5102 = vmatmul.mubr.bf16.vlgmr.msra.gmra.mrb[36].mxu0 %v8556_v24  ;;  %6202 = vmatprep.subr.bf16.mxu1 %v6652_v9  ;;  %v5153_v24 = vcombine.high %v8593_v20, %v8593_v20 }
 0x773   :  { %6181 = vmatpush3.bf16.msra.mxu0 %v6653_v37  ;;  %5242 = vmatprep.mubr.bf16.mxu0 %v5190_v36 }
 0x774   :  { %5142 = vmatmul.mubr.bf16.vlgmr.msra.gmra.mrb[36].mxu1 %v8563_v30  ;;  %6182 = vmatprep.subr.bf16.mxu0 %v6654_v45 }
 0x775   :  { %6203 = vmatpush3.bf16.msra.mxu1 %v6655_v58  ;;  %5282 = vmatprep.mubr.bf16.mxu1 %v5200_v34  ;;  %v9395_v58 = vld [vmem:[#allocation81_spill] sm:$0xff] }
 0x776   :  { %6204 = vmatprep.subr.bf16.mxu1 %v6656_v28 }
 0x777   :  { %6183 = vmatpush3.bf16.msra.mxu0 %v6657_v5 }
 0x778   :  { %6184 = vmatprep.subr.bf16.mxu0 %v6658_v61 }
 0x779   :  { %6205 = vmatpush3.bf16.msra.mxu1 %v9316_v12 }
 0x77a   :  { %6206 = vmatprep.subr.bf16.mxu1 %v9317_v50  ;;  %v8620_v50 = vrot.slane %v5153_v24, %v8022_v41 }
 0x77b   :  { %6185 = vmatpush3.bf16.msra.mxu0 %v9318_v54 }
 0x77c   :  { %6186 = vmatprep.subr.bf16.mxu0 %v9319_v31 }
 0x77d   :  { %6207 = vmatpush3.bf16.msra.mxu1 %v9320_v15 }
 0x77e   :  { %6208 = vmatprep.subr.bf16.mxu1 %v9321_v8 }
 0x77f   :  { %6187 = vmatpush3.bf16.msra.mxu0 %v9322_v19  ;;  %v8627_v19 = vld [vmem:[%s8709_s7] ss:$0 sm:$0xff] }
 0x780   :  { %6188 = vmatprep.subr.bf16.mxu0 %v9323_v23 }
 0x781   :  { %6209 = vmatpush3.bf16.msra.mxu1 %v9324_v21 }
 0x782   :  { %6210 = vmatprep.subr.bf16.mxu1 %v9325_v44 }
 0x783   :  { %6189 = vmatpush3.bf16.msra.mxu0 %v9326_v10 }
 0x784   :  { %6190 = vmatprep.subr.bf16.mxu0 %v9327_v4 }
 0x785   :  { %6211 = vmatpush3.bf16.msra.mxu1 %v9328_v35  ;;  %v5888_v12 = vpop.f32.mrb[12].mxu0  ;;  %v5169_v35 = vcombine.high %v8620_v50, %v8620_v50 }
 0x786   :  { %v5889_v54 = vpop.f32.mrb[13].mxu0  ;;  %6212 = vmatprep.subr.bf16.mxu1 %v9329_v29 }
 0x787   :  { %v5910_v31 = vpop.f32.mrb[12].mxu1  ;;  %v5890_v15 = vadd.f32 %v5889_v54, %v5888_v12  ;;  %v5891_v8 = vpop.f32.mrb[14].mxu0  ;;  %6191 = vmatpush3.bf16.msra.mxu0 %v9330_v46  ;;  %v3829_v46 = vadd.f32 %v8627_v19, %v8587_v25 }
 0x788   :  { %v5911_v23 = vpop.f32.mrb[13].mxu1  ;;  %v5892_v21 = vpop.f32.mrb[15].mxu0  ;;  %6192 = vmatprep.subr.bf16.mxu0 %v9331_v13  ;;  %v5176_v13 = vrot.slane %v8597_v39, %v8022_v41  ;;  %v9388_v39 = vld [vmem:[#allocation68_spill] sm:$0xff] }
 0x789   :  { %v4389_v44 = vadd.f32 %v5890_v15, %v4349_v7  ;;  %v5912_v10 = vadd.f32 %v5911_v23, %v5910_v31  ;;  %v5913_v4 = vpop.f32.mrb[14].mxu1  ;;  %6213 = vmatpush3.bf16.msra.mxu1 %v9332_v14  ;;  %v5197_v14 = vrot.slane %v5169_v35, %v8022_v41  ;;  %v9392_v7 = vld [vmem:[#allocation72_spill] sm:$0xff] }
 0x78a   :  { %v5914_v29 = vpop.f32.mrb[15].mxu1  ;;  %6214 = vmatprep.subr.bf16.mxu1 %v9333_v16  ;;  %v5198_v25 = vcombine.high %v5176_v13, %v5176_v13 }
 0x78b   :  { %v4429_v30 = vadd.f32 %v5912_v10, %v4389_v44  ;;  %6193 = vmatpush3.bf16.msra.mxu0 %v9334_v55 }
 0x78c   :  { %6194 = vmatprep.subr.bf16.mxu0 %v9335_v62  ;;  %v5201_v62 = vcombine.high %v5197_v14, %v5197_v14 }
 0x78d   :  { %v4434_v20 = vadd.f32 %v4429_v30, %v3829_v46  ;;  %6215 = vmatpush3.bf16.msra.mxu1 %v9336_v40  ;;  %v9379_v40 = vld [vmem:[#allocation59_spill] sm:$0xff] }
 0x78e   :  { %6216 = vmatprep.subr.bf16.mxu1 %v9337_v42  ;;  %v9380_v42 = vld [vmem:[#allocation60_spill] sm:$0xff] }
 0x78f   :  { %v4442_v16 = vrot.slane %v4434_v20, %v8022_v41  ;;  %6195 = vmatpush3.bf16.msra.mxu0 %v9338_v38  ;;  %v9381_v38 = vld [vmem:[#allocation61_spill] sm:$0xff] }
 0x790   :  { %6224 = vmatprep.subr.bf16.mxu0 %v9339_v63  ;;  %v9382_v63 = vld [vmem:[#allocation62_spill] sm:$0xff] }
 0x791   :  { %v4443_v55 = vcombine.high %v4442_v16, %v4442_v16  ;;  %5724 = vst.sshfl [vmem:[%s8710_s8] sm:$0x1 pattern:$0x73625140] %v4442_v16  ;;  %6217 = vmatpush3.bf16.msra.mxu1 %v9340_v60  ;;  %v9383_v60 = vld [vmem:[#allocation63_spill] sm:$0xff] }
 0x792   :  { %5243 = vmatmul.mubr.bf16.vlgmr.msra.gmra.mrb[40].mxu0 %v5176_v13  ;;  %6246 = vmatprep.subr.bf16.mxu1 %v9341_v59  ;;  %v9384_v59 = vld [vmem:[#allocation64_spill] sm:$0xff] }
 0x793   :  { %5725 = vst.sshfl [vmem:[%s8710_s8 + $0x4] sm:$0x1 pattern:$0x73625140] %v4443_v55  ;;  %6225 = vmatpush3.bf16.msra.mxu0 %v9342_v49  ;;  %5322 = vmatprep.mubr.bf16.mxu0 %v5197_v14  ;;  %v9385_v49 = vld [vmem:[#allocation65_spill] sm:$0xff] }
 0x794   :  { %5283 = vmatmul.mubr.bf16.vlgmr.msra.gmra.mrb[40].mxu1 %v5198_v25  ;;  %6226 = vmatprep.subr.bf16.mxu0 %v9343_v2  ;;  %v9386_v2 = vld [vmem:[#allocation66_spill] sm:$0xff] }
 0x795   :  { %6247 = vmatpush3.bf16.msra.mxu1 %v9344_v3  ;;  %5362 = vmatprep.mubr.bf16.mxu1 %v5201_v62  ;;  %v9387_v3 = vld [vmem:[#allocation67_spill] sm:$0xff] }
 0x796   :  { %6248 = vmatprep.subr.bf16.mxu1 %v9345_v17  ;;  %v9389_v17 = vld [vmem:[#allocation69_spill] sm:$0xff] }
 0x797   :  { %6227 = vmatpush3.bf16.msra.mxu0 %v9379_v40 }
 0x798   :  { %6228 = vmatprep.subr.bf16.mxu0 %v9380_v42 }
 0x799   :  { %6249 = vmatpush3.bf16.msra.mxu1 %v9381_v38 }
 0x79a   :  { %6250 = vmatprep.subr.bf16.mxu1 %v9382_v63 }
 0x79b   :  { %6229 = vmatpush3.bf16.msra.mxu0 %v9383_v60 }
 0x79c   :  { %6230 = vmatprep.subr.bf16.mxu0 %v9384_v59 }
 0x79d   :  { %6251 = vmatpush3.bf16.msra.mxu1 %v9385_v49 }
 0x79e   :  { %6252 = vmatprep.subr.bf16.mxu1 %v9386_v2 }
 0x79f   :  { %6231 = vmatpush3.bf16.msra.mxu0 %v9387_v3 }
 0x7a0   :  { %6232 = vmatprep.subr.bf16.mxu0 %v9388_v39 }
 0x7a1   :  { %6253 = vmatpush3.bf16.msra.mxu1 %v9389_v17 }
 0x7a2   :  { %6254 = vmatprep.subr.bf16.mxu1 %v9390_v26 }
 0x7a3   :  { %6233 = vmatpush3.bf16.msra.mxu0 %v9391_v52 }
 0x7a4   :  { %6234 = vmatprep.subr.bf16.mxu0 %v9392_v7 }
 0x7a5   :  { %6255 = vmatpush3.bf16.msra.mxu1 %v9393_v11  ;;  %v5932_v18 = vpop.f32.mrb[16].mxu0 }
 0x7a6   :  { %v5933_v6 = vpop.f32.mrb[17].mxu0  ;;  %6256 = vmatprep.subr.bf16.mxu1 %v9361_v27  ;;  %v5183_v27 = vrot.slane %v8620_v50, %v8022_v41 }
 0x7a7   :  { %v5954_v36 = vpop.f32.mrb[16].mxu1  ;;  %v5934_v57 = vadd.f32 %v5933_v6, %v5932_v18  ;;  %v5935_v53 = vpop.f32.mrb[18].mxu0  ;;  %6235 = vmatpush3.bf16.msra.mxu0 %v9362_v22  ;;  %v9394_v22 = vld [vmem:[#allocation80_spill] sm:$0xff] }
 0x7a8   :  { %v5955_v51 = vpop.f32.mrb[17].mxu1  ;;  %v5936_v33 = vpop.f32.mrb[19].mxu0  ;;  %6236 = vmatprep.subr.bf16.mxu0 %v9363_v0  ;;  %v5199_v0 = vcombine.high %v5183_v27, %v5183_v27 }
 0x7a9   :  { %v5956_v34 = vadd.f32 %v5955_v51, %v5954_v36  ;;  %v5957_v9 = vpop.f32.mrb[18].mxu1  ;;  %6257 = vmatpush3.bf16.msra.mxu1 %v8323_v48 }
 0x7aa   :  { %v5958_v37 = vpop.f32.mrb[19].mxu1  ;;  %6258 = vmatprep.subr.bf16.mxu1 %v9364_v1 }
 0x7ab   :  { %v4596_v45 = vadd.f32 %v5956_v34, %v5934_v57  ;;  %6237 = vmatpush3.bf16.msra.mxu0 %v9365_v56 }
 0x7ac   :  { %6238 = vmatprep.subr.bf16.mxu0 %v8332_v43 }
 0x7ad   :  { %6259 = vmatpush3.bf16.msra.mxu1 %v9366_v47 }
 0x7ae   :  { %6260 = vmatprep.subr.bf16.mxu1 %v8338_v32 }
 0x7af   :  { %6239 = vmatpush3.bf16.msra.mxu0 %v9394_v22 }
 0x7b1   :  { %6261 = vmatpush3.bf16.msra.mxu1 %v9395_v58 }
 0x7b2   :  { %5323 = vmatmul.mubr.bf16.vlgmr.msra.gmra.mrb[44].mxu0 %v5183_v27 }
 0x7b4   :  { %5363 = vmatmul.mubr.bf16.vlgmr.msra.gmra.mrb[44].mxu1 %v5199_v0 }
 0x7c5   :  { %v5976_v48 = vpop.f32.mrb[20].mxu0 }
 0x7c6   :  { %v5977_v1 = vpop.f32.mrb[21].mxu0 }
 0x7c7   :  { %v5998_v28 = vpop.f32.mrb[20].mxu1  ;;  %v5978_v56 = vadd.f32 %v5977_v1, %v5976_v48  ;;  %v5979_v5 = vpop.f32.mrb[22].mxu0 }
 0x7c8   :  { %v5999_v43 = vpop.f32.mrb[21].mxu1  ;;  %v5980_v61 = vpop.f32.mrb[23].mxu0 }
 0x7c9   :  { %v4636_v24 = vadd.f32 %v5978_v56, %v4596_v45  ;;  %v6000_v12 = vadd.f32 %v5999_v43, %v5998_v28  ;;  %v6001_v50 = vpop.f32.mrb[22].mxu1 }
 0x7ca   :  { %v6002_v47 = vpop.f32.mrb[23].mxu1 }
 0x7cb   :  { %v4676_v54 = vadd.f32 %v6000_v12, %v4636_v24 }
 0x7cd   :  { %v4681_v38 = vadd.f32 %v8627_v19, %v4676_v54 }
 0x7e5   :  { %v6020_v32 = vpop.f32.mrb[24].mxu0 }
 0x7e6   :  { %v6021_v31 = vpop.f32.mrb[25].mxu0 }
 0x7e7   :  { %v6042_v15 = vpop.f32.mrb[24].mxu1  ;;  %v6022_v8 = vadd.f32 %v6021_v31, %v6020_v32  ;;  %v6023_v23 = vpop.f32.mrb[26].mxu0 }
 0x7e8   :  { %v6043_v21 = vpop.f32.mrb[25].mxu1  ;;  %v6024_v44 = vpop.f32.mrb[27].mxu0 }
 0x7e9   :  { %v6044_v10 = vadd.f32 %v6043_v21, %v6042_v15  ;;  %v6045_v4 = vpop.f32.mrb[26].mxu1 }
 0x7ea   :  { %v6046_v35 = vpop.f32.mrb[27].mxu1 }
 0x7eb   :  { %v4817_v29 = vadd.f32 %v6044_v10, %v6022_v8 }
 0x805   :  { %v6064_v46 = vpop.f32.mrb[28].mxu0 }
 0x806   :  { %v6065_v30 = vpop.f32.mrb[29].mxu0 }
 0x807   :  { %v6086_v13 = vpop.f32.mrb[28].mxu1  ;;  %v6066_v20 = vadd.f32 %v6065_v30, %v6064_v46  ;;  %v6067_v14 = vpop.f32.mrb[30].mxu0 }
 0x808   :  { %v6087_v16 = vpop.f32.mrb[29].mxu1  ;;  %v6068_v25 = vpop.f32.mrb[31].mxu0 }
 0x809   :  { %v4857_v55 = vadd.f32 %v6066_v20, %v4817_v29  ;;  %v6088_v62 = vadd.f32 %v6087_v16, %v6086_v13  ;;  %v6089_v40 = vpop.f32.mrb[30].mxu1 }
 0x80a   :  { %v6090_v42 = vpop.f32.mrb[31].mxu1 }
 0x80b   :  { %v4897_v63 = vadd.f32 %v6088_v62, %v4857_v55 }
 0x80d   :  { %v4902_v60 = vadd.f32 %v4897_v63, %v4681_v38 }
 0x80f   :  { %v4910_v59 = vrot.slane %v4902_v60, %v8022_v41 }
 0x811   :  { %v4911_v49 = vcombine.high %v4910_v59, %v4910_v59  ;;  %5726 = vst.sshfl [vmem:[%s8710_s8 + $0x1] sm:$0x1 pattern:$0x73625140] %v4910_v59 }
 0x813   :  { %5727 = vst.sshfl [vmem:[%s8710_s8 + $0x5] sm:$0x1 pattern:$0x73625140] %v4911_v49 }
 0x825   :  { %v6108_v2 = vpop.f32.mrb[32].mxu0 }
 0x826   :  { %v6109_v3 = vpop.f32.mrb[33].mxu0 }
 0x827   :  { %v6130_v39 = vpop.f32.mrb[32].mxu1  ;;  %v6110_v17 = vadd.f32 %v6109_v3, %v6108_v2  ;;  %v6111_v26 = vpop.f32.mrb[34].mxu0 }
 0x828   :  { %v6131_v52 = vpop.f32.mrb[33].mxu1  ;;  %v6112_v7 = vpop.f32.mrb[35].mxu0 }
 0x829   :  { %v6132_v11 = vadd.f32 %v6131_v52, %v6130_v39  ;;  %v6133_v18 = vpop.f32.mrb[34].mxu1 }
 0x82a   :  { %v6134_v6 = vpop.f32.mrb[35].mxu1 }
 0x82b   :  { %v5064_v36 = vadd.f32 %v6132_v11, %v6110_v17 }
 0x845   :  { %v6152_v57 = vpop.f32.mrb[36].mxu0 }
 0x846   :  { %v6153_v53 = vpop.f32.mrb[37].mxu0 }
 0x847   :  { %v6174_v51 = vpop.f32.mrb[36].mxu1  ;;  %v6154_v33 = vadd.f32 %v6153_v53, %v6152_v57  ;;  %v6155_v34 = vpop.f32.mrb[38].mxu0 }
 0x848   :  { %v6175_v9 = vpop.f32.mrb[37].mxu1  ;;  %v6156_v37 = vpop.f32.mrb[39].mxu0 }
 0x849   :  { %v5104_v45 = vadd.f32 %v6154_v33, %v5064_v36  ;;  %v6176_v27 = vadd.f32 %v6175_v9, %v6174_v51  ;;  %v6177_v22 = vpop.f32.mrb[38].mxu1 }
 0x84a   :  { %v6178_v0 = vpop.f32.mrb[39].mxu1 }
 0x84b   :  { %v5144_v58 = vadd.f32 %v6176_v27, %v5104_v45 }
 0x84d   :  { %v5149_v29 = vadd.f32 %v8627_v19, %v5144_v58 }
 0x865   :  { %v6196_v48 = vpop.f32.mrb[40].mxu0 }
 0x866   :  { %v6197_v1 = vpop.f32.mrb[41].mxu0 }
 0x867   :  { %v6218_v28 = vpop.f32.mrb[40].mxu1  ;;  %v6198_v56 = vadd.f32 %v6197_v1, %v6196_v48  ;;  %v6199_v5 = vpop.f32.mrb[42].mxu0 }
 0x868   :  { %v6219_v43 = vpop.f32.mrb[41].mxu1  ;;  %v6200_v61 = vpop.f32.mrb[43].mxu0 }
 0x869   :  { %v6220_v24 = vadd.f32 %v6219_v43, %v6218_v28  ;;  %v6221_v12 = vpop.f32.mrb[42].mxu1 }
 0x86a   :  { %v6222_v50 = vpop.f32.mrb[43].mxu1 }
 0x86b   :  { %v5285_v47 = vadd.f32 %v6220_v24, %v6198_v56 }
 0x885   :  { %v6240_v54 = vpop.f32.mrb[44].mxu0 }
 0x886   :  { %v6241_v32 = vpop.f32.mrb[45].mxu0 }
 0x887   :  { %v6262_v31 = vpop.f32.mrb[44].mxu1  ;;  %v6242_v15 = vadd.f32 %v6241_v32, %v6240_v54  ;;  %v6243_v8 = vpop.f32.mrb[46].mxu0 }
 0x888   :  { %v6263_v23 = vpop.f32.mrb[45].mxu1  ;;  %v6244_v21 = vpop.f32.mrb[47].mxu0 }
 0x889   :  { %v5325_v44 = vadd.f32 %v6242_v15, %v5285_v47  ;;  %v6264_v10 = vadd.f32 %v6263_v23, %v6262_v31  ;;  %v6265_v4 = vpop.f32.mrb[46].mxu1 }
 0x88a   :  { %v6266_v35 = vpop.f32.mrb[47].mxu1 }
 0x88b   :  { %v5365_v46 = vadd.f32 %v6264_v10, %v5325_v44 }
 0x88d   :  { %v5370_v30 = vadd.f32 %v5365_v46, %v5149_v29 }
 0x88f   :  { %v5378_v13 = vrot.slane %v5370_v30, %v8022_v41 }
 0x891   :  { %v5379_v20 = vcombine.high %v5378_v13, %v5378_v13  ;;  %5728 = vst.sshfl [vmem:[%s8710_s8 + $0x2] sm:$0x1 pattern:$0x73625140] %v5378_v13 }
 0x893   :  { %5729 = vst.sshfl [vmem:[%s8710_s8 + $0x6] sm:$0x1 pattern:$0x73625140] %v5379_v20 }
 0x894   :  { %5402 = vsyncpa [#allocation7], 1 }
 0x895   :  { %5403 = vsyncpa [#allocation9], 1 }
 0x896   :  { %5404 = vsyncpa [#allocation12], 1 }
 0x897   :  { %5405 = vsyncpa [#allocation15], 1 }

</bundles_post_ra>
